<compile_context>
chip_gen: v7x
topology: tpu7x:2x2x1
jax: 0.10.0
libtpu: 0.0.40
codegen_flags: <defaults>
</compile_context>

<pallas_src>
import jax
import jax.numpy as jnp
from jax.experimental import pallas as pl
from jax.experimental.pallas import tpu as pltpu

NOISE_DIM = 100
H1, H2, H3, OUT = 256, 512, 1024, 784
OUT_PAD = 896        # 784 -> 896 (= 7*128); padded cols of W4/b4 are zero


def generator_kernel(x_ref,
                     w1_ref, b1_ref,
                     w2_ref, b2_ref,
                     w3_ref, b3_ref,
                     w4_ref, b4_ref,
                     o_ref):
    # Weights are bf16; matmuls accumulate in f32; bias/ReLU stay f32.
    x = x_ref[...]

    h = jnp.dot(x.astype(jnp.bfloat16), w1_ref[...],
                preferred_element_type=jnp.float32) + b1_ref[...]
    h = jnp.maximum(h, 0.0)                                      # ReLU

    h = jnp.dot(h.astype(jnp.bfloat16), w2_ref[...],
                preferred_element_type=jnp.float32) + b2_ref[...]
    h = jnp.maximum(h, 0.0)                                      # ReLU

    h = jnp.dot(h.astype(jnp.bfloat16), w3_ref[...],
                preferred_element_type=jnp.float32) + b3_ref[...]
    h = jnp.maximum(h, 0.0)                                      # ReLU

    h = jnp.dot(h.astype(jnp.bfloat16), w4_ref[...],
                preferred_element_type=jnp.float32) + b4_ref[...]
    # bf16 tanh + bf16 store: halves writeback bytes; v6e/v7x EUP has a native bf16 path.
    o_ref[...] = jnp.tanh(h.astype(jnp.bfloat16))                # Tanh


def _round_up(n, m):
    return -(-n // m) * m


def _pick_tm(b):
    """Batch-tile rows per grid step.

    B <= 128: single tile, padded only to a multiple of 16 (sublane pack) — avoids
    doing 16x the work for tiny batches.  B > 128: at least 2 grid steps (so v7x's
    second TensorCore is used), capped at 256 rows/step (matches v6e/v7x 256-wide MXU;
    still VMEM-safe on v5e's 16 MiB default scoped limit with single-buffered weights).
    """
    if b <= 128:
        return _round_up(b, 16)
    half = _round_up(b, 2) // 2
    return min(256, _round_up(half, 128))


def generator_forward(x, padded_params):
    """x: [B, NOISE_DIM] float.  Returns [B, OUT] f32."""
    (w1, b1), (w2, b2), (w3, b3), (w4, b4) = padded_params
    B = x.shape[0]
    tm = _pick_tm(B)
    n_tiles = pl.cdiv(B, tm)
    b_pad = n_tiles * tm

    x = x.astype(jnp.float32)
    if b_pad != B:
        # Pad only the batch dimension; the noise/feature dim stays at 100
        # (full-extent block — Mosaic lane-pads K internally).
        x = jnp.pad(x, ((0, b_pad - B), (0, 0)))

    def const(i):            # weights/biases: same block every step -> VMEM resident
        return (0, 0)

    # Resident (never-changing) blocks: single-buffer to halve their VMEM footprint.
    resident = dict(index_map=const, pipeline_mode=pl.Buffered(1))

    cost = pl.CostEstimate(
        flops=2 * b_pad * (NOISE_DIM * H1 + H1 * H2 + H2 * H3 + H3 * OUT_PAD),
        transcendentals=b_pad * OUT_PAD,
        bytes_accessed=(2 * (NOISE_DIM * H1 + H1 * H2 + H2 * H3 + H3 * OUT_PAD)  # bf16 weights
                        + 4 * (H1 + H2 + H3 + OUT_PAD)                           # f32 biases
                        + 4 * b_pad * NOISE_DIM                                  # f32 input
                        + 2 * b_pad * OUT_PAD),                                  # bf16 output
    )

    out_pad = pl.pallas_call(
        generator_kernel,
        out_shape=jax.ShapeDtypeStruct((b_pad, OUT_PAD), jnp.bfloat16),
        grid=(n_tiles,),
        in_specs=[
            pl.BlockSpec((tm, NOISE_DIM), lambda i: (i, 0)),
            pl.BlockSpec((NOISE_DIM, H1), **resident), pl.BlockSpec((1, H1), **resident),
            pl.BlockSpec((H1, H2), **resident),        pl.BlockSpec((1, H2), **resident),
            pl.BlockSpec((H2, H3), **resident),        pl.BlockSpec((1, H3), **resident),
            pl.BlockSpec((H3, OUT_PAD), **resident),   pl.BlockSpec((1, OUT_PAD), **resident),
        ],
        out_specs=pl.BlockSpec((tm, OUT_PAD), lambda i: (i, 0)),
        compiler_params=pltpu.CompilerParams(
            dimension_semantics=("parallel",)),   # batch tiles shard across v7x's 2 TCs
        cost_estimate=cost,
    )(x, w1, b1, w2, b2, w3, b3, w4, b4)

    # Slice off batch / output-column padding; cast back to f32 (fuses with the slice).
    return out_pad[:B, :OUT].astype(jnp.float32)


def init_linear(key, fan_in, fan_out):
    # Matches torch.nn.Linear default init: U(-1/sqrt(fan_in), 1/sqrt(fan_in)).
    kw, kb = jax.random.split(key)
    bound = 1.0 / jnp.sqrt(jnp.float32(fan_in))
    # Stored as [in, out] (transposed vs. PyTorch's [out, in]); bias as [1, out].
    w = jax.random.uniform(kw, (fan_in, fan_out), jnp.float32, -bound, bound)
    b = jax.random.uniform(kb, (1, fan_out), jnp.float32, -bound, bound)
    return w, b


def prepare_params(raw_params):
    """Zero-pad final layer to OUT_PAD and cast weights to bf16 (biases stay f32)."""
    (w1, b1), (w2, b2), (w3, b3), (w4, b4) = raw_params
    w4p = jnp.zeros((H3, OUT_PAD), jnp.float32).at[:, :OUT].set(w4)
    b4p = jnp.zeros((1, OUT_PAD), jnp.float32).at[:, :OUT].set(b4)
    return [
        (w1.astype(jnp.bfloat16), b1),
        (w2.astype(jnp.bfloat16), b2),
        (w3.astype(jnp.bfloat16), b3),
        (w4p.astype(jnp.bfloat16), b4p),
    ]


def reference_forward(x, padded_params):
    """Pure-JAX reference with matching bf16-weight / f32-accumulate semantics.

    Note: activations are quantized to bf16 between layers and the output is bf16,
    so results differ slightly from a pure-f32 PyTorch Generator (benign for a GAN).
    """
    h = x.astype(jnp.float32)
    for i, (w, b) in enumerate(padded_params):
        h = jnp.dot(h.astype(jnp.bfloat16).astype(jnp.float32),
                    w.astype(jnp.float32),
                    precision=jax.lax.Precision.HIGHEST) + b
        h = jnp.tanh(h) if i == len(padded_params) - 1 else jnp.maximum(h, 0.0)
    return h[:, :OUT]


if __name__ == "__main__":
    key = jax.random.PRNGKey(0)
    k_x, k1, k2, k3, k4 = jax.random.split(key, 5)

    batch = 8   # small driver batch; wrapper pads batch to a multiple of 16 only
    x = jax.random.normal(k_x, (batch, NOISE_DIM), jnp.float32)

    raw_params = [
        init_linear(k1, NOISE_DIM, H1),
        init_linear(k2, H1, H2),
        init_linear(k3, H2, H3),
        init_linear(k4, H3, OUT),
    ]
    params = prepare_params(raw_params)

    out = generator_forward(x, params)
    out = jax.block_until_ready(out)

    ref = reference_forward(x, params)
    assert out.shape == (batch, OUT), out.shape
    max_err = float(jnp.max(jnp.abs(out - ref)))
    assert jnp.allclose(out, ref, atol=2e-2, rtol=2e-2), f"mismatch vs reference (max_err={max_err})"

    print("KERNEL_OK")
</pallas_src>

<mosaic_0001>
module attributes {stable_mosaic.version = 11 : i64} {
  func.func @generator_kernel(%arg0: i32, %arg1: memref<16x100xf32, #tpu.memory_space<vmem>>, %arg2: memref<100x256xbf16, #tpu.memory_space<vmem>>, %arg3: memref<1x256xf32, #tpu.memory_space<vmem>>, %arg4: memref<256x512xbf16, #tpu.memory_space<vmem>>, %arg5: memref<1x512xf32, #tpu.memory_space<vmem>>, %arg6: memref<512x1024xbf16, #tpu.memory_space<vmem>>, %arg7: memref<1x1024xf32, #tpu.memory_space<vmem>>, %arg8: memref<1024x896xbf16, #tpu.memory_space<vmem>>, %arg9: memref<1x896xf32, #tpu.memory_space<vmem>>, %arg10: memref<16x896xbf16, #tpu.memory_space<vmem>>) attributes {dimension_semantics = [#tpu.dimension_semantics<parallel>], iteration_bounds = array<i64: 1>, scalar_prefetch = 0 : i64, scratch_operands = 0 : i64, tpu.core_type = #tpu.core_type<tc>, window_params = [{transform_indices = @transform_0, window_bounds = array<i64: 16, 100>}, {pipeline_mode = #tpu.pipeline_mode<synchronous>, transform_indices = @transform_1, window_bounds = array<i64: 100, 256>}, {pipeline_mode = #tpu.pipeline_mode<synchronous>, transform_indices = @transform_2, window_bounds = array<i64: 1, 256>}, {pipeline_mode = #tpu.pipeline_mode<synchronous>, transform_indices = @transform_3, window_bounds = array<i64: 256, 512>}, {pipeline_mode = #tpu.pipeline_mode<synchronous>, transform_indices = @transform_4, window_bounds = array<i64: 1, 512>}, {pipeline_mode = #tpu.pipeline_mode<synchronous>, transform_indices = @transform_5, window_bounds = array<i64: 512, 1024>}, {pipeline_mode = #tpu.pipeline_mode<synchronous>, transform_indices = @transform_6, window_bounds = array<i64: 1, 1024>}, {pipeline_mode = #tpu.pipeline_mode<synchronous>, transform_indices = @transform_7, window_bounds = array<i64: 1024, 896>}, {pipeline_mode = #tpu.pipeline_mode<synchronous>, transform_indices = @transform_8, window_bounds = array<i64: 1, 896>}, {transform_indices = @transform_9, window_bounds = array<i64: 16, 896>}]} {
    %c0 = arith.constant 0 : index
    %c0_0 = arith.constant 0 : index
    %0 = vector.load %arg1[%c0, %c0_0] : memref<16x100xf32, #tpu.memory_space<vmem>>, vector<16x100xf32>
    %1 = arith.truncf %0 : vector<16x100xf32> to vector<16x100xbf16>
    %c0_1 = arith.constant 0 : index
    %c0_2 = arith.constant 0 : index
    %2 = vector.load %arg2[%c0_1, %c0_2] : memref<100x256xbf16, #tpu.memory_space<vmem>>, vector<100x256xbf16>
    %cst = arith.constant dense<0.000000e+00> : vector<16x256xf32>
    %3 = tpu.matmul %1, %2, %cst {dimension_numbers = #tpu.dot_dimension_numbers<[1], [0], [0], [1], [0, 0, 1, 1], [], []>} : vector<16x100xbf16>, vector<100x256xbf16>, vector<16x256xf32> -> vector<16x256xf32>
    %c0_3 = arith.constant 0 : index
    %c0_4 = arith.constant 0 : index
    %4 = vector.load %arg3[%c0_3, %c0_4] : memref<1x256xf32, #tpu.memory_space<vmem>>, vector<1x256xf32>
    %5 = vector.broadcast %4 : vector<1x256xf32> to vector<16x256xf32>
    %6 = arith.addf %3, %5 : vector<16x256xf32>
    %cst_5 = arith.constant 0.000000e+00 : f32
    %7 = vector.broadcast %cst_5 : f32 to vector<16x256xf32>
    %8 = arith.maximumf %6, %7 : vector<16x256xf32>
    %9 = arith.truncf %8 : vector<16x256xf32> to vector<16x256xbf16>
    %c0_6 = arith.constant 0 : index
    %c0_7 = arith.constant 0 : index
    %10 = vector.load %arg4[%c0_6, %c0_7] : memref<256x512xbf16, #tpu.memory_space<vmem>>, vector<256x512xbf16>
    %cst_8 = arith.constant dense<0.000000e+00> : vector<16x512xf32>
    %11 = tpu.matmul %9, %10, %cst_8 {dimension_numbers = #tpu.dot_dimension_numbers<[1], [0], [0], [1], [0, 0, 1, 1], [], []>} : vector<16x256xbf16>, vector<256x512xbf16>, vector<16x512xf32> -> vector<16x512xf32>
    %c0_9 = arith.constant 0 : index
    %c0_10 = arith.constant 0 : index
    %12 = vector.load %arg5[%c0_9, %c0_10] : memref<1x512xf32, #tpu.memory_space<vmem>>, vector<1x512xf32>
    %13 = vector.broadcast %12 : vector<1x512xf32> to vector<16x512xf32>
    %14 = arith.addf %11, %13 : vector<16x512xf32>
    %cst_11 = arith.constant 0.000000e+00 : f32
    %15 = vector.broadcast %cst_11 : f32 to vector<16x512xf32>
    %16 = arith.maximumf %14, %15 : vector<16x512xf32>
    %17 = arith.truncf %16 : vector<16x512xf32> to vector<16x512xbf16>
    %c0_12 = arith.constant 0 : index
    %c0_13 = arith.constant 0 : index
    %18 = vector.load %arg6[%c0_12, %c0_13] : memref<512x1024xbf16, #tpu.memory_space<vmem>>, vector<512x1024xbf16>
    %cst_14 = arith.constant dense<0.000000e+00> : vector<16x1024xf32>
    %19 = tpu.matmul %17, %18, %cst_14 {dimension_numbers = #tpu.dot_dimension_numbers<[1], [0], [0], [1], [0, 0, 1, 1], [], []>} : vector<16x512xbf16>, vector<512x1024xbf16>, vector<16x1024xf32> -> vector<16x1024xf32>
    %c0_15 = arith.constant 0 : index
    %c0_16 = arith.constant 0 : index
    %20 = vector.load %arg7[%c0_15, %c0_16] : memref<1x1024xf32, #tpu.memory_space<vmem>>, vector<1x1024xf32>
    %21 = vector.broadcast %20 : vector<1x1024xf32> to vector<16x1024xf32>
    %22 = arith.addf %19, %21 : vector<16x1024xf32>
    %cst_17 = arith.constant 0.000000e+00 : f32
    %23 = vector.broadcast %cst_17 : f32 to vector<16x1024xf32>
    %24 = arith.maximumf %22, %23 : vector<16x1024xf32>
    %25 = arith.truncf %24 : vector<16x1024xf32> to vector<16x1024xbf16>
    %c0_18 = arith.constant 0 : index
    %c0_19 = arith.constant 0 : index
    %26 = vector.load %arg8[%c0_18, %c0_19] : memref<1024x896xbf16, #tpu.memory_space<vmem>>, vector<1024x896xbf16>
    %cst_20 = arith.constant dense<0.000000e+00> : vector<16x896xf32>
    %27 = tpu.matmul %25, %26, %cst_20 {dimension_numbers = #tpu.dot_dimension_numbers<[1], [0], [0], [1], [0, 0, 1, 1], [], []>} : vector<16x1024xbf16>, vector<1024x896xbf16>, vector<16x896xf32> -> vector<16x896xf32>
    %c0_21 = arith.constant 0 : index
    %c0_22 = arith.constant 0 : index
    %28 = vector.load %arg9[%c0_21, %c0_22] : memref<1x896xf32, #tpu.memory_space<vmem>>, vector<1x896xf32>
    %29 = vector.broadcast %28 : vector<1x896xf32> to vector<16x896xf32>
    %30 = arith.addf %27, %29 : vector<16x896xf32>
    %31 = arith.truncf %30 : vector<16x896xf32> to vector<16x896xbf16>
    %32 = math.tanh %31 : vector<16x896xbf16>
    %c0_23 = arith.constant 0 : index
    %c0_24 = arith.constant 0 : index
    %33 = vector.load %arg10[%c0_23, %c0_24] : memref<16x896xbf16, #tpu.memory_space<vmem>>, vector<16x896xbf16>
    tpu.vector_store %arg10[%c0_23, %c0_24], %32 {strides = array<i32>} : memref<16x896xbf16, #tpu.memory_space<vmem>>, vector<16x896xbf16>,
    return
  }
  func.func @transform_0(%arg0: i32) -> (i32, i32) {
    %c0_i32 = arith.constant 0 : i32
    %c0_i32_0 = arith.constant 0 : i32
    return %arg0, %c0_i32 : i32, i32
  }
  func.func @transform_1(%arg0: i32) -> (i32, i32) {
    %c0_i32 = arith.constant 0 : i32
    %c0_i32_0 = arith.constant 0 : i32
    %c0_i32_1 = arith.constant 0 : i32
    return %c0_i32, %c0_i32_0 : i32, i32
  }
  func.func @transform_2(%arg0: i32) -> (i32, i32) {
    %c0_i32 = arith.constant 0 : i32
    %c0_i32_0 = arith.constant 0 : i32
    %c0_i32_1 = arith.constant 0 : i32
    return %c0_i32, %c0_i32_0 : i32, i32
  }
  func.func @transform_3(%arg0: i32) -> (i32, i32) {
    %c0_i32 = arith.constant 0 : i32
    %c0_i32_0 = arith.constant 0 : i32
    %c0_i32_1 = arith.constant 0 : i32
    return %c0_i32, %c0_i32_0 : i32, i32
  }
  func.func @transform_4(%arg0: i32) -> (i32, i32) {
    %c0_i32 = arith.constant 0 : i32
    %c0_i32_0 = arith.constant 0 : i32
    %c0_i32_1 = arith.constant 0 : i32
    return %c0_i32, %c0_i32_0 : i32, i32
  }
  func.func @transform_5(%arg0: i32) -> (i32, i32) {
    %c0_i32 = arith.constant 0 : i32
    %c0_i32_0 = arith.constant 0 : i32
    %c0_i32_1 = arith.constant 0 : i32
    return %c0_i32, %c0_i32_0 : i32, i32
  }
  func.func @transform_6(%arg0: i32) -> (i32, i32) {
    %c0_i32 = arith.constant 0 : i32
    %c0_i32_0 = arith.constant 0 : i32
    %c0_i32_1 = arith.constant 0 : i32
    return %c0_i32, %c0_i32_0 : i32, i32
  }
  func.func @transform_7(%arg0: i32) -> (i32, i32) {
    %c0_i32 = arith.constant 0 : i32
    %c0_i32_0 = arith.constant 0 : i32
    %c0_i32_1 = arith.constant 0 : i32
    return %c0_i32, %c0_i32_0 : i32, i32
  }
  func.func @transform_8(%arg0: i32) -> (i32, i32) {
    %c0_i32 = arith.constant 0 : i32
    %c0_i32_0 = arith.constant 0 : i32
    %c0_i32_1 = arith.constant 0 : i32
    return %c0_i32, %c0_i32_0 : i32, i32
  }
  func.func @transform_9(%arg0: i32) -> (i32, i32) {
    %c0_i32 = arith.constant 0 : i32
    %c0_i32_0 = arith.constant 0 : i32
    return %arg0, %c0_i32 : i32, i32
  }
}

</mosaic_0001>

<bundles_post_ra>
// kernel: tpu_custom_call.1
= control target key start
LH: loop header
LB: loop body
LE: loop exit
PB: predicated region body
PF: predicated region fallthrough
CT: control target
= control target key end

     0   :  { %14 = vsyncpa [#allocation3], 0  ;;  %s8720_s0 = inlined_call_operand.hbm [shape: f32[16,100], index: 0, kind: input, shape index: {}]   ;;  %s8721_s1 = inlined_call_operand.hbm [shape: bf16[100,256], index: 1, kind: input, shape index: {}]   ;;  %s8722_s2 = inlined_call_operand.hbm [shape: f32[1,256], index: 2, kind: input, shape index: {}]   ;;  %s8723_s3 = inlined_call_operand.hbm [shape: bf16[256,512], index: 3, kind: input, shape index: {}]   ;;  %s8724_s4 = inlined_call_operand.hbm [shape: f32[1,512], index: 4, kind: input, shape index: {}]   ;;  %s8725_s5 = inlined_call_operand.hbm [shape: bf16[512,1024], index: 5, kind: input, shape index: {}]   ;;  %s8726_s6 = inlined_call_operand.hbm [shape: f32[1,1024], index: 6, kind: input, shape index: {}]   ;;  %s8727_s7 = inlined_call_operand.hbm [shape: bf16[1024,896], index: 7, kind: input, shape index: {}]   ;;  %s8728_s8 = inlined_call_operand.hbm [shape: f32[1,896], index: 8, kind: input, shape index: {}]   ;;  %s8729_s9 = inlined_call_operand.hbm [shape: bf16[16,896], index: 9, kind: output, shape index: {}]  }
   0x1   :  { %15 = vsyncpa [#allocation6], 0 }
   0x2   :  { %16 = vsyncpa [#allocation9], 0 }
   0x3   :  { %17 = vsyncpa [#allocation12], 0 }
   0x4   :  { %18 = vsyncpa [#allocation15], 0 }
   0x5   :  { %19 = vsyncpa [#allocation4], 0  ;;  %s8345_s30 = smov [#allocation5]   ;;  %s8346_s11 = smov [#allocation8]  }
   0x6   :  { %s37_s10 = sshll.u32 %s8345_s30, 4  ;;  %s59_s12 = sshll.u32 %s8346_s11, 4  ;;  %s38_s10 = int_to_ptr.vmem [resolvable:$true] %s37_s10  ;;  %s8414_s12 = int_to_ptr.vmem [resolvable:$true] %s59_s12 }
   0x7   :  { %s8113_s15 = scalar_lea.hbm %s8721_s1, 1664 }
   0x8   :  { %p8114_p0 = scmp.ne.s32.totalorder %s8721_s1, %s8113_s15  ;;  %p8117_p1 = scmp.lt.u32.totalorder %s8113_s15, %s8721_s1 }
   0xa   :  { %p8119_p2 = pnand %p8117_p1, %p8114_p0 }
   0xc   :  { %8122 = shalt.err (!%p8119_p2)
}
   0xd   :  { %s8123_s20 = scalar_lea.vmem %s38_s10, 1664  ;;  %p8128_p4 = scmp.lt.s32.totalorder %s38_s10, %s38_s10 }
   0xe   :  { %p8124_p3 = scmp.ne.s32.totalorder %s38_s10, %s8123_s20  ;;  %p8129_p5 = scmp.lt.s32.totalorder %s8123_s20, %s8123_s20 }
  0x10   :  { %p8130_p6 = por %p8129_p5, %p8128_p4 }
  0x12   :  { %p8131_p7 = pnand %p8130_p6, %p8124_p3 }
  0x14   :  { %8134 = shalt.err (!%p8131_p7)
}
  0x15   :  { %s8347_s21 = smov 128   ;;  %s8348_s22 = smov 8  }
  0x16   :  { %43 = dma.hbm_to_vmem [thread:$0]  %s8721_s1, 1664, %s38_s10, [#allocation6], %s8347_s21, %s8347_s21, %s8348_s22  }
  0x17   :  { %s8135_s27 = scalar_lea.hbm %s8723_s3, 8192 }
  0x18   :  { %p8136_p8 = scmp.ne.s32.totalorder %s8723_s3, %s8135_s27  ;;  %p8139_p9 = scmp.lt.u32.totalorder %s8135_s27, %s8723_s3 }
  0x1a   :  { %p8141_p10 = pnand %p8139_p9, %p8136_p8 }
  0x1c   :  { %8144 = shalt.err (!%p8141_p10)
}
  0x1d   :  { %s8145_s13 = scalar_lea.vmem %s8414_s12, 8192  ;;  %p8150_p12 = scmp.lt.s32.totalorder %s8414_s12, %s8414_s12 }
  0x1e   :  { %p8146_p11 = scmp.ne.s32.totalorder %s8414_s12, %s8145_s13  ;;  %p8151_p13 = scmp.lt.s32.totalorder %s8145_s13, %s8145_s13 }
  0x20   :  { %p8152_p0 = por %p8151_p13, %p8150_p12 }
  0x22   :  { %p8153_p1 = pnand %p8152_p0, %p8146_p11 }
  0x24   :  { %8156 = shalt.err (!%p8153_p1)
}
  0x25   :  { %s8349_s1 = smov 256   ;;  %s8350_s10 = smov 16  }
  0x26   :  { %65 = dma.hbm_to_vmem [thread:$0]  %s8723_s3, 8192, %s8414_s12, [#allocation9], %s8349_s1, %s8349_s1, %s8350_s10  }
  0x27   :  { %s8351_s16 = smov [#allocation11]   ;;  %s8157_s20 = scalar_lea.hbm %s8725_s5, 32768 }
  0x28   :  { %s81_s17 = sshll.u32 %s8351_s16, 4  ;;  %p8158_p2 = scmp.ne.s32.totalorder %s8725_s5, %s8157_s20  ;;  %s82_s17 = int_to_ptr.vmem [resolvable:$true] %s81_s17 }
  0x29   :  { %p8161_p3 = scmp.lt.u32.totalorder %s8157_s20, %s8725_s5 }
  0x2b   :  { %p8163_p4 = pnand %p8161_p3, %p8158_p2 }
  0x2d   :  { %8166 = shalt.err (!%p8163_p4)
}
  0x2e   :  { %s8167_s27 = scalar_lea.vmem %s82_s17, 32768  ;;  %p8172_p6 = scmp.lt.s32.totalorder %s82_s17, %s82_s17 }
  0x2f   :  { %p8168_p5 = scmp.ne.s32.totalorder %s82_s17, %s8167_s27  ;;  %p8173_p7 = scmp.lt.s32.totalorder %s8167_s27, %s8167_s27 }
  0x31   :  { %p8174_p8 = por %p8173_p7, %p8172_p6 }
  0x33   :  { %p8175_p9 = pnand %p8174_p8, %p8168_p5 }
  0x35   :  { %8178 = shalt.err (!%p8175_p9)
}
  0x36   :  { %s8352_s3 = smov 512   ;;  %s8353_s12 = smov 32  }
  0x37   :  { %87 = dma.hbm_to_vmem [thread:$0]  %s8725_s5, 32768, %s82_s17, [#allocation12], %s8352_s3, %s8352_s3, %s8353_s12  }
  0x38   :  { %s8354_s30 = smov [#allocation14]   ;;  %s8179_s10 = scalar_lea.hbm %s8727_s7, 57344 }
  0x39   :  { %s103_s11 = sshll.u32 %s8354_s30, 4  ;;  %p8180_p10 = scmp.ne.s32.totalorder %s8727_s7, %s8179_s10  ;;  %s104_s11 = int_to_ptr.vmem [resolvable:$true] %s103_s11 }
  0x3a   :  { %p8183_p11 = scmp.lt.u32.totalorder %s8179_s10, %s8727_s7 }
  0x3c   :  { %p8185_p12 = pnand %p8183_p11, %p8180_p10 }
  0x3e   :  { %8188 = shalt.err (!%p8185_p12)
}
  0x3f   :  { %s8189_s19 = scalar_lea.vmem %s104_s11, 57344  ;;  %p8194_p0 = scmp.lt.s32.totalorder %s104_s11, %s104_s11 }
  0x40   :  { %p8190_p13 = scmp.ne.s32.totalorder %s104_s11, %s8189_s19  ;;  %p8195_p1 = scmp.lt.s32.totalorder %s8189_s19, %s8189_s19 }
  0x42   :  { %p8196_p2 = por %p8195_p1, %p8194_p0 }
  0x44   :  { %p8197_p3 = pnand %p8196_p2, %p8190_p13 }
  0x46   :  { %8200 = shalt.err (!%p8197_p3)
}
  0x47   :  { %s8355_s5 = smov 448   ;;  %s8356_s17 = smov 28  }
  0x48   :  { %109 = dma.hbm_to_vmem [thread:$0]  %s8727_s7, 57344, %s104_s11, [#allocation15], %s8355_s5, %s8355_s5, %s8356_s17  }
  0x49   :  { %s8357_s24 = smov [#allocation2]   ;;  %s8358_s26 = smov [#allocation7]  }
  0x4a   :  { %s25_s25 = sshll.u32 %s8357_s24, 4  ;;  %s50_s27 = sshll.u32 %s8358_s26, 4  ;;  %s26_s25 = int_to_ptr.vmem [resolvable:$true] %s25_s25  ;;  %s51_s27 = int_to_ptr.vmem [resolvable:$true] %s50_s27 }
  0x4b   :  { %s8201_s28 = scalar_lea.hbm %s8720_s0, 256 }
  0x4c   :  { %p8202_p4 = scmp.ne.s32.totalorder %s8720_s0, %s8201_s28  ;;  %p8205_p5 = scmp.lt.u32.totalorder %s8201_s28, %s8720_s0 }
  0x4e   :  { %p8207_p6 = pnand %p8205_p5, %p8202_p4 }
  0x50   :  { %8210 = shalt.err (!%p8207_p6)
}
  0x51   :  { %s8211_s7 = scalar_lea.vmem %s26_s25, 256  ;;  %p8216_p8 = scmp.lt.s32.totalorder %s26_s25, %s26_s25 }
  0x52   :  { %p8212_p7 = scmp.ne.s32.totalorder %s26_s25, %s8211_s7  ;;  %p8217_p9 = scmp.lt.s32.totalorder %s8211_s7, %s8211_s7 }
  0x54   :  { %p8218_p10 = por %p8217_p9, %p8216_p8 }
  0x56   :  { %p8219_p11 = pnand %p8218_p10, %p8212_p7 }
  0x58   :  { %8222 = shalt.err (!%p8219_p11)
}
  0x59   :  { %31 = dma.hbm_to_vmem [thread:$0]  %s8720_s0, 256, %s26_s25, [#allocation3], %s8347_s21, %s8347_s21, %s8348_s22  }
  0x5a   :  { %s8223_s16 = scalar_lea.hbm %s8722_s2, 32 }
  0x5b   :  { %p8224_p12 = scmp.ne.s32.totalorder %s8722_s2, %s8223_s16  ;;  %p8227_p13 = scmp.lt.u32.totalorder %s8223_s16, %s8722_s2 }
  0x5d   :  { %p8229_p0 = pnand %p8227_p13, %p8224_p12 }
  0x5f   :  { %8232 = shalt.err (!%p8229_p0)
}
  0x60   :  { %s8233_s24 = scalar_lea.vmem %s51_s27, 32  ;;  %p8238_p2 = scmp.lt.s32.totalorder %s51_s27, %s51_s27 }
  0x61   :  { %p8234_p1 = scmp.ne.s32.totalorder %s51_s27, %s8233_s24  ;;  %p8239_p3 = scmp.lt.s32.totalorder %s8233_s24, %s8233_s24 }
  0x63   :  { %p8240_p4 = por %p8239_p3, %p8238_p2 }
  0x65   :  { %p8241_p5 = pnand %p8240_p4, %p8234_p1 }
  0x67   :  { %8244 = shalt.err (!%p8241_p5)
}
  0x68   :  { %53 = dma.hbm_to_vmem [thread:$0]  %s8722_s2, 32, %s51_s27, [#allocation6]  }
  0x69   :  { %s8359_s22 = smov [#allocation10]   ;;  %s8360_s26 = smov [#allocation13]  }
  0x6a   :  { %s72_s25 = sshll.u32 %s8359_s22, 4  ;;  %s94_s3 = sshll.u32 %s8360_s26, 4  ;;  %s73_s25 = int_to_ptr.vmem [resolvable:$true] %s72_s25  ;;  %s95_s3 = int_to_ptr.vmem [resolvable:$true] %s94_s3 }
  0x6b   :  { %s8245_s29 = scalar_lea.hbm %s8724_s4, 64 }
  0x6c   :  { %p8246_p6 = scmp.ne.s32.totalorder %s8724_s4, %s8245_s29  ;;  %p8249_p7 = scmp.lt.u32.totalorder %s8245_s29, %s8724_s4 }
  0x6e   :  { %p8251_p8 = pnand %p8249_p7, %p8246_p6 }
  0x70   :  { %8254 = shalt.err (!%p8251_p8)
}
  0x71   :  { %s8255_s2 = scalar_lea.vmem %s73_s25, 64  ;;  %p8260_p10 = scmp.lt.s32.totalorder %s73_s25, %s73_s25 }
  0x72   :  { %p8256_p9 = scmp.ne.s32.totalorder %s73_s25, %s8255_s2  ;;  %p8261_p11 = scmp.lt.s32.totalorder %s8255_s2, %s8255_s2 }
  0x74   :  { %p8262_p12 = por %p8261_p11, %p8260_p10 }
  0x76   :  { %p8263_p13 = pnand %p8262_p12, %p8256_p9 }
  0x78   :  { %8266 = shalt.err (!%p8263_p13)
}
  0x79   :  { %75 = dma.hbm_to_vmem [thread:$0]  %s8724_s4, 64, %s73_s25, [#allocation9]  }
  0x7a   :  { %s8267_s15 = scalar_lea.hbm %s8726_s6, 128 }
  0x7b   :  { %p8268_p0 = scmp.ne.s32.totalorder %s8726_s6, %s8267_s15  ;;  %p8271_p1 = scmp.lt.u32.totalorder %s8267_s15, %s8726_s6 }
  0x7d   :  { %p8273_p2 = pnand %p8271_p1, %p8268_p0 }
  0x7f   :  { %8276 = shalt.err (!%p8273_p2)
}
  0x80   :  { %s8277_s23 = scalar_lea.vmem %s95_s3, 128  ;;  %p8282_p4 = scmp.lt.s32.totalorder %s95_s3, %s95_s3 }
  0x81   :  { %p8278_p3 = scmp.ne.s32.totalorder %s95_s3, %s8277_s23  ;;  %p8283_p5 = scmp.lt.s32.totalorder %s8277_s23, %s8277_s23 }
  0x83   :  { %p8284_p6 = por %p8283_p5, %p8282_p4 }
  0x85   :  { %p8285_p7 = pnand %p8284_p6, %p8278_p3 }
  0x87   :  { %8288 = shalt.err (!%p8285_p7)
}
  0x88   :  { %97 = dma.hbm_to_vmem [thread:$0]  %s8726_s6, 128, %s95_s3, [#allocation12]  }
  0x89   :  { %s8361_s0 = smov [#allocation16]   ;;  %s8289_s26 = scalar_lea.hbm %s8728_s8, 112 }
  0x8a   :  { %s116_s21 = sshll.u32 %s8361_s0, 4  ;;  %p8290_p8 = scmp.ne.s32.totalorder %s8728_s8, %s8289_s26  ;;  %s117_s21 = int_to_ptr.vmem [resolvable:$true] %s116_s21 }
  0x8b   :  { %p8293_p9 = scmp.lt.u32.totalorder %s8289_s26, %s8728_s8 }
  0x8d   :  { %p8295_p10 = pnand %p8293_p9, %p8290_p8 }
  0x8f   :  { %8298 = shalt.err (!%p8295_p10)
}
  0x90   :  { %s8299_s13 = scalar_lea.vmem %s117_s21, 112  ;;  %s8303_s6 = scalar_lea.vmem %s117_s21, 128 }
  0x91   :  { %p8300_p11 = scmp.ne.s32.totalorder %s117_s21, %s8299_s13  ;;  %p8304_p12 = scmp.lt.s32.totalorder %s117_s21, %s117_s21 }
  0x92   :  { %p8305_p13 = scmp.lt.s32.totalorder %s8303_s6, %s8299_s13 }
  0x94   :  { %p8306_p0 = por %p8305_p13, %p8304_p12 }
  0x96   :  { %p8307_p1 = pnand %p8306_p0, %p8300_p11 }
  0x98   :  { %8310 = shalt.err (!%p8307_p1)
}
  0x99   :  { %119 = dma.hbm_to_vmem [thread:$0]  %s8728_s8, 112, %s117_s21, [#allocation15]  }
  0x9a   :  { %8333 = dma.done.wait [#allocation3], 256  }
  0x9b   :  { %8334 = vsyncadd [#allocation3], 4294967040 }
  0x9c   :  { %8335 = dma.done.wait [#allocation6], 1696  }
  0x9d   :  { %8336 = vsyncadd [#allocation6], 4294965600 }
  0x9e   :  { %8337 = dma.done.wait [#allocation9], 8256  }
  0x9f   :  { %8338 = vsyncadd [#allocation9], 4294959040 }
  0xa0   :  { %8339 = dma.done.wait [#allocation12], 32896  }
  0xa1   :  { %8340 = vsyncadd [#allocation12], 4294934400 }
  0xa2   :  { %8341 = dma.done.wait [#allocation15], 57456  }
  0xa3   :  { %8342 = vsyncadd [#allocation15], 4294909840  ;;  %v8362_v0 = vmov 0   ;;  %v7343_v1 = vld [vmem:[#allocation5 + $0x4] ss:$8 sps:$4 sm:$0xff]   ;;  %vm245_vm0 = vcmask 1041408  }
  0xa4   :  { %284 = vmatprep.mubr.bf16.mxu0 %v8362_v0  ;;  %v7345_v2 = vld [vmem:[#allocation5] ss:$8 sps:$4 sm:$0xff]   ;;  %252 = vmatprep.subr.bf16.mxu0 %v7343_v1  ;;  %v7346_v3 = vld [vmem:[#allocation5 + $0x14] ss:$8 sps:$4 sm:$0xff]   ;;  %v7348_v4 = vld [vmem:[#allocation5 + $0x10] ss:$8 sps:$4 sm:$0xff]  }
  0xa5   :  { %253 = vmatpush1.bf16.msra.mxu0 %v7345_v2  ;;  %v7349_v5 = vld [vmem:[#allocation5 + $0x24] ss:$8 sps:$4 sm:$0xff]   ;;  %v7351_v6 = vld [vmem:[#allocation5 + $0x20] ss:$8 sps:$4 sm:$0xff]   ;;  %v7352_v7 = vld [vmem:[#allocation5 + $0x34] ss:$8 sps:$4 sm:$0xff]  }
  0xa6   :  { %254 = vmatprep.subr.bf16.mxu0 %v7346_v3  ;;  %v7354_v8 = vld [vmem:[#allocation5 + $0x30] ss:$8 sps:$4 sm:$0xff]   ;;  %v7355_v9 = vld [vmem:[#allocation5 + $0x44] ss:$8 sps:$4 sm:$0xff]   ;;  %v7357_v10 = vld [vmem:[#allocation5 + $0x40] ss:$8 sps:$4 sm:$0xff]  }
  0xa7   :  { %v7358_v11 = vld [vmem:[#allocation5 + $0x54] ss:$8 sps:$4 sm:$0xff]   ;;  %v163_v12 = vld [vmem:[#allocation5 + $0x60] sm:$0x33]  ;;  %v7360_v13 = vld [vmem:[#allocation5 + $0x50] ss:$8 sps:$4 sm:$0xff]  }
  0xa8   :  { %v6377_v14 = vcombine.high %v163_v12, %v163_v12  ;;  %v6376_v15 = vcombine.low %v163_v12, %v163_v12  ;;  %v148_v16 = vld [vmem:[#allocation2] sm:$0xff]  ;;  %v149_v17 = vld [vmem:[#allocation2 + $0x8] sm:$0xff]  ;;  %vm241_vm1 = vcmask 818176   ;;  %s8363_s8 = smov [#allocation17]  }
  0xa9   :  { %255 = vmatpush1.bf16.msra.mxu0 %v7348_v4  ;;  %v7365_v19 = vld [vmem:[#allocation8 + $0x4] ss:$16 sps:$4 sm:$0xff]   ;;  %v150_v20 = vpack.c.bf16 %v149_v17, %v148_v16  ;;  %v7363_v21 = vld [vmem:[#allocation8] ss:$16 sps:$4 sm:$0xff]   ;;  %v7413_v52 = vld [vmem:[#allocation8 + $0xc] ss:$16 sps:$4 sm:$0xff]  }
  0xaa   :  { %256 = vmatprep.subr.bf16.mxu0 %v7349_v5  ;;  %v247_v18 = vsel %vm245_vm0, %v6376_v15, 0  ;;  %v7368_v22 = vld [vmem:[#allocation8 + $0x24] ss:$16 sps:$4 sm:$0xff]   ;;  %v7366_v23 = vld [vmem:[#allocation8 + $0x20] ss:$16 sps:$4 sm:$0xff]   ;;  %s6348_s7 = sshll.u32 %s8363_s8, 4  ;;  %s6349_s7 = int_to_ptr.vmem [resolvable:$true] %s6348_s7 }
  0xab   :  { %v7371_v24 = vld [vmem:[#allocation8 + $0x44] ss:$16 sps:$4 sm:$0xff]   ;;  %v7369_v25 = vld [vmem:[#allocation8 + $0x40] ss:$16 sps:$4 sm:$0xff]   ;;  %s8311_s2 = scalar_lea.vmem %s6349_s7, 896  ;;  %p8316_p3 = scmp.lt.s32.totalorder %s6349_s7, %s6349_s7 }
  0xac   :  { %v7374_v26 = vld [vmem:[#allocation8 + $0x64] ss:$16 sps:$4 sm:$0xff]   ;;  %v7372_v27 = vld [vmem:[#allocation8 + $0x60] ss:$16 sps:$4 sm:$0xff]   ;;  %p8312_p2 = scmp.ne.s32.totalorder %s6349_s7, %s8311_s2  ;;  %p8317_p4 = scmp.lt.s32.totalorder %s8311_s2, %s8311_s2 }
  0xad   :  { %257 = vmatpush1.bf16.msra.mxu0 %v7351_v6  ;;  %v7377_v28 = vld [vmem:[#allocation8 + $0x84] ss:$16 sps:$4 sm:$0xff]   ;;  %v7375_v29 = vld [vmem:[#allocation8 + $0x80] ss:$16 sps:$4 sm:$0xff]  }
  0xae   :  { %258 = vmatprep.subr.bf16.mxu0 %v7352_v7  ;;  %v7380_v30 = vld [vmem:[#allocation8 + $0xa4] ss:$16 sps:$4 sm:$0xff]   ;;  %v7378_v31 = vld [vmem:[#allocation8 + $0xa0] ss:$16 sps:$4 sm:$0xff]   ;;  %p8318_p5 = por %p8317_p4, %p8316_p3 }
  0xaf   :  { %v7383_v32 = vld [vmem:[#allocation8 + $0xc4] ss:$16 sps:$4 sm:$0xff]   ;;  %v7381_v33 = vld [vmem:[#allocation8 + $0xc0] ss:$16 sps:$4 sm:$0xff]  }
  0xb0   :  { %v7386_v34 = vld [vmem:[#allocation8 + $0xe4] ss:$16 sps:$4 sm:$0xff]   ;;  %v7384_v35 = vld [vmem:[#allocation8 + $0xe0] ss:$16 sps:$4 sm:$0xff]   ;;  %p8319_p6 = pnand %p8318_p5, %p8312_p2 }
  0xb1   :  { %259 = vmatpush1.bf16.msra.mxu0 %v7354_v8  ;;  %v7389_v36 = vld [vmem:[#allocation8 + $0x104] ss:$16 sps:$4 sm:$0xff]   ;;  %v7387_v37 = vld [vmem:[#allocation8 + $0x100] ss:$16 sps:$4 sm:$0xff]  }
  0xb2   :  { %260 = vmatprep.subr.bf16.mxu0 %v7355_v9  ;;  %v7392_v38 = vld [vmem:[#allocation8 + $0x124] ss:$16 sps:$4 sm:$0xff]   ;;  %v7390_v39 = vld [vmem:[#allocation8 + $0x120] ss:$16 sps:$4 sm:$0xff]  }
  0xb3   :  { %v7395_v40 = vld [vmem:[#allocation8 + $0x144] ss:$16 sps:$4 sm:$0xff]   ;;  %v7393_v41 = vld [vmem:[#allocation8 + $0x140] ss:$16 sps:$4 sm:$0xff]  }
  0xb4   :  { %v7398_v42 = vld [vmem:[#allocation8 + $0x164] ss:$16 sps:$4 sm:$0xff]   ;;  %v7396_v43 = vld [vmem:[#allocation8 + $0x160] ss:$16 sps:$4 sm:$0xff]  }
  0xb5   :  { %261 = vmatpush1.bf16.msra.mxu0 %v7357_v10  ;;  %v7401_v44 = vld [vmem:[#allocation8 + $0x184] ss:$16 sps:$4 sm:$0xff]   ;;  %v7399_v45 = vld [vmem:[#allocation8 + $0x180] ss:$16 sps:$4 sm:$0xff]  }
  0xb6   :  { %262 = vmatprep.subr.bf16.mxu0 %v7358_v11  ;;  %v7404_v46 = vld [vmem:[#allocation8 + $0x1a4] ss:$16 sps:$4 sm:$0xff]   ;;  %v7402_v47 = vld [vmem:[#allocation8 + $0x1a0] ss:$16 sps:$4 sm:$0xff]  }
  0xb7   :  { %v7407_v48 = vld [vmem:[#allocation8 + $0x1c4] ss:$16 sps:$4 sm:$0xff]   ;;  %v7405_v49 = vld [vmem:[#allocation8 + $0x1c0] ss:$16 sps:$4 sm:$0xff]  }
  0xb8   :  { %v7410_v50 = vld [vmem:[#allocation8 + $0x1e4] ss:$16 sps:$4 sm:$0xff]   ;;  %v7408_v51 = vld [vmem:[#allocation8 + $0x1e0] ss:$16 sps:$4 sm:$0xff]  }
  0xb9   :  { %263 = vmatpush1.bf16.msra.mxu0 %v7360_v13  ;;  %v805_v53 = vld [vmem:[#allocation11] sm:$0xff] }
  0xba   :  { %6378 = vmatprep.subr.msk.bf16.mxu0 %vm245_vm0, %v6377_v14  ;;  %v809_v54 = vld [vmem:[#allocation11 + $0x20] sm:$0xff] }
  0xbb   :  { %v6445_v55 = vcombine.high %v805_v53, %v809_v54  ;;  %v6444_v56 = vcombine.low %v805_v53, %v809_v54  ;;  %v813_v57 = vld [vmem:[#allocation11 + $0x40] sm:$0xff] }
  0xbc   :  { %v817_v58 = vld [vmem:[#allocation11 + $0x60] sm:$0xff] }
  0xbd   :  { %265 = vmatpush1.bf16.msra.mxu0 %v247_v18  ;;  %v6453_v59 = vcombine.high %v813_v57, %v817_v58  ;;  %2383 = vmatprep.subr.bf16.mxu1 %v6445_v55  ;;  %v6452_v60 = vcombine.low %v813_v57, %v817_v58  ;;  %v821_v61 = vld [vmem:[#allocation11 + $0x80] sm:$0xff] }
  0xbe   :  { %707 = vmatprep.subr.bf16.mxu0 %v7365_v19  ;;  %2384 = vmatpush1.bf16.msra.mxu1 %v6444_v56  ;;  %v825_v62 = vld [vmem:[#allocation11 + $0xa0] sm:$0xff] }
  0xbf   :  { %2385 = vmatprep.subr.bf16.mxu1 %v6453_v59  ;;  %v6461_v63 = vcombine.high %v821_v61, %v825_v62  ;;  %v6460_v0 = vcombine.low %v821_v61, %v825_v62  ;;  %v829_v1 = vld [vmem:[#allocation11 + $0xc0] sm:$0xff] }
  0xc0   :  { %6379 = vmatmul.mubr.msk.bf16.vlgmr.msra.gmra.mrb[0].mxu0 %vm241_vm1, %v150_v20  ;;  %v833_v2 = vld [vmem:[#allocation11 + $0xe0] sm:$0xff] }
  0xc1   :  { %708 = vmatpush1.bf16.msra.mxu0 %v7363_v21  ;;  %v6469_v3 = vcombine.high %v829_v1, %v833_v2  ;;  %v6468_v4 = vcombine.low %v829_v1, %v833_v2  ;;  %v837_v5 = vld [vmem:[#allocation11 + $0x100] sm:$0xff] }
  0xc2   :  { %709 = vmatprep.subr.bf16.mxu0 %v7368_v22  ;;  %2386 = vmatpush1.bf16.msra.mxu1 %v6452_v60  ;;  %v841_v6 = vld [vmem:[#allocation11 + $0x120] sm:$0xff] }
  0xc3   :  { %2387 = vmatprep.subr.bf16.mxu1 %v6461_v63  ;;  %v6477_v7 = vcombine.high %v837_v5, %v841_v6  ;;  %v6476_v8 = vcombine.low %v837_v5, %v841_v6  ;;  %v845_v9 = vld [vmem:[#allocation11 + $0x140] sm:$0xff]  ;;  %v7419_v5 = vld [vmem:[#allocation8 + $0x4c] ss:$16 sps:$4 sm:$0xff]  }
  0xc4   :  { %v849_v10 = vld [vmem:[#allocation11 + $0x160] sm:$0xff] }
  0xc5   :  { %710 = vmatpush1.bf16.msra.mxu0 %v7366_v23  ;;  %v6485_v11 = vcombine.high %v845_v9, %v849_v10  ;;  %v6484_v12 = vcombine.low %v845_v9, %v849_v10  ;;  %v853_v13 = vld [vmem:[#allocation11 + $0x180] sm:$0xff]  ;;  %v7425_v9 = vld [vmem:[#allocation8 + $0x8c] ss:$16 sps:$4 sm:$0xff]  }
  0xc6   :  { %711 = vmatprep.subr.bf16.mxu0 %v7371_v24  ;;  %2388 = vmatpush1.bf16.msra.mxu1 %v6460_v0  ;;  %v857_v14 = vld [vmem:[#allocation11 + $0x1a0] sm:$0xff] }
  0xc7   :  { %2389 = vmatprep.subr.bf16.mxu1 %v6469_v3  ;;  %v6493_v15 = vcombine.high %v853_v13, %v857_v14  ;;  %v6492_v16 = vcombine.low %v853_v13, %v857_v14  ;;  %v861_v17 = vld [vmem:[#allocation11 + $0x1c0] sm:$0xff]  ;;  %v7416_v3 = vld [vmem:[#allocation8 + $0x2c] ss:$16 sps:$4 sm:$0xff]  }
  0xc8   :  { %v865_v18 = vld [vmem:[#allocation11 + $0x1e0] sm:$0xff]  ;;  %v7431_v13 = vld [vmem:[#allocation8 + $0xcc] ss:$16 sps:$4 sm:$0xff]  }
  0xc9   :  { %712 = vmatpush1.bf16.msra.mxu0 %v7369_v25  ;;  %v6501_v19 = vcombine.high %v861_v17, %v865_v18  ;;  %v6500_v20 = vcombine.low %v861_v17, %v865_v18  ;;  %v869_v21 = vld [vmem:[#allocation11 + $0x200] sm:$0xff]  ;;  %v7437_v17 = vld [vmem:[#allocation8 + $0x10c] ss:$16 sps:$4 sm:$0xff]  }
  0xca   :  { %713 = vmatprep.subr.bf16.mxu0 %v7374_v26  ;;  %2390 = vmatpush1.bf16.msra.mxu1 %v6468_v4  ;;  %v873_v22 = vld [vmem:[#allocation11 + $0x220] sm:$0xff] }
  0xcb   :  { %2391 = vmatprep.subr.bf16.mxu1 %v6477_v7  ;;  %v6509_v23 = vcombine.high %v869_v21, %v873_v22  ;;  %v6508_v24 = vcombine.low %v869_v21, %v873_v22  ;;  %v877_v25 = vld [vmem:[#allocation11 + $0x240] sm:$0xff]  ;;  %v7422_v7 = vld [vmem:[#allocation8 + $0x6c] ss:$16 sps:$4 sm:$0xff]  }
  0xcc   :  { %v881_v26 = vld [vmem:[#allocation11 + $0x260] sm:$0xff]  ;;  %v7443_v21 = vld [vmem:[#allocation8 + $0x14c] ss:$16 sps:$4 sm:$0xff]  }
  0xcd   :  { %714 = vmatpush1.bf16.msra.mxu0 %v7372_v27  ;;  %v6517_v27 = vcombine.high %v877_v25, %v881_v26  ;;  %v7411_v2 = vld [vmem:[#allocation8 + $0x8] ss:$16 sps:$4 sm:$0xff]  }
  0xce   :  { %715 = vmatprep.subr.bf16.mxu0 %v7377_v28  ;;  %2392 = vmatpush1.bf16.msra.mxu1 %v6476_v8  ;;  %v6516_v28 = vcombine.low %v877_v25, %v881_v26  ;;  %v7414_v4 = vld [vmem:[#allocation8 + $0x28] ss:$16 sps:$4 sm:$0xff]   ;;  %v7449_v25 = vld [vmem:[#allocation8 + $0x18c] ss:$16 sps:$4 sm:$0xff]  }
  0xcf   :  { %2393 = vmatprep.subr.bf16.mxu1 %v6485_v11  ;;  %v7417_v6 = vld [vmem:[#allocation8 + $0x48] ss:$16 sps:$4 sm:$0xff]   ;;  %v7428_v11 = vld [vmem:[#allocation8 + $0xac] ss:$16 sps:$4 sm:$0xff]  }
  0xd0   :  { %v7420_v8 = vld [vmem:[#allocation8 + $0x68] ss:$16 sps:$4 sm:$0xff]  }
  0xd1   :  { %716 = vmatpush1.bf16.msra.mxu0 %v7375_v29  ;;  %v885_v29 = vld [vmem:[#allocation11 + $0x280] sm:$0xff] }
  0xd2   :  { %717 = vmatprep.subr.bf16.mxu0 %v7380_v30  ;;  %2394 = vmatpush1.bf16.msra.mxu1 %v6484_v12  ;;  %v889_v30 = vld [vmem:[#allocation11 + $0x2a0] sm:$0xff] }
  0xd3   :  { %2395 = vmatprep.subr.bf16.mxu1 %v6493_v15  ;;  %v7423_v10 = vld [vmem:[#allocation8 + $0x88] ss:$16 sps:$4 sm:$0xff]   ;;  %v7434_v15 = vld [vmem:[#allocation8 + $0xec] ss:$16 sps:$4 sm:$0xff]  }
  0xd4   :  { %v7426_v12 = vld [vmem:[#allocation8 + $0xa8] ss:$16 sps:$4 sm:$0xff]  }
  0xd5   :  { %718 = vmatpush1.bf16.msra.mxu0 %v7378_v31  ;;  %v166_v31 = vlaneseq  ;;  %v7429_v14 = vld [vmem:[#allocation8 + $0xc8] ss:$16 sps:$4 sm:$0xff]  }
  0xd6   :  { %719 = vmatprep.subr.bf16.mxu0 %v7383_v32  ;;  %2396 = vmatpush1.bf16.msra.mxu1 %v6492_v16  ;;  %v6525_v32 = vcombine.high %v885_v29, %v889_v30  ;;  %v7432_v16 = vld [vmem:[#allocation8 + $0xe8] ss:$16 sps:$4 sm:$0xff]  }
  0xd7   :  { %2397 = vmatprep.subr.bf16.mxu1 %v6501_v19  ;;  %v7435_v18 = vld [vmem:[#allocation8 + $0x108] ss:$16 sps:$4 sm:$0xff]   ;;  %v7440_v19 = vld [vmem:[#allocation8 + $0x12c] ss:$16 sps:$4 sm:$0xff]  }
  0xd8   :  { %v7441_v22 = vld [vmem:[#allocation8 + $0x148] ss:$16 sps:$4 sm:$0xff]  }
  0xd9   :  { %720 = vmatpush1.bf16.msra.mxu0 %v7381_v33  ;;  %v6524_v33 = vcombine.low %v885_v29, %v889_v30  ;;  %v7447_v26 = vld [vmem:[#allocation8 + $0x188] ss:$16 sps:$4 sm:$0xff]   ;;  %v7455_v29 = vld [vmem:[#allocation8 + $0x1cc] ss:$16 sps:$4 sm:$0xff]  }
  0xda   :  { %721 = vmatprep.subr.bf16.mxu0 %v7386_v34  ;;  %2398 = vmatpush1.bf16.msra.mxu1 %v6500_v20  ;;  %v893_v34 = vld [vmem:[#allocation11 + $0x2c0] sm:$0xff] }
  0xdb   :  { %2399 = vmatprep.subr.bf16.mxu1 %v6509_v23  ;;  %v7438_v20 = vld [vmem:[#allocation8 + $0x128] ss:$16 sps:$4 sm:$0xff]   ;;  %v7446_v23 = vld [vmem:[#allocation8 + $0x16c] ss:$16 sps:$4 sm:$0xff]  }
  0xdc   :  { %v7453_v30 = vld [vmem:[#allocation8 + $0x1c8] ss:$16 sps:$4 sm:$0xff]  }
  0xdd   :  { %722 = vmatpush1.bf16.msra.mxu0 %v7384_v35  ;;  %v897_v35 = vld [vmem:[#allocation11 + $0x2e0] sm:$0xff] }
  0xde   :  { %723 = vmatprep.subr.bf16.mxu0 %v7389_v36  ;;  %2400 = vmatpush1.bf16.msra.mxu1 %v6508_v24  ;;  %v8538_v36 = vshrl.u32 %v166_v31, 7  ;;  %v7444_v24 = vld [vmem:[#allocation8 + $0x168] ss:$16 sps:$4 sm:$0xff]   ;;  %v7458_v31 = vld [vmem:[#allocation8 + $0x1ec] ss:$16 sps:$4 sm:$0xff]  }
  0xdf   :  { %2401 = vmatprep.subr.bf16.mxu1 %v6517_v27  ;;  %v7452_v27 = vld [vmem:[#allocation8 + $0x1ac] ss:$16 sps:$4 sm:$0xff]  }
  0xe1   :  { %724 = vmatpush1.bf16.msra.mxu0 %v7387_v37  ;;  %v6533_v37 = vcombine.high %v893_v34, %v897_v35 }
  0xe2   :  { %725 = vmatprep.subr.bf16.mxu0 %v7392_v38  ;;  %2402 = vmatpush1.bf16.msra.mxu1 %v6516_v28  ;;  %v6532_v38 = vcombine.low %v893_v34, %v897_v35  ;;  %v7450_v28 = vld [vmem:[#allocation8 + $0x1a8] ss:$16 sps:$4 sm:$0xff]  }
  0xe3   :  { %2403 = vmatprep.subr.bf16.mxu1 %v6525_v32  ;;  %v806_v32 = vld [vmem:[#allocation11 + $0x8] sm:$0xff]  ;;  %v7456_v34 = vld [vmem:[#allocation8 + $0x1e8] ss:$16 sps:$4 sm:$0xff]  }
  0xe5   :  { %726 = vmatpush1.bf16.msra.mxu0 %v7390_v39  ;;  %v901_v39 = vld [vmem:[#allocation11 + $0x300] sm:$0xff] }
  0xe6   :  { %727 = vmatprep.subr.bf16.mxu0 %v7395_v40  ;;  %2404 = vmatpush1.bf16.msra.mxu1 %v6524_v33  ;;  %v905_v40 = vld [vmem:[#allocation11 + $0x320] sm:$0xff]  ;;  %v810_v33 = vld [vmem:[#allocation11 + $0x28] sm:$0xff] }
  0xe7   :  { %2405 = vmatprep.subr.bf16.mxu1 %v6533_v37  ;;  %v6447_v35 = vcombine.high %v806_v32, %v810_v33  ;;  %v814_v37 = vld [vmem:[#allocation11 + $0x48] sm:$0xff] }
  0xe9   :  { %728 = vmatpush1.bf16.msra.mxu0 %v7393_v41  ;;  %v164_v41 = vld [vmem:[#allocation7] sm:$0x3] }
  0xea   :  { %729 = vmatprep.subr.bf16.mxu0 %v7398_v42  ;;  %v8541_v42 = vsub.s32 0, %v8538_v36  ;;  %2406 = vmatpush1.bf16.msra.mxu1 %v6532_v38  ;;  %v818_v38 = vld [vmem:[#allocation11 + $0x68] sm:$0xff] }
  0xed   :  { %730 = vmatpush1.bf16.msra.mxu0 %v7396_v43  ;;  %v6541_v43 = vcombine.high %v901_v39, %v905_v40 }
  0xee   :  { %731 = vmatprep.subr.bf16.mxu0 %v7401_v44  ;;  %v8544_v44 = vsub.s32 1, %v8538_v36 }
  0xef   :  { %2407 = vmatprep.subr.bf16.mxu1 %v6541_v43  ;;  %v826_v43 = vld [vmem:[#allocation11 + $0xa8] sm:$0xff] }
  0xf1   :  { %732 = vmatpush1.bf16.msra.mxu0 %v7399_v45  ;;  %v6540_v45 = vcombine.low %v901_v39, %v905_v40  ;;  %v6446_v39 = vcombine.low %v806_v32, %v810_v33  ;;  %v6455_v40 = vcombine.high %v814_v37, %v818_v38 }
  0xf2   :  { %733 = vmatprep.subr.bf16.mxu0 %v7404_v46  ;;  %v909_v46 = vld [vmem:[#allocation11 + $0x340] sm:$0xff] }
  0xf3   :  { %2408 = vmatpush1.bf16.msra.mxu1 %v6540_v45  ;;  %v6454_v45 = vcombine.low %v814_v37, %v818_v38 }
  0xf5   :  { %734 = vmatpush1.bf16.msra.mxu0 %v7402_v47  ;;  %v913_v47 = vld [vmem:[#allocation11 + $0x360] sm:$0xff] }
  0xf6   :  { %735 = vmatprep.subr.bf16.mxu0 %v7407_v48  ;;  %v169_v48 = vrot.slane %v164_v41, %v8541_v42 }
  0xf9   :  { %736 = vmatpush1.bf16.msra.mxu0 %v7405_v49  ;;  %v6549_v49 = vcombine.high %v909_v46, %v913_v47 }
  0xfa   :  { %737 = vmatprep.subr.bf16.mxu0 %v7410_v50  ;;  %v173_v50 = vrot.slane %v164_v41, %v8544_v44  ;;  %v822_v41 = vld [vmem:[#allocation11 + $0x88] sm:$0xff] }
  0xfb   :  { %2409 = vmatprep.subr.bf16.mxu1 %v6549_v49  ;;  %v6462_v49 = vcombine.low %v822_v41, %v826_v43 }
  0xfd   :  { %738 = vmatpush1.bf16.msra.mxu0 %v7408_v51  ;;  %v6548_v51 = vcombine.low %v909_v46, %v913_v47  ;;  %v6463_v46 = vcombine.high %v822_v41, %v826_v43  ;;  %v830_v47 = vld [vmem:[#allocation11 + $0xc8] sm:$0xff] }
  0xfe   :  { %750 = vmatprep.subr.bf16.mxu0 %v7413_v52 }
  0xff   :  { %2410 = vmatpush1.bf16.msra.mxu1 %v6548_v51  ;;  %v838_v51 = vld [vmem:[#allocation11 + $0x108] sm:$0xff] }
 0x193   :  { %v286_v52 = vpop.f32.mrb[0].mxu0 }
 0x194   :  { %v287_v53 = vadd.f32 %v286_v52, %v169_v48  ;;  %v288_v54 = vpop.f32.mrb[1].mxu0  ;;  %v842_v52 = vld [vmem:[#allocation11 + $0x128] sm:$0xff] }
 0x195   :  { %v289_v55 = vadd.f32 %v288_v54, %v173_v50  ;;  %v290_v56 = vpop.f32.mrb[2].mxu0  ;;  %v6479_v54 = vcombine.high %v838_v51, %v842_v52 }
 0x196   :  { %v291_v57 = vadd.f32 %v290_v56, %v169_v48  ;;  %v292_v58 = vpop.f32.mrb[3].mxu0  ;;  %v295_v60 = vmax.f32 %v287_v53, 0.0  ;;  %v834_v48 = vld [vmem:[#allocation11 + $0xe8] sm:$0xff] }
 0x197   :  { %v293_v59 = vadd.f32 %v292_v58, %v173_v50  ;;  %v296_v62 = vmax.f32 %v289_v55, 0.0  ;;  %v6471_v50 = vcombine.high %v830_v47, %v834_v48  ;;  %v6470_v53 = vcombine.low %v830_v47, %v834_v48  ;;  %v846_v55 = vld [vmem:[#allocation11 + $0x148] sm:$0xff] }
 0x198   :  { %v297_v61 = vmax.f32 %v291_v57, 0.0  ;;  %v850_v56 = vld [vmem:[#allocation11 + $0x168] sm:$0xff]  ;;  %v6478_v57 = vcombine.low %v838_v51, %v842_v52 }
 0x199   :  { %v298_v63 = vmax.f32 %v293_v59, 0.0  ;;  %v6487_v58 = vcombine.high %v846_v55, %v850_v56  ;;  %v854_v59 = vld [vmem:[#allocation11 + $0x188] sm:$0xff] }
 0x19a   :  { %v8548_v0 = vpack.c.bf16 %v297_v61, %v295_v60  ;;  %v858_v60 = vld [vmem:[#allocation11 + $0x1a8] sm:$0xff]  ;;  %v6486_v61 = vcombine.low %v846_v55, %v850_v56  ;;  %v8568_v55 = vld [vmem:[#allocation10] sm:$0xf] }
 0x19b   :  { %v300_v1 = vpack.c.bf16 %v298_v63, %v296_v62  ;;  %v6495_v62 = vcombine.high %v854_v59, %v858_v60  ;;  %v862_v63 = vld [vmem:[#allocation11 + $0x1c8] sm:$0xff]  ;;  %v370_v56 = vrot.slane %v8568_v55, %v8541_v42 }
 0x19d   :  { %739 = vmatprep.mubr.bf16.mxu0 %v300_v1 }
 0x19e   :  { %740 = vmatmul.mubr.bf16.vlgmr.msra.gmra.mrb[4].mxu0 %v8548_v0 }
 0x19f   :  { %751 = vmatpush1.bf16.msra.mxu0 %v7411_v2  ;;  %782 = vmatprep.mubr.bf16.mxu0 %v300_v1  ;;  %v917_v1 = vld [vmem:[#allocation11 + $0x380] sm:$0xff] }
 0x1a0   :  { %752 = vmatprep.subr.bf16.mxu0 %v7416_v3  ;;  %v921_v2 = vld [vmem:[#allocation11 + $0x3a0] sm:$0xff] }
 0x1a1   :  { %v6557_v3 = vcombine.high %v917_v1, %v921_v2 }
 0x1a3   :  { %753 = vmatpush1.bf16.msra.mxu0 %v7414_v4  ;;  %v6494_v4 = vcombine.low %v854_v59, %v858_v60  ;;  %2411 = vmatprep.subr.bf16.mxu1 %v6557_v3 }
 0x1a4   :  { %754 = vmatprep.subr.bf16.mxu0 %v7419_v5  ;;  %v6556_v5 = vcombine.low %v917_v1, %v921_v2 }
 0x1a6   :  { %2412 = vmatpush1.bf16.msra.mxu1 %v6556_v5 }
 0x1a7   :  { %755 = vmatpush1.bf16.msra.mxu0 %v7417_v6 }
 0x1a8   :  { %756 = vmatprep.subr.bf16.mxu0 %v7422_v7  ;;  %v870_v7 = vld [vmem:[#allocation11 + $0x208] sm:$0xff] }
 0x1ab   :  { %757 = vmatpush1.bf16.msra.mxu0 %v7420_v8  ;;  %v874_v8 = vld [vmem:[#allocation11 + $0x228] sm:$0xff] }
 0x1ac   :  { %758 = vmatprep.subr.bf16.mxu0 %v7425_v9  ;;  %v925_v9 = vld [vmem:[#allocation11 + $0x3c0] sm:$0xff] }
 0x1af   :  { %759 = vmatpush1.bf16.msra.mxu0 %v7423_v10  ;;  %v929_v10 = vld [vmem:[#allocation11 + $0x3e0] sm:$0xff] }
 0x1b0   :  { %760 = vmatprep.subr.bf16.mxu0 %v7428_v11  ;;  %v6565_v11 = vcombine.high %v925_v9, %v929_v10 }
 0x1b2   :  { %2413 = vmatprep.subr.bf16.mxu1 %v6565_v11 }
 0x1b3   :  { %761 = vmatpush1.bf16.msra.mxu0 %v7426_v12 }
 0x1b4   :  { %762 = vmatprep.subr.bf16.mxu0 %v7431_v13  ;;  %v6564_v13 = vcombine.low %v925_v9, %v929_v10  ;;  %v946_v9 = vld [vmem:[#allocation11 + $0x468] sm:$0xff] }
 0x1b6   :  { %2414 = vmatpush1.bf16.msra.mxu1 %v6564_v13 }
 0x1b7   :  { %763 = vmatpush1.bf16.msra.mxu0 %v7429_v14  ;;  %v6511_v14 = vcombine.high %v870_v7, %v874_v8 }
 0x1b8   :  { %764 = vmatprep.subr.bf16.mxu0 %v7434_v15  ;;  %v878_v15 = vld [vmem:[#allocation11 + $0x248] sm:$0xff] }
 0x1bb   :  { %765 = vmatpush1.bf16.msra.mxu0 %v7432_v16  ;;  %v882_v16 = vld [vmem:[#allocation11 + $0x268] sm:$0xff] }
 0x1bc   :  { %766 = vmatprep.subr.bf16.mxu0 %v7437_v17  ;;  %v8552_v17 = vld [vmem:[#allocation11 + $0x400] sm:$0xff] }
 0x1bf   :  { %767 = vmatpush1.bf16.msra.mxu0 %v7435_v18  ;;  %v8554_v18 = vld [vmem:[#allocation11 + $0x420] sm:$0xff] }
 0x1c0   :  { %768 = vmatprep.subr.bf16.mxu0 %v7440_v19  ;;  %v8556_v19 = vld [vmem:[#allocation11 + $0x408] sm:$0xff] }
 0x1c3   :  { %769 = vmatpush1.bf16.msra.mxu0 %v7438_v20  ;;  %v6573_v20 = vcombine.high %v8552_v17, %v8554_v18 }
 0x1c4   :  { %770 = vmatprep.subr.bf16.mxu0 %v7443_v21  ;;  %v8560_v21 = vld [vmem:[#allocation11 + $0x428] sm:$0xff] }
 0x1c5   :  { %2426 = vmatprep.subr.bf16.mxu1 %v6573_v20  ;;  %v954_v20 = vld [vmem:[#allocation11 + $0x4a8] sm:$0xff] }
 0x1c7   :  { %771 = vmatpush1.bf16.msra.mxu0 %v7441_v22  ;;  %v6510_v22 = vcombine.low %v870_v7, %v874_v8  ;;  %v945_v7 = vld [vmem:[#allocation11 + $0x460] sm:$0xff]  ;;  %v942_v8 = vld [vmem:[#allocation11 + $0x448] sm:$0xff] }
 0x1c8   :  { %772 = vmatprep.subr.bf16.mxu0 %v7446_v23  ;;  %v6572_v23 = vcombine.low %v8552_v17, %v8554_v18  ;;  %v6583_v13 = vcombine.high %v942_v8, %v946_v9 }
 0x1cb   :  { %773 = vmatpush1.bf16.msra.mxu0 %v7444_v24  ;;  %v6574_v24 = vcombine.low %v8556_v19, %v8560_v21 }
 0x1cc   :  { %774 = vmatprep.subr.bf16.mxu0 %v7449_v25  ;;  %v6519_v25 = vcombine.high %v878_v15, %v882_v16 }
 0x1cf   :  { %775 = vmatpush1.bf16.msra.mxu0 %v7447_v26  ;;  %v886_v26 = vld [vmem:[#allocation11 + $0x288] sm:$0xff] }
 0x1d0   :  { %776 = vmatprep.subr.bf16.mxu0 %v7452_v27  ;;  %v890_v27 = vld [vmem:[#allocation11 + $0x2a8] sm:$0xff] }
 0x1d1   :  { %v6526_v32 = vcombine.low %v886_v26, %v890_v27 }
 0x1d3   :  { %777 = vmatpush1.bf16.msra.mxu0 %v7450_v28  ;;  %v6518_v28 = vcombine.low %v878_v15, %v882_v16  ;;  %v953_v15 = vld [vmem:[#allocation11 + $0x4a0] sm:$0xff]  ;;  %v950_v16 = vld [vmem:[#allocation11 + $0x488] sm:$0xff] }
 0x1d4   :  { %778 = vmatprep.subr.bf16.mxu0 %v7455_v29  ;;  %v6527_v29 = vcombine.high %v886_v26, %v890_v27  ;;  %v6591_v27 = vcombine.high %v950_v16, %v954_v20 }
 0x1d7   :  { %779 = vmatpush1.bf16.msra.mxu0 %v7453_v30  ;;  %v894_v30 = vld [vmem:[#allocation11 + $0x2c8] sm:$0xff] }
 0x1d8   :  { %780 = vmatprep.subr.bf16.mxu0 %v7458_v31  ;;  %v898_v31 = vld [vmem:[#allocation11 + $0x2e8] sm:$0xff] }
 0x1d9   :  { %v6535_v33 = vcombine.high %v894_v30, %v898_v31  ;;  %v6534_v37 = vcombine.low %v894_v30, %v898_v31  ;;  %v958_v30 = vld [vmem:[#allocation11 + $0x4c8] sm:$0xff] }
 0x1da   :  { %v962_v31 = vld [vmem:[#allocation11 + $0x4e8] sm:$0xff] }
 0x1db   :  { %781 = vmatpush1.bf16.msra.mxu0 %v7456_v34  ;;  %v902_v34 = vld [vmem:[#allocation11 + $0x308] sm:$0xff]  ;;  %v6599_v18 = vcombine.high %v958_v30, %v962_v31 }
 0x1dc   :  { %2469 = vmatprep.subr.bf16.mxu0 %v6447_v35  ;;  %v906_v35 = vld [vmem:[#allocation11 + $0x328] sm:$0xff] }
 0x1dd   :  { %v6543_v38 = vcombine.high %v902_v34, %v906_v35  ;;  %v6542_v41 = vcombine.low %v902_v34, %v906_v35  ;;  %v6598_v35 = vcombine.low %v958_v30, %v962_v31 }
 0x1de   :  { %783 = vmatmul.mubr.bf16.vlgmr.msra.gmra.mrb[8].mxu0 %v8548_v0  ;;  %v866_v0 = vld [vmem:[#allocation11 + $0x1e8] sm:$0xff] }
 0x1df   :  { %2470 = vmatpush1.bf16.msra.mxu0 %v6446_v39  ;;  %v6503_v6 = vcombine.high %v862_v63, %v866_v0  ;;  %v6502_v12 = vcombine.low %v862_v63, %v866_v0  ;;  %v910_v39 = vld [vmem:[#allocation11 + $0x348] sm:$0xff] }
 0x1e0   :  { %2471 = vmatprep.subr.bf16.mxu0 %v6455_v40  ;;  %v914_v40 = vld [vmem:[#allocation11 + $0x368] sm:$0xff] }
 0x1e1   :  { %v6551_v43 = vcombine.high %v910_v39, %v914_v40  ;;  %v6550_v47 = vcombine.low %v910_v39, %v914_v40  ;;  %v973_v39 = vld [vmem:[#allocation11 + $0x540] sm:$0xff] }
 0x1e2   :  { %v977_v40 = vld [vmem:[#allocation11 + $0x560] sm:$0xff] }
 0x1e3   :  { %2472 = vmatpush1.bf16.msra.mxu0 %v6454_v45  ;;  %v918_v45 = vld [vmem:[#allocation11 + $0x388] sm:$0xff] }
 0x1e4   :  { %2473 = vmatprep.subr.bf16.mxu0 %v6463_v46  ;;  %v922_v46 = vld [vmem:[#allocation11 + $0x3a8] sm:$0xff] }
 0x1e5   :  { %v6559_v48 = vcombine.high %v918_v45, %v922_v46  ;;  %v6558_v51 = vcombine.low %v918_v45, %v922_v46 }
 0x1e7   :  { %2474 = vmatpush1.bf16.msra.mxu0 %v6462_v49  ;;  %v926_v49 = vld [vmem:[#allocation11 + $0x3c8] sm:$0xff] }
 0x1e8   :  { %2475 = vmatprep.subr.bf16.mxu0 %v6471_v50  ;;  %v930_v50 = vld [vmem:[#allocation11 + $0x3e8] sm:$0xff] }
 0x1e9   :  { %v6567_v52 = vcombine.high %v926_v49, %v930_v50 }
 0x1eb   :  { %2476 = vmatpush1.bf16.msra.mxu0 %v6470_v53  ;;  %v6566_v53 = vcombine.low %v926_v49, %v930_v50  ;;  %v981_v49 = vld [vmem:[#allocation11 + $0x580] sm:$0xff] }
 0x1ec   :  { %2477 = vmatprep.subr.bf16.mxu0 %v6479_v54  ;;  %v6575_v54 = vcombine.high %v8556_v19, %v8560_v21  ;;  %v965_v19 = vld [vmem:[#allocation11 + $0x500] sm:$0xff] }
 0x1ed   :  { %v969_v21 = vld [vmem:[#allocation11 + $0x520] sm:$0xff] }
 0x1ee   :  { %v6604_v45 = vcombine.low %v965_v19, %v969_v21  ;;  %v985_v50 = vld [vmem:[#allocation11 + $0x5a0] sm:$0xff] }
 0x1ef   :  { %2478 = vmatpush1.bf16.msra.mxu0 %v6478_v57  ;;  %v374_v57 = vrot.slane %v8568_v55, %v8544_v44 }
 0x1f0   :  { %2479 = vmatprep.subr.bf16.mxu0 %v6487_v58 }
 0x1f3   :  { %2480 = vmatpush1.bf16.msra.mxu0 %v6486_v61 }
 0x1f4   :  { %2481 = vmatprep.subr.bf16.mxu0 %v6495_v62 }
 0x1f7   :  { %2482 = vmatpush1.bf16.msra.mxu0 %v6494_v4  ;;  %v941_v4 = vld [vmem:[#allocation11 + $0x440] sm:$0xff] }
 0x1f8   :  { %2483 = vmatprep.subr.bf16.mxu0 %v6503_v6 }
 0x1fb   :  { %2484 = vmatpush1.bf16.msra.mxu0 %v6502_v12  ;;  %v6581_v12 = vcombine.high %v941_v4, %v945_v7 }
 0x1fc   :  { %2485 = vmatprep.subr.bf16.mxu0 %v6511_v14  ;;  %v949_v14 = vld [vmem:[#allocation11 + $0x480] sm:$0xff] }
 0x1fd   :  { %v6589_v26 = vcombine.high %v949_v14, %v953_v15 }
 0x1ff   :  { %2486 = vmatpush1.bf16.msra.mxu0 %v6510_v22  ;;  %v6580_v22 = vcombine.low %v941_v4, %v945_v7  ;;  %v998_v4 = vld [vmem:[#allocation11 + $0x608] sm:$0xff] }
 0x200   :  { %2487 = vmatprep.subr.bf16.mxu0 %v6519_v25  ;;  %v6582_v25 = vcombine.low %v942_v8, %v946_v9 }
 0x203   :  { %2488 = vmatpush1.bf16.msra.mxu0 %v6518_v28  ;;  %v957_v28 = vld [vmem:[#allocation11 + $0x4c0] sm:$0xff] }
 0x204   :  { %2489 = vmatprep.subr.bf16.mxu0 %v6527_v29  ;;  %v961_v29 = vld [vmem:[#allocation11 + $0x4e0] sm:$0xff] }
 0x205   :  { %v6597_v17 = vcombine.high %v957_v28, %v961_v29  ;;  %v6596_v34 = vcombine.low %v957_v28, %v961_v29  ;;  %v1014_v28 = vld [vmem:[#allocation11 + $0x688] sm:$0xff] }
 0x206   :  { %v1018_v29 = vld [vmem:[#allocation11 + $0x6a8] sm:$0xff] }
 0x207   :  { %2490 = vmatpush1.bf16.msra.mxu0 %v6526_v32  ;;  %v6588_v32 = vcombine.low %v949_v14, %v953_v15  ;;  %v1006_v14 = vld [vmem:[#allocation11 + $0x648] sm:$0xff] }
 0x208   :  { %2491 = vmatprep.subr.bf16.mxu0 %v6535_v33  ;;  %v6590_v33 = vcombine.low %v950_v16, %v954_v20  ;;  %v1010_v15 = vld [vmem:[#allocation11 + $0x668] sm:$0xff] }
 0x209   :  { %v6646_v31 = vcombine.low %v1006_v14, %v1010_v15 }
 0x20b   :  { %2492 = vmatpush1.bf16.msra.mxu0 %v6534_v37  ;;  %v6605_v37 = vcombine.high %v965_v19, %v969_v21  ;;  %v1022_v19 = vld [vmem:[#allocation11 + $0x6c8] sm:$0xff] }
 0x20c   :  { %2493 = vmatprep.subr.bf16.mxu0 %v6543_v38  ;;  %v1026_v21 = vld [vmem:[#allocation11 + $0x6e8] sm:$0xff] }
 0x20f   :  { %2494 = vmatpush1.bf16.msra.mxu0 %v6542_v41  ;;  %v974_v41 = vld [vmem:[#allocation11 + $0x548] sm:$0xff] }
 0x210   :  { %2495 = vmatprep.subr.bf16.mxu0 %v6551_v43  ;;  %v978_v43 = vld [vmem:[#allocation11 + $0x568] sm:$0xff] }
 0x213   :  { %2496 = vmatpush1.bf16.msra.mxu0 %v6550_v47  ;;  %v6613_v47 = vcombine.high %v973_v39, %v977_v40 }
 0x214   :  { %2497 = vmatprep.subr.bf16.mxu0 %v6559_v48  ;;  %v6615_v48 = vcombine.high %v974_v41, %v978_v43 }
 0x217   :  { %2498 = vmatpush1.bf16.msra.mxu0 %v6558_v51  ;;  %v982_v51 = vld [vmem:[#allocation11 + $0x588] sm:$0xff] }
 0x218   :  { %2499 = vmatprep.subr.bf16.mxu0 %v6567_v52  ;;  %v986_v52 = vld [vmem:[#allocation11 + $0x5a8] sm:$0xff] }
 0x21b   :  { %2500 = vmatpush1.bf16.msra.mxu0 %v6566_v53  ;;  %v6612_v53 = vcombine.low %v973_v39, %v977_v40  ;;  %v1030_v39 = vld [vmem:[#allocation11 + $0x708] sm:$0xff] }
 0x21c   :  { %2512 = vmatprep.subr.bf16.mxu0 %v6575_v54  ;;  %v6614_v54 = vcombine.low %v974_v41, %v978_v43  ;;  %v1034_v40 = vld [vmem:[#allocation11 + $0x728] sm:$0xff]  ;;  %v6662_v43 = vcombine.low %v1022_v19, %v1026_v21 }
 0x271   :  { %v741_v58 = vpop.f32.mrb[4].mxu0 }
 0x272   :  { %v742_v59 = vadd.f32 %v741_v58, %v370_v56  ;;  %v743_v60 = vpop.f32.mrb[5].mxu0  ;;  %v989_v58 = vld [vmem:[#allocation11 + $0x5c0] sm:$0xff] }
 0x273   :  { %v744_v61 = vadd.f32 %v743_v60, %v374_v57  ;;  %v745_v62 = vpop.f32.mrb[6].mxu0  ;;  %v990_v60 = vld [vmem:[#allocation11 + $0x5c8] sm:$0xff] }
 0x274   :  { %v746_v63 = vadd.f32 %v745_v62, %v370_v56  ;;  %v747_v0 = vpop.f32.mrb[7].mxu0  ;;  %v793_v2 = vmax.f32 %v742_v59, 0.0  ;;  %v6621_v56 = vcombine.high %v981_v49, %v985_v50  ;;  %v993_v59 = vld [vmem:[#allocation11 + $0x5e0] sm:$0xff]  ;;  %v6620_v62 = vcombine.low %v981_v49, %v985_v50  ;;  %v1038_v49 = vld [vmem:[#allocation11 + $0x748] sm:$0xff] }
 0x275   :  { %v748_v1 = vadd.f32 %v747_v0, %v374_v57  ;;  %v794_v5 = vmax.f32 %v744_v61, 0.0  ;;  %v6623_v57 = vcombine.high %v982_v51, %v986_v52  ;;  %v994_v61 = vld [vmem:[#allocation11 + $0x5e8] sm:$0xff]  ;;  %v6629_v0 = vcombine.high %v989_v58, %v993_v59 }
 0x276   :  { %v797_v3 = vmax.f32 %v746_v63, 0.0  ;;  %v6622_v63 = vcombine.low %v982_v51, %v986_v52  ;;  %v6630_v7 = vcombine.low %v990_v60, %v994_v61  ;;  %v1042_v50 = vld [vmem:[#allocation11 + $0x768] sm:$0xff]  ;;  %v6670_v52 = vcombine.low %v1030_v39, %v1034_v40 }
 0x277   :  { %v798_v6 = vmax.f32 %v748_v1, 0.0  ;;  %v6631_v1 = vcombine.high %v990_v60, %v994_v61  ;;  %v1046_v60 = vld [vmem:[#allocation11 + $0x788] sm:$0xff] }
 0x278   :  { %v8574_v10 = vpack.c.bf16 %v797_v3, %v793_v2  ;;  %v997_v2 = vld [vmem:[#allocation11 + $0x600] sm:$0xff]  ;;  %v1050_v61 = vld [vmem:[#allocation11 + $0x7a8] sm:$0xff] }
 0x279   :  { %v8576_v11 = vpack.c.bf16 %v798_v6, %v794_v5  ;;  %v1001_v3 = vld [vmem:[#allocation11 + $0x620] sm:$0xff]  ;;  %v1002_v5 = vld [vmem:[#allocation11 + $0x628] sm:$0xff]  ;;  %v6628_v6 = vcombine.low %v989_v58, %v993_v59  ;;  %v8592_v58 = vsub.s32 3, %v8538_v36 }
 0x27a   :  { %v6637_v8 = vcombine.high %v997_v2, %v1001_v3  ;;  %v6639_v9 = vcombine.high %v998_v4, %v1002_v5  ;;  %v6636_v16 = vcombine.low %v997_v2, %v1001_v3  ;;  %v6638_v20 = vcombine.low %v998_v4, %v1002_v5  ;;  %v1049_v59 = vld [vmem:[#allocation11 + $0x7a0] sm:$0xff] }
 0x27b   :  { %2415 = vmatprep.mubr.bf16.mxu1 %v8576_v11  ;;  %2501 = vmatprep.mubr.bf16.mxu0 %v8576_v11  ;;  %v6687_v2 = vcombine.high %v1046_v60, %v1050_v61  ;;  %v1053_v3 = vld [vmem:[#allocation11 + $0x7c0] sm:$0xff]  ;;  %v382_v4 = vrot.slane %v8568_v55, %v8592_v58 }
 0x27c   :  { %2416 = vmatmul.mubr.bf16.vlgmr.msra.gmra.mrb[0].mxu1 %v8574_v10  ;;  %2502 = vmatmul.mubr.bf16.vlgmr.msra.gmra.mrb[12].mxu0 %v8574_v10  ;;  %v1057_v5 = vld [vmem:[#allocation11 + $0x7e0] sm:$0xff] }
 0x27d   :  { %2427 = vmatpush1.bf16.msra.mxu1 %v6572_v23  ;;  %2513 = vmatpush1.bf16.msra.mxu0 %v6574_v24  ;;  %v966_v23 = vld [vmem:[#allocation11 + $0x508] sm:$0xff] }
 0x27e   :  { %2428 = vmatprep.subr.bf16.mxu1 %v6581_v12  ;;  %2514 = vmatprep.subr.bf16.mxu0 %v6583_v13  ;;  %v970_v24 = vld [vmem:[#allocation11 + $0x528] sm:$0xff]  ;;  %v1005_v12 = vld [vmem:[#allocation11 + $0x640] sm:$0xff] }
 0x27f   :  { %v6607_v38 = vcombine.high %v966_v23, %v970_v24  ;;  %v6606_v46 = vcombine.low %v966_v23, %v970_v24  ;;  %v1009_v13 = vld [vmem:[#allocation11 + $0x660] sm:$0xff]  ;;  %v6654_v24 = vcombine.low %v1014_v28, %v1018_v29 }
 0x280   :  { %v6644_v30 = vcombine.low %v1005_v12, %v1009_v13 }
 0x281   :  { %2429 = vmatpush1.bf16.msra.mxu1 %v6580_v22  ;;  %2515 = vmatpush1.bf16.msra.mxu0 %v6582_v25  ;;  %v6645_v22 = vcombine.high %v1005_v12, %v1009_v13  ;;  %v6647_v25 = vcombine.high %v1006_v14, %v1010_v15  ;;  %v6686_v12 = vcombine.low %v1046_v60, %v1050_v61  ;;  %v836_v60 = vld [vmem:[#allocation11 + $0xf8] sm:$0xff] }
 0x282   :  { %2430 = vmatprep.subr.bf16.mxu1 %v6589_v26  ;;  %2516 = vmatprep.subr.bf16.mxu0 %v6591_v27  ;;  %v1013_v26 = vld [vmem:[#allocation11 + $0x680] sm:$0xff]  ;;  %v6693_v15 = vcombine.high %v1053_v3, %v1057_v5 }
 0x283   :  { %v1017_v27 = vld [vmem:[#allocation11 + $0x6a0] sm:$0xff] }
 0x284   :  { %v6652_v23 = vcombine.low %v1013_v26, %v1017_v27 }
 0x285   :  { %2431 = vmatpush1.bf16.msra.mxu1 %v6588_v32  ;;  %2517 = vmatpush1.bf16.msra.mxu0 %v6590_v33  ;;  %v6653_v32 = vcombine.high %v1013_v26, %v1017_v27  ;;  %v6655_v33 = vcombine.high %v1014_v28, %v1018_v29  ;;  %v811_v26 = vld [vmem:[#allocation11 + $0x30] sm:$0xff]  ;;  %v808_v27 = vld [vmem:[#allocation11 + $0x18] sm:$0xff] }
 0x286   :  { %2432 = vmatprep.subr.bf16.mxu1 %v6597_v17  ;;  %2518 = vmatprep.subr.bf16.mxu0 %v6599_v18  ;;  %v1021_v17 = vld [vmem:[#allocation11 + $0x6c0] sm:$0xff] }
 0x287   :  { %v1025_v18 = vld [vmem:[#allocation11 + $0x6e0] sm:$0xff] }
 0x288   :  { %v6660_v41 = vcombine.low %v1021_v17, %v1025_v18 }
 0x289   :  { %2433 = vmatpush1.bf16.msra.mxu1 %v6596_v34  ;;  %2519 = vmatpush1.bf16.msra.mxu0 %v6598_v35  ;;  %v6661_v34 = vcombine.high %v1021_v17, %v1025_v18  ;;  %v6663_v35 = vcombine.high %v1022_v19, %v1026_v21 }
 0x28a   :  { %2434 = vmatprep.subr.bf16.mxu1 %v6605_v37  ;;  %2520 = vmatprep.subr.bf16.mxu0 %v6607_v38  ;;  %v1029_v37 = vld [vmem:[#allocation11 + $0x700] sm:$0xff] }
 0x28b   :  { %v1033_v38 = vld [vmem:[#allocation11 + $0x720] sm:$0xff] }
 0x28c   :  { %v6668_v51 = vcombine.low %v1029_v37, %v1033_v38 }
 0x28d   :  { %2435 = vmatpush1.bf16.msra.mxu1 %v6604_v45  ;;  %2521 = vmatpush1.bf16.msra.mxu0 %v6606_v46  ;;  %v6669_v45 = vcombine.high %v1029_v37, %v1033_v38  ;;  %v6671_v46 = vcombine.high %v1030_v39, %v1034_v40  ;;  %v816_v37 = vld [vmem:[#allocation11 + $0x58] sm:$0xff] }
 0x28e   :  { %2436 = vmatprep.subr.bf16.mxu1 %v6613_v47  ;;  %2522 = vmatprep.subr.bf16.mxu0 %v6615_v48  ;;  %v1037_v47 = vld [vmem:[#allocation11 + $0x740] sm:$0xff]  ;;  %v820_v38 = vld [vmem:[#allocation11 + $0x78] sm:$0xff] }
 0x28f   :  { %v1041_v48 = vld [vmem:[#allocation11 + $0x760] sm:$0xff] }
 0x291   :  { %2437 = vmatpush1.bf16.msra.mxu1 %v6612_v53  ;;  %2523 = vmatpush1.bf16.msra.mxu0 %v6614_v54  ;;  %v6677_v53 = vcombine.high %v1037_v47, %v1041_v48  ;;  %v6679_v54 = vcombine.high %v1038_v49, %v1042_v50 }
 0x292   :  { %2438 = vmatprep.subr.bf16.mxu1 %v6621_v56  ;;  %2524 = vmatprep.subr.bf16.mxu0 %v6623_v57  ;;  %v8589_v56 = vsub.s32 2, %v8538_v36  ;;  %v1045_v57 = vld [vmem:[#allocation11 + $0x780] sm:$0xff] }
 0x295   :  { %2439 = vmatpush1.bf16.msra.mxu1 %v6620_v62  ;;  %2525 = vmatpush1.bf16.msra.mxu0 %v6622_v63  ;;  %v6676_v62 = vcombine.low %v1037_v47, %v1041_v48  ;;  %v6678_v63 = vcombine.low %v1038_v49, %v1042_v50  ;;  %v827_v47 = vld [vmem:[#allocation11 + $0xb0] sm:$0xff]  ;;  %v824_v48 = vld [vmem:[#allocation11 + $0x98] sm:$0xff] }
 0x296   :  { %2440 = vmatprep.subr.bf16.mxu1 %v6629_v0  ;;  %2526 = vmatprep.subr.bf16.mxu0 %v6631_v1  ;;  %v378_v0 = vrot.slane %v8568_v55, %v8589_v56  ;;  %v6685_v1 = vcombine.high %v1045_v57, %v1049_v59  ;;  %v812_v55 = vld [vmem:[#allocation11 + $0x38] sm:$0xff] }
 0x297   :  { %v6451_v19 = vcombine.high %v808_v27, %v812_v55  ;;  %v828_v49 = vld [vmem:[#allocation11 + $0xb8] sm:$0xff] }
 0x299   :  { %2441 = vmatpush1.bf16.msra.mxu1 %v6628_v6  ;;  %2527 = vmatpush1.bf16.msra.mxu0 %v6630_v7  ;;  %v1054_v6 = vld [vmem:[#allocation11 + $0x7c8] sm:$0xff] }
 0x29a   :  { %2442 = vmatprep.subr.bf16.mxu1 %v6637_v8  ;;  %2528 = vmatprep.subr.bf16.mxu0 %v6639_v9  ;;  %v1058_v7 = vld [vmem:[#allocation11 + $0x7e8] sm:$0xff]  ;;  %v6684_v9 = vcombine.low %v1045_v57, %v1049_v59  ;;  %v835_v57 = vld [vmem:[#allocation11 + $0xf0] sm:$0xff]  ;;  %v832_v59 = vld [vmem:[#allocation11 + $0xd8] sm:$0xff] }
 0x29d   :  { %2443 = vmatpush1.bf16.msra.mxu1 %v6636_v16  ;;  %2529 = vmatpush1.bf16.msra.mxu0 %v6638_v20  ;;  %v6695_v16 = vcombine.high %v1054_v6, %v1058_v7  ;;  %v807_v20 = vld [vmem:[#allocation11 + $0x10] sm:$0xff] }
 0x29e   :  { %2444 = vmatprep.subr.bf16.mxu1 %v6645_v22  ;;  %2530 = vmatprep.subr.bf16.mxu0 %v6647_v25  ;;  %v6449_v18 = vcombine.high %v807_v20, %v811_v26  ;;  %v6448_v40 = vcombine.low %v807_v20, %v811_v26  ;;  %v856_v26 = vld [vmem:[#allocation11 + $0x198] sm:$0xff] }
 0x2a1   :  { %2445 = vmatpush1.bf16.msra.mxu1 %v6644_v30  ;;  %2531 = vmatpush1.bf16.msra.mxu0 %v6646_v31  ;;  %v6692_v31 = vcombine.low %v1053_v3, %v1057_v5  ;;  %v844_v3 = vld [vmem:[#allocation11 + $0x138] sm:$0xff]  ;;  %v6474_v5 = vcombine.low %v832_v59, %v836_v60 }
 0x2a2   :  { %2446 = vmatprep.subr.bf16.mxu1 %v6653_v32  ;;  %2532 = vmatprep.subr.bf16.mxu0 %v6655_v33  ;;  %v6694_v32 = vcombine.low %v1054_v6, %v1058_v7 }
 0x2a5   :  { %2447 = vmatpush1.bf16.msra.mxu1 %v6652_v23  ;;  %2533 = vmatpush1.bf16.msra.mxu0 %v6654_v24  ;;  %v815_v24 = vld [vmem:[#allocation11 + $0x50] sm:$0xff] }
 0x2a6   :  { %2448 = vmatprep.subr.bf16.mxu1 %v6661_v34  ;;  %2534 = vmatprep.subr.bf16.mxu0 %v6663_v35  ;;  %v819_v35 = vld [vmem:[#allocation11 + $0x70] sm:$0xff] }
 0x2a7   :  { %v6456_v50 = vcombine.low %v815_v24, %v819_v35 }
 0x2a9   :  { %2449 = vmatpush1.bf16.msra.mxu1 %v6660_v41  ;;  %2535 = vmatpush1.bf16.msra.mxu0 %v6662_v43  ;;  %v6450_v41 = vcombine.low %v808_v27, %v812_v55  ;;  %v6457_v43 = vcombine.high %v815_v24, %v819_v35  ;;  %v860_v27 = vld [vmem:[#allocation11 + $0x1b8] sm:$0xff]  ;;  %v871_v24 = vld [vmem:[#allocation11 + $0x210] sm:$0xff] }
 0x2aa   :  { %2450 = vmatprep.subr.bf16.mxu1 %v6669_v45  ;;  %2536 = vmatprep.subr.bf16.mxu0 %v6671_v46  ;;  %v6459_v45 = vcombine.high %v816_v37, %v820_v38  ;;  %v823_v46 = vld [vmem:[#allocation11 + $0x90] sm:$0xff] }
 0x2ab   :  { %v6464_v61 = vcombine.low %v823_v46, %v827_v47  ;;  %v875_v35 = vld [vmem:[#allocation11 + $0x230] sm:$0xff] }
 0x2ad   :  { %2451 = vmatpush1.bf16.msra.mxu1 %v6668_v51  ;;  %2537 = vmatpush1.bf16.msra.mxu0 %v6670_v52  ;;  %v6458_v51 = vcombine.low %v816_v37, %v820_v38  ;;  %v6465_v52 = vcombine.high %v823_v46, %v827_v47  ;;  %v872_v37 = vld [vmem:[#allocation11 + $0x218] sm:$0xff]  ;;  %v879_v46 = vld [vmem:[#allocation11 + $0x250] sm:$0xff] }
 0x2ae   :  { %2452 = vmatprep.subr.bf16.mxu1 %v6677_v53  ;;  %2538 = vmatprep.subr.bf16.mxu0 %v6679_v54  ;;  %v6467_v53 = vcombine.high %v824_v48, %v828_v49  ;;  %v831_v54 = vld [vmem:[#allocation11 + $0xd0] sm:$0xff]  ;;  %v876_v38 = vld [vmem:[#allocation11 + $0x238] sm:$0xff] }
 0x2af   :  { %v883_v47 = vld [vmem:[#allocation11 + $0x270] sm:$0xff] }
 0x2b1   :  { %v784_v8 = vpop.f32.mrb[8].mxu0  ;;  %2453 = vmatpush1.bf16.msra.mxu1 %v6676_v62  ;;  %2539 = vmatpush1.bf16.msra.mxu0 %v6678_v63  ;;  %v6466_v62 = vcombine.low %v824_v48, %v828_v49  ;;  %v6473_v63 = vcombine.high %v831_v54, %v835_v57  ;;  %v880_v48 = vld [vmem:[#allocation11 + $0x258] sm:$0xff] }
 0x2b2   :  { %v785_v13 = vadd.f32 %v784_v8, %v378_v0  ;;  %v786_v14 = vpop.f32.mrb[9].mxu0  ;;  %2454 = vmatprep.subr.bf16.mxu1 %v6685_v1  ;;  %2540 = vmatprep.subr.bf16.mxu0 %v6687_v2  ;;  %v839_v1 = vld [vmem:[#allocation11 + $0x110] sm:$0xff]  ;;  %v884_v49 = vld [vmem:[#allocation11 + $0x278] sm:$0xff] }
 0x2b3   :  { %v787_v22 = vadd.f32 %v786_v14, %v382_v4  ;;  %v788_v25 = vpop.f32.mrb[10].mxu0  ;;  %v843_v2 = vld [vmem:[#allocation11 + $0x130] sm:$0xff] }
 0x2b4   :  { %v789_v28 = vadd.f32 %v788_v25, %v378_v0  ;;  %v790_v29 = vpop.f32.mrb[11].mxu0  ;;  %v795_v33 = vmax.f32 %v785_v13, 0.0  ;;  %v6475_v0 = vcombine.high %v832_v59, %v836_v60  ;;  %v6481_v6 = vcombine.high %v839_v1, %v843_v2  ;;  %v847_v8 = vld [vmem:[#allocation11 + $0x150] sm:$0xff]  ;;  %v852_v13 = vld [vmem:[#allocation11 + $0x178] sm:$0xff] }
 0x2b5   :  { %v791_v30 = vadd.f32 %v790_v29, %v382_v4  ;;  %2455 = vmatpush1.bf16.msra.mxu1 %v6684_v9  ;;  %2541 = vmatpush1.bf16.msra.mxu0 %v6686_v12  ;;  %v796_v21 = vmax.f32 %v787_v22, 0.0  ;;  %v6472_v4 = vcombine.low %v831_v54, %v835_v57  ;;  %v851_v9 = vld [vmem:[#allocation11 + $0x170] sm:$0xff]  ;;  %v848_v12 = vld [vmem:[#allocation11 + $0x158] sm:$0xff]  ;;  %v6480_v14 = vcombine.low %v839_v1, %v843_v2 }
 0x2b6   :  { %v799_v17 = vmax.f32 %v789_v28, 0.0  ;;  %2456 = vmatprep.subr.bf16.mxu1 %v6693_v15  ;;  %2542 = vmatprep.subr.bf16.mxu0 %v6695_v16  ;;  %v6489_v16 = vcombine.high %v847_v8, %v851_v9  ;;  %v6491_v20 = vcombine.high %v848_v12, %v852_v13  ;;  %v855_v22 = vld [vmem:[#allocation11 + $0x190] sm:$0xff]  ;;  %v6488_v55 = vcombine.low %v847_v8, %v851_v9  ;;  %v888_v59 = vld [vmem:[#allocation11 + $0x298] sm:$0xff] }
 0x2b7   :  { %v800_v23 = vmax.f32 %v791_v30, 0.0  ;;  %v859_v25 = vld [vmem:[#allocation11 + $0x1b0] sm:$0xff]  ;;  %v6490_v28 = vcombine.low %v848_v12, %v852_v13  ;;  %v6499_v30 = vcombine.high %v856_v26, %v860_v27  ;;  %v892_v60 = vld [vmem:[#allocation11 + $0x2b8] sm:$0xff] }
 0x2b8   :  { %v8598_v34 = vpack.c.bf16 %v799_v17, %v795_v33  ;;  %v6497_v29 = vcombine.high %v855_v22, %v859_v25  ;;  %v864_v33 = vld [vmem:[#allocation11 + $0x1d8] sm:$0xff]  ;;  %v887_v54 = vld [vmem:[#allocation11 + $0x290] sm:$0xff] }
 0x2b9   :  { %v8600_v39 = vpack.c.bf16 %v800_v23, %v796_v21  ;;  %2457 = vmatpush1.bf16.msra.mxu1 %v6692_v31  ;;  %2543 = vmatpush1.bf16.msra.mxu0 %v6694_v32  ;;  %v863_v31 = vld [vmem:[#allocation11 + $0x1d0] sm:$0xff]  ;;  %v868_v17 = vld [vmem:[#allocation11 + $0x1f8] sm:$0xff] }
 0x2ba   :  { %2555 = vmatprep.subr.bf16.mxu1 %v6449_v18  ;;  %2641 = vmatprep.subr.bf16.mxu0 %v6451_v19  ;;  %v867_v32 = vld [vmem:[#allocation11 + $0x1f0] sm:$0xff]  ;;  %v6496_v18 = vcombine.low %v855_v22, %v859_v25  ;;  %v6498_v19 = vcombine.low %v856_v26, %v860_v27  ;;  %v6507_v23 = vcombine.high %v864_v33, %v868_v17  ;;  %v904_v12 = vld [vmem:[#allocation11 + $0x318] sm:$0xff] }
 0x2bb   :  { %2458 = vmatprep.mubr.bf16.mxu1 %v8600_v39  ;;  %2544 = vmatprep.mubr.bf16.mxu0 %v8600_v39  ;;  %v6505_v21 = vcombine.high %v863_v31, %v867_v32  ;;  %v891_v57 = vld [vmem:[#allocation11 + $0x2b0] sm:$0xff]  ;;  %v908_v13 = vld [vmem:[#allocation11 + $0x338] sm:$0xff] }
 0x2bc   :  { %2459 = vmatmul.mubr.bf16.vlgmr.msra.gmra.mrb[0].mxu1 %v8598_v34  ;;  %2545 = vmatmul.mubr.bf16.vlgmr.msra.gmra.mrb[12].mxu0 %v8598_v34  ;;  %v895_v1 = vld [vmem:[#allocation11 + $0x2d0] sm:$0xff]  ;;  %v912_v26 = vld [vmem:[#allocation11 + $0x358] sm:$0xff] }
 0x2bd   :  { %2556 = vmatpush1.bf16.msra.mxu1 %v6448_v40  ;;  %2587 = vmatprep.mubr.bf16.mxu1 %v8576_v11  ;;  %v6504_v40 = vcombine.low %v863_v31, %v867_v32  ;;  %v899_v2 = vld [vmem:[#allocation11 + $0x2f0] sm:$0xff]  ;;  %v916_v27 = vld [vmem:[#allocation11 + $0x378] sm:$0xff] }
 0x2be   :  { %2642 = vmatpush1.bf16.msra.mxu0 %v6450_v41  ;;  %2673 = vmatprep.mubr.bf16.mxu0 %v8576_v11  ;;  %v840_v11 = vld [vmem:[#allocation11 + $0x118] sm:$0xff]  ;;  %v6506_v41 = vcombine.low %v864_v33, %v868_v17  ;;  %v903_v8 = vld [vmem:[#allocation11 + $0x310] sm:$0xff] }
 0x2bf   :  { %2557 = vmatprep.subr.bf16.mxu1 %v6457_v43  ;;  %2643 = vmatprep.subr.bf16.mxu0 %v6459_v45  ;;  %v6483_v7 = vcombine.high %v840_v11, %v844_v3  ;;  %v6482_v15 = vcombine.low %v840_v11, %v844_v3  ;;  %v6513_v43 = vcombine.high %v871_v24, %v875_v35  ;;  %v896_v11 = vld [vmem:[#allocation11 + $0x2d8] sm:$0xff]  ;;  %v907_v9 = vld [vmem:[#allocation11 + $0x330] sm:$0xff] }
 0x2c0   :  { %v6515_v45 = vcombine.high %v872_v37, %v876_v38  ;;  %v900_v3 = vld [vmem:[#allocation11 + $0x2f8] sm:$0xff]  ;;  %v911_v22 = vld [vmem:[#allocation11 + $0x350] sm:$0xff] }
 0x2c1   :  { %2558 = vmatpush1.bf16.msra.mxu1 %v6456_v50  ;;  %v6512_v50 = vcombine.low %v871_v24, %v875_v35  ;;  %v915_v25 = vld [vmem:[#allocation11 + $0x370] sm:$0xff]  ;;  %v920_v33 = vld [vmem:[#allocation11 + $0x398] sm:$0xff] }
 0x2c2   :  { %2644 = vmatpush1.bf16.msra.mxu0 %v6458_v51  ;;  %2559 = vmatprep.subr.bf16.mxu1 %v6465_v52  ;;  %v6514_v51 = vcombine.low %v872_v37, %v876_v38  ;;  %v6521_v52 = vcombine.high %v879_v46, %v883_v47  ;;  %v919_v31 = vld [vmem:[#allocation11 + $0x390] sm:$0xff]  ;;  %v924_v17 = vld [vmem:[#allocation11 + $0x3b8] sm:$0xff] }
 0x2c3   :  { %2645 = vmatprep.subr.bf16.mxu0 %v6467_v53  ;;  %v6523_v53 = vcombine.high %v880_v48, %v884_v49  ;;  %v923_v32 = vld [vmem:[#allocation11 + $0x3b0] sm:$0xff]  ;;  %v928_v37 = vld [vmem:[#allocation11 + $0x3d8] sm:$0xff] }
 0x2c4   :  { %v927_v24 = vld [vmem:[#allocation11 + $0x3d0] sm:$0xff]  ;;  %v932_v38 = vld [vmem:[#allocation11 + $0x3f8] sm:$0xff] }
 0x2c5   :  { %2560 = vmatpush1.bf16.msra.mxu1 %v6464_v61  ;;  %v6520_v61 = vcombine.low %v879_v46, %v883_v47  ;;  %v931_v35 = vld [vmem:[#allocation11 + $0x3f0] sm:$0xff] }
 0x2c6   :  { %2646 = vmatpush1.bf16.msra.mxu0 %v6466_v62  ;;  %2561 = vmatprep.subr.bf16.mxu1 %v6473_v63  ;;  %v6522_v62 = vcombine.low %v880_v48, %v884_v49  ;;  %v6529_v63 = vcombine.high %v887_v54, %v891_v57  ;;  %v935_v46 = vld [vmem:[#allocation11 + $0x410] sm:$0xff]  ;;  %v936_v48 = vld [vmem:[#allocation11 + $0x418] sm:$0xff] }
 0x2c7   :  { %2647 = vmatprep.subr.bf16.mxu0 %v6475_v0  ;;  %v6531_v0 = vcombine.high %v888_v59, %v892_v60  ;;  %v939_v47 = vld [vmem:[#allocation11 + $0x430] sm:$0xff]  ;;  %v940_v49 = vld [vmem:[#allocation11 + $0x438] sm:$0xff] }
 0x2c9   :  { %2562 = vmatpush1.bf16.msra.mxu1 %v6472_v4  ;;  %v6528_v4 = vcombine.low %v887_v54, %v891_v57  ;;  %v943_v54 = vld [vmem:[#allocation11 + $0x450] sm:$0xff] }
 0x2ca   :  { %2648 = vmatpush1.bf16.msra.mxu0 %v6474_v5  ;;  %2563 = vmatprep.subr.bf16.mxu1 %v6481_v6  ;;  %v6530_v5 = vcombine.low %v888_v59, %v892_v60  ;;  %v6537_v6 = vcombine.high %v895_v1, %v899_v2  ;;  %v947_v57 = vld [vmem:[#allocation11 + $0x470] sm:$0xff]  ;;  %v6576_v59 = vcombine.low %v935_v46, %v939_v47  ;;  %v944_v60 = vld [vmem:[#allocation11 + $0x458] sm:$0xff] }
 0x2cb   :  { %2649 = vmatprep.subr.bf16.mxu0 %v6483_v7  ;;  %v6539_v7 = vcombine.high %v896_v11, %v900_v3 }
 0x2cd   :  { %2564 = vmatpush1.bf16.msra.mxu1 %v6480_v14  ;;  %v6536_v14 = vcombine.low %v895_v1, %v899_v2  ;;  %v955_v1 = vld [vmem:[#allocation11 + $0x4b0] sm:$0xff] }
 0x2ce   :  { %2650 = vmatpush1.bf16.msra.mxu0 %v6482_v15  ;;  %2565 = vmatprep.subr.bf16.mxu1 %v6489_v16  ;;  %v6538_v15 = vcombine.low %v896_v11, %v900_v3  ;;  %v6545_v16 = vcombine.high %v903_v8, %v907_v9  ;;  %v952_v11 = vld [vmem:[#allocation11 + $0x498] sm:$0xff] }
 0x2cf   :  { %2651 = vmatprep.subr.bf16.mxu0 %v6491_v20  ;;  %v6547_v20 = vcombine.high %v904_v12, %v908_v13  ;;  %v956_v3 = vld [vmem:[#allocation11 + $0x4b8] sm:$0xff] }
 0x2d1   :  { %2566 = vmatpush1.bf16.msra.mxu1 %v6488_v55  ;;  %v6544_v55 = vcombine.low %v903_v8, %v907_v9  ;;  %v959_v8 = vld [vmem:[#allocation11 + $0x4d0] sm:$0xff] }
 0x2d2   :  { %2652 = vmatpush1.bf16.msra.mxu0 %v6490_v28  ;;  %2567 = vmatprep.subr.bf16.mxu1 %v6497_v29  ;;  %v6546_v28 = vcombine.low %v904_v12, %v908_v13  ;;  %v6553_v29 = vcombine.high %v911_v22, %v915_v25  ;;  %v963_v9 = vld [vmem:[#allocation11 + $0x4f0] sm:$0xff]  ;;  %v960_v12 = vld [vmem:[#allocation11 + $0x4d8] sm:$0xff] }
 0x2d3   :  { %2653 = vmatprep.subr.bf16.mxu0 %v6499_v30  ;;  %v6555_v30 = vcombine.high %v912_v26, %v916_v27  ;;  %v964_v13 = vld [vmem:[#allocation11 + $0x4f8] sm:$0xff] }
 0x2d5   :  { %2568 = vmatpush1.bf16.msra.mxu1 %v6496_v18  ;;  %v6552_v18 = vcombine.low %v911_v22, %v915_v25  ;;  %v971_v22 = vld [vmem:[#allocation11 + $0x530] sm:$0xff]  ;;  %v968_v25 = vld [vmem:[#allocation11 + $0x518] sm:$0xff] }
 0x2d6   :  { %2654 = vmatpush1.bf16.msra.mxu0 %v6498_v19  ;;  %2569 = vmatprep.subr.bf16.mxu1 %v6505_v21  ;;  %v6554_v19 = vcombine.low %v912_v26, %v916_v27  ;;  %v6561_v21 = vcombine.high %v919_v31, %v923_v32  ;;  %v972_v26 = vld [vmem:[#allocation11 + $0x538] sm:$0xff]  ;;  %v6602_v27 = vcombine.low %v960_v12, %v964_v13 }
 0x2d7   :  { %2655 = vmatprep.subr.bf16.mxu0 %v6507_v23  ;;  %v6563_v23 = vcombine.high %v920_v33, %v924_v17 }
 0x2d9   :  { %2570 = vmatpush1.bf16.msra.mxu1 %v6504_v40  ;;  %v6560_v40 = vcombine.low %v919_v31, %v923_v32  ;;  %v976_v31 = vld [vmem:[#allocation11 + $0x558] sm:$0xff] }
 0x2da   :  { %2656 = vmatpush1.bf16.msra.mxu0 %v6506_v41  ;;  %2571 = vmatprep.subr.bf16.mxu1 %v6513_v43  ;;  %v6562_v41 = vcombine.low %v920_v33, %v924_v17  ;;  %v6569_v43 = vcombine.high %v927_v24, %v931_v35  ;;  %v980_v32 = vld [vmem:[#allocation11 + $0x578] sm:$0xff]  ;;  %v6610_v17 = vcombine.low %v968_v25, %v972_v26 }
 0x2db   :  { %2657 = vmatprep.subr.bf16.mxu0 %v6515_v45  ;;  %v6571_v45 = vcombine.high %v928_v37, %v932_v38 }
 0x2dd   :  { %2572 = vmatpush1.bf16.msra.mxu1 %v6512_v50  ;;  %v6568_v50 = vcombine.low %v927_v24, %v931_v35  ;;  %v984_v24 = vld [vmem:[#allocation11 + $0x598] sm:$0xff] }
 0x2de   :  { %2658 = vmatpush1.bf16.msra.mxu0 %v6514_v51  ;;  %2573 = vmatprep.subr.bf16.mxu1 %v6521_v52  ;;  %v6570_v51 = vcombine.low %v928_v37, %v932_v38  ;;  %v6577_v52 = vcombine.high %v935_v46, %v939_v47  ;;  %v988_v35 = vld [vmem:[#allocation11 + $0x5b8] sm:$0xff]  ;;  %v6618_v38 = vcombine.low %v976_v31, %v980_v32 }
 0x2df   :  { %2659 = vmatprep.subr.bf16.mxu0 %v6523_v53  ;;  %v6579_v53 = vcombine.high %v936_v48, %v940_v49  ;;  %v992_v46 = vld [vmem:[#allocation11 + $0x5d8] sm:$0xff] }
 0x2e0   :  { %v996_v47 = vld [vmem:[#allocation11 + $0x5f8] sm:$0xff] }
 0x2e1   :  { %2574 = vmatpush1.bf16.msra.mxu1 %v6520_v61  ;;  %v948_v61 = vld [vmem:[#allocation11 + $0x478] sm:$0xff] }
 0x2e2   :  { %2660 = vmatpush1.bf16.msra.mxu0 %v6522_v62  ;;  %2575 = vmatprep.subr.bf16.mxu1 %v6529_v63  ;;  %v6578_v62 = vcombine.low %v936_v48, %v940_v49  ;;  %v6585_v63 = vcombine.high %v943_v54, %v947_v57  ;;  %v6587_v2 = vcombine.high %v944_v60, %v948_v61 }
 0x2e3   :  { %2661 = vmatprep.subr.bf16.mxu0 %v6531_v0  ;;  %v951_v0 = vld [vmem:[#allocation11 + $0x490] sm:$0xff]  ;;  %v6626_v49 = vcombine.low %v984_v24, %v988_v35 }
 0x2e5   :  { %2576 = vmatpush1.bf16.msra.mxu1 %v6528_v4  ;;  %v6584_v4 = vcombine.low %v943_v54, %v947_v57  ;;  %v1000_v54 = vld [vmem:[#allocation11 + $0x618] sm:$0xff] }
 0x2e6   :  { %2662 = vmatpush1.bf16.msra.mxu0 %v6530_v5  ;;  %2577 = vmatprep.subr.bf16.mxu1 %v6537_v6  ;;  %v6586_v5 = vcombine.low %v944_v60, %v948_v61  ;;  %v6593_v6 = vcombine.high %v951_v0, %v955_v1  ;;  %v1004_v57 = vld [vmem:[#allocation11 + $0x638] sm:$0xff]  ;;  %v6634_v60 = vcombine.low %v992_v46, %v996_v47 }
 0x2e7   :  { %2663 = vmatprep.subr.bf16.mxu0 %v6539_v7  ;;  %v6595_v7 = vcombine.high %v952_v11, %v956_v3 }
 0x2e9   :  { %2578 = vmatpush1.bf16.msra.mxu1 %v6536_v14  ;;  %v6592_v14 = vcombine.low %v951_v0, %v955_v1  ;;  %v1011_v0 = vld [vmem:[#allocation11 + $0x670] sm:$0xff]  ;;  %v1008_v1 = vld [vmem:[#allocation11 + $0x658] sm:$0xff] }
 0x2ea   :  { %2664 = vmatpush1.bf16.msra.mxu0 %v6538_v15  ;;  %2579 = vmatprep.subr.bf16.mxu1 %v6545_v16  ;;  %v6601_v15 = vcombine.high %v959_v8, %v963_v9  ;;  %v6603_v16 = vcombine.high %v960_v12, %v964_v13 }
 0x2eb   :  { %2665 = vmatprep.subr.bf16.mxu0 %v6547_v20  ;;  %v967_v20 = vld [vmem:[#allocation11 + $0x510] sm:$0xff] }
 0x2ec   :  { %v6608_v33 = vcombine.low %v967_v20, %v971_v22 }
 0x2ed   :  { %2580 = vmatpush1.bf16.msra.mxu1 %v6544_v55  ;;  %v6609_v55 = vcombine.high %v967_v20, %v971_v22  ;;  %v1024_v20 = vld [vmem:[#allocation11 + $0x6d8] sm:$0xff] }
 0x2ee   :  { %2666 = vmatpush1.bf16.msra.mxu0 %v6546_v28  ;;  %2581 = vmatprep.subr.bf16.mxu1 %v6553_v29  ;;  %v6611_v28 = vcombine.high %v968_v25, %v972_v26  ;;  %v975_v29 = vld [vmem:[#allocation11 + $0x550] sm:$0xff]  ;;  %v1028_v22 = vld [vmem:[#allocation11 + $0x6f8] sm:$0xff] }
 0x2ef   :  { %2667 = vmatprep.subr.bf16.mxu0 %v6555_v30  ;;  %v979_v30 = vld [vmem:[#allocation11 + $0x570] sm:$0xff] }
 0x2f0   :  { %v6616_v37 = vcombine.low %v975_v29, %v979_v30 }
 0x2f1   :  { %2582 = vmatpush1.bf16.msra.mxu1 %v6552_v18  ;;  %v6617_v18 = vcombine.high %v975_v29, %v979_v30  ;;  %v1032_v29 = vld [vmem:[#allocation11 + $0x718] sm:$0xff] }
 0x2f2   :  { %2668 = vmatpush1.bf16.msra.mxu0 %v6554_v19  ;;  %2583 = vmatprep.subr.bf16.mxu1 %v6561_v21  ;;  %v6619_v19 = vcombine.high %v976_v31, %v980_v32  ;;  %v983_v21 = vld [vmem:[#allocation11 + $0x590] sm:$0xff]  ;;  %v1036_v30 = vld [vmem:[#allocation11 + $0x738] sm:$0xff]  ;;  %v6666_v32 = vcombine.low %v1024_v20, %v1028_v22 }
 0x2f3   :  { %2669 = vmatprep.subr.bf16.mxu0 %v6563_v23  ;;  %v987_v23 = vld [vmem:[#allocation11 + $0x5b0] sm:$0xff] }
 0x2f4   :  { %v6624_v48 = vcombine.low %v983_v21, %v987_v23 }
 0x2f5   :  { %2584 = vmatpush1.bf16.msra.mxu1 %v6560_v40  ;;  %v6625_v40 = vcombine.high %v983_v21, %v987_v23  ;;  %v1040_v21 = vld [vmem:[#allocation11 + $0x758] sm:$0xff] }
 0x2f6   :  { %2670 = vmatpush1.bf16.msra.mxu0 %v6562_v41  ;;  %2585 = vmatprep.subr.bf16.mxu1 %v6569_v43  ;;  %v6627_v41 = vcombine.high %v984_v24, %v988_v35  ;;  %v991_v43 = vld [vmem:[#allocation11 + $0x5d0] sm:$0xff]  ;;  %v1044_v23 = vld [vmem:[#allocation11 + $0x778] sm:$0xff]  ;;  %v6674_v35 = vcombine.low %v1032_v29, %v1036_v30 }
 0x2f7   :  { %2671 = vmatprep.subr.bf16.mxu0 %v6571_v45  ;;  %v995_v45 = vld [vmem:[#allocation11 + $0x5f0] sm:$0xff] }
 0x2f9   :  { %2586 = vmatpush1.bf16.msra.mxu1 %v6568_v50  ;;  %v6633_v50 = vcombine.high %v991_v43, %v995_v45 }
 0x2fa   :  { %2672 = vmatpush1.bf16.msra.mxu0 %v6570_v51  ;;  %2598 = vmatprep.subr.bf16.mxu1 %v6577_v52  ;;  %v6635_v51 = vcombine.high %v992_v46, %v996_v47  ;;  %v999_v52 = vld [vmem:[#allocation11 + $0x610] sm:$0xff]  ;;  %v6682_v47 = vcombine.low %v1040_v21, %v1044_v23 }
 0x2fb   :  { %2684 = vmatprep.subr.bf16.mxu0 %v6579_v53  ;;  %v1003_v53 = vld [vmem:[#allocation11 + $0x630] sm:$0xff] }
 0x2fc   :  { %2588 = vmatmul.mubr.bf16.vlgmr.msra.gmra.mrb[4].mxu1 %v8574_v10  ;;  %v6641_v61 = vcombine.high %v999_v52, %v1003_v53 }
 0x2fd   :  { %2674 = vmatmul.mubr.bf16.vlgmr.msra.gmra.mrb[16].mxu0 %v8574_v10  ;;  %2599 = vmatpush1.bf16.msra.mxu1 %v6576_v59  ;;  %v6594_v10 = vcombine.low %v952_v11, %v956_v3  ;;  %v6632_v59 = vcombine.low %v991_v43, %v995_v45  ;;  %v6640_v11 = vcombine.low %v999_v52, %v1003_v53  ;;  %v1048_v43 = vld [vmem:[#allocation11 + $0x798] sm:$0xff] }
 0x2fe   :  { %2630 = vmatprep.mubr.bf16.mxu1 %v8600_v39  ;;  %2685 = vmatpush1.bf16.msra.mxu0 %v6578_v62  ;;  %v6643_v62 = vcombine.high %v1000_v54, %v1004_v57  ;;  %v6642_v3 = vcombine.low %v1000_v54, %v1004_v57  ;;  %v1052_v45 = vld [vmem:[#allocation11 + $0x7b8] sm:$0xff] }
 0x2ff   :  { %2716 = vmatprep.mubr.bf16.mxu0 %v8600_v39  ;;  %2600 = vmatprep.subr.bf16.mxu1 %v6585_v63  ;;  %v6600_v39 = vcombine.low %v959_v8, %v963_v9  ;;  %v1007_v63 = vld [vmem:[#allocation11 + $0x650] sm:$0xff]  ;;  %v1016_v8 = vld [vmem:[#allocation11 + $0x698] sm:$0xff]  ;;  %v6690_v57 = vcombine.low %v1048_v43, %v1052_v45 }
 0x300   :  { %2686 = vmatprep.subr.bf16.mxu0 %v6587_v2  ;;  %v1012_v2 = vld [vmem:[#allocation11 + $0x678] sm:$0xff]  ;;  %v6648_v12 = vcombine.low %v1007_v63, %v1011_v0 }
 0x301   :  { %2601 = vmatpush1.bf16.msra.mxu1 %v6584_v4  ;;  %v6649_v4 = vcombine.high %v1007_v63, %v1011_v0  ;;  %v1020_v9 = vld [vmem:[#allocation11 + $0x6b8] sm:$0xff]  ;;  %v6650_v13 = vcombine.low %v1008_v1, %v1012_v2  ;;  %v7461_v63 = vld [vmem:[#allocation14 + $0x4] ss:$28 sps:$4 sm:$0xff]   ;;  %v7464_v0 = vld [vmem:[#allocation14 + $0xc] ss:$28 sps:$4 sm:$0xff]  }
 0x302   :  { %2687 = vmatpush1.bf16.msra.mxu0 %v6586_v5  ;;  %2602 = vmatprep.subr.bf16.mxu1 %v6593_v6  ;;  %v6651_v5 = vcombine.high %v1008_v1, %v1012_v2  ;;  %v1015_v6 = vld [vmem:[#allocation11 + $0x690] sm:$0xff]  ;;  %v6658_v26 = vcombine.low %v1016_v8, %v1020_v9  ;;  %v1056_v52 = vld [vmem:[#allocation11 + $0x7d8] sm:$0xff]  ;;  %v7459_v1 = vld [vmem:[#allocation14] ss:$28 sps:$4 sm:$0xff]  }
 0x303   :  { %2688 = vmatprep.subr.bf16.mxu0 %v6595_v7  ;;  %v1019_v7 = vld [vmem:[#allocation11 + $0x6b0] sm:$0xff]  ;;  %v1060_v53 = vld [vmem:[#allocation11 + $0x7f8] sm:$0xff] }
 0x304   :  { %v6656_v25 = vcombine.low %v1015_v6, %v1019_v7  ;;  %v7462_v2 = vld [vmem:[#allocation14 + $0x8] ss:$28 sps:$4 sm:$0xff]  }
 0x305   :  { %2603 = vmatpush1.bf16.msra.mxu1 %v6592_v14  ;;  %v6657_v14 = vcombine.high %v1015_v6, %v1019_v7  ;;  %v7473_v6 = vld [vmem:[#allocation14 + $0x74] ss:$28 sps:$4 sm:$0xff]   ;;  %v7476_v7 = vld [vmem:[#allocation14 + $0x7c] ss:$28 sps:$4 sm:$0xff]  }
 0x306   :  { %2689 = vmatpush1.bf16.msra.mxu0 %v6594_v10  ;;  %2604 = vmatprep.subr.bf16.mxu1 %v6601_v15  ;;  %v6659_v10 = vcombine.high %v1016_v8, %v1020_v9  ;;  %v1023_v15 = vld [vmem:[#allocation11 + $0x6d0] sm:$0xff]  ;;  %v7474_v9 = vld [vmem:[#allocation14 + $0x78] ss:$28 sps:$4 sm:$0xff]  }
 0x307   :  { %2690 = vmatprep.subr.bf16.mxu0 %v6603_v16  ;;  %v1027_v16 = vld [vmem:[#allocation11 + $0x6f0] sm:$0xff] }
 0x308   :  { %v6664_v31 = vcombine.low %v1023_v15, %v1027_v16  ;;  %v7471_v8 = vld [vmem:[#allocation14 + $0x70] ss:$28 sps:$4 sm:$0xff]  }
 0x309   :  { %2605 = vmatpush1.bf16.msra.mxu1 %v6600_v39  ;;  %v6665_v39 = vcombine.high %v1023_v15, %v1027_v16  ;;  %v7488_v15 = vld [vmem:[#allocation14 + $0xec] ss:$28 sps:$4 sm:$0xff]   ;;  %v7483_v16 = vld [vmem:[#allocation14 + $0xe0] ss:$28 sps:$4 sm:$0xff]  }
 0x30a   :  { %2691 = vmatpush1.bf16.msra.mxu0 %v6602_v27  ;;  %2606 = vmatprep.subr.bf16.mxu1 %v6609_v55  ;;  %v6667_v27 = vcombine.high %v1024_v20, %v1028_v22  ;;  %v1031_v55 = vld [vmem:[#allocation11 + $0x710] sm:$0xff]  ;;  %v7491_v22 = vld [vmem:[#allocation14 + $0x11c] ss:$28 sps:$4 sm:$0xff]  }
 0x30b   :  { %2692 = vmatprep.subr.bf16.mxu0 %v6611_v28  ;;  %v1035_v28 = vld [vmem:[#allocation11 + $0x730] sm:$0xff] }
 0x30c   :  { %v6672_v24 = vcombine.low %v1031_v55, %v1035_v28  ;;  %v7486_v20 = vld [vmem:[#allocation14 + $0xe8] ss:$28 sps:$4 sm:$0xff]  }
 0x30d   :  { %2607 = vmatpush1.bf16.msra.mxu1 %v6608_v33  ;;  %v6673_v33 = vcombine.high %v1031_v55, %v1035_v28  ;;  %v7500_v55 = vld [vmem:[#allocation14 + $0x15c] ss:$28 sps:$4 sm:$0xff]   ;;  %v7495_v28 = vld [vmem:[#allocation14 + $0x150] ss:$28 sps:$4 sm:$0xff]  }
 0x30e   :  { %2693 = vmatpush1.bf16.msra.mxu0 %v6610_v17  ;;  %2608 = vmatprep.subr.bf16.mxu1 %v6617_v18  ;;  %v6675_v17 = vcombine.high %v1032_v29, %v1036_v30  ;;  %v1039_v18 = vld [vmem:[#allocation11 + $0x750] sm:$0xff]  ;;  %v7498_v29 = vld [vmem:[#allocation14 + $0x158] ss:$28 sps:$4 sm:$0xff]  }
 0x30f   :  { %2694 = vmatprep.subr.bf16.mxu0 %v6619_v19  ;;  %v1043_v19 = vld [vmem:[#allocation11 + $0x770] sm:$0xff] }
 0x310   :  { %v6680_v46 = vcombine.low %v1039_v18, %v1043_v19  ;;  %v7503_v30 = vld [vmem:[#allocation14 + $0x18c] ss:$28 sps:$4 sm:$0xff]  }
 0x311   :  { %2609 = vmatpush1.bf16.msra.mxu1 %v6616_v37  ;;  %v6681_v37 = vcombine.high %v1039_v18, %v1043_v19  ;;  %v7512_v18 = vld [vmem:[#allocation14 + $0x1cc] ss:$28 sps:$4 sm:$0xff]   ;;  %v7507_v19 = vld [vmem:[#allocation14 + $0x1c0] ss:$28 sps:$4 sm:$0xff]  }
 0x312   :  { %2695 = vmatpush1.bf16.msra.mxu0 %v6618_v38  ;;  %2610 = vmatprep.subr.bf16.mxu1 %v6625_v40  ;;  %v6683_v38 = vcombine.high %v1040_v21, %v1044_v23  ;;  %v1047_v40 = vld [vmem:[#allocation11 + $0x790] sm:$0xff]  ;;  %v7515_v23 = vld [vmem:[#allocation14 + $0x1fc] ss:$28 sps:$4 sm:$0xff]  }
 0x313   :  { %2696 = vmatprep.subr.bf16.mxu0 %v6627_v41  ;;  %v1051_v41 = vld [vmem:[#allocation11 + $0x7b0] sm:$0xff] }
 0x314   :  { %v6688_v54 = vcombine.low %v1047_v40, %v1051_v41  ;;  %v7510_v21 = vld [vmem:[#allocation14 + $0x1c8] ss:$28 sps:$4 sm:$0xff]  }
 0x315   :  { %2611 = vmatpush1.bf16.msra.mxu1 %v6624_v48  ;;  %v6689_v48 = vcombine.high %v1047_v40, %v1051_v41  ;;  %v7524_v40 = vld [vmem:[#allocation14 + $0x23c] ss:$28 sps:$4 sm:$0xff]   ;;  %v7519_v41 = vld [vmem:[#allocation14 + $0x230] ss:$28 sps:$4 sm:$0xff]  }
 0x316   :  { %2697 = vmatpush1.bf16.msra.mxu0 %v6626_v49  ;;  %2612 = vmatprep.subr.bf16.mxu1 %v6633_v50  ;;  %v6691_v49 = vcombine.high %v1048_v43, %v1052_v45  ;;  %v1055_v50 = vld [vmem:[#allocation11 + $0x7d0] sm:$0xff]  ;;  %v7522_v43 = vld [vmem:[#allocation14 + $0x238] ss:$28 sps:$4 sm:$0xff]  }
 0x317   :  { %2698 = vmatprep.subr.bf16.mxu0 %v6635_v51  ;;  %v1059_v51 = vld [vmem:[#allocation11 + $0x7f0] sm:$0xff] }
 0x318   :  { %v7527_v45 = vld [vmem:[#allocation14 + $0x26c] ss:$28 sps:$4 sm:$0xff]  }
 0x319   :  { %2613 = vmatpush1.bf16.msra.mxu1 %v6632_v59  ;;  %v6697_v59 = vcombine.high %v1055_v50, %v1059_v51 }
 0x31a   :  { %2699 = vmatpush1.bf16.msra.mxu0 %v6634_v60  ;;  %2614 = vmatprep.subr.bf16.mxu1 %v6641_v61  ;;  %v6699_v60 = vcombine.high %v1056_v52, %v1060_v53  ;;  %v6696_v61 = vcombine.low %v1055_v50, %v1059_v51  ;;  %v7536_v50 = vld [vmem:[#allocation14 + $0x2ac] ss:$28 sps:$4 sm:$0xff]   ;;  %v7531_v51 = vld [vmem:[#allocation14 + $0x2a0] ss:$28 sps:$4 sm:$0xff]  }
 0x31b   :  { %2700 = vmatprep.subr.bf16.mxu0 %v6643_v62  ;;  %v6698_v62 = vcombine.low %v1056_v52, %v1060_v53  ;;  %v7534_v52 = vld [vmem:[#allocation14 + $0x2a8] ss:$28 sps:$4 sm:$0xff]   ;;  %v7539_v53 = vld [vmem:[#allocation14 + $0x2dc] ss:$28 sps:$4 sm:$0xff]  }
 0x31d   :  { %2615 = vmatpush1.bf16.msra.mxu1 %v6640_v11  ;;  %v7467_v11 = vld [vmem:[#allocation14 + $0x3c] ss:$28 sps:$4 sm:$0xff]  }
 0x31e   :  { %2701 = vmatpush1.bf16.msra.mxu0 %v6642_v3  ;;  %2616 = vmatprep.subr.bf16.mxu1 %v6649_v4  ;;  %v7470_v3 = vld [vmem:[#allocation14 + $0x44] ss:$28 sps:$4 sm:$0xff]   ;;  %v7465_v4 = vld [vmem:[#allocation14 + $0x38] ss:$28 sps:$4 sm:$0xff]  }
 0x31f   :  { %2702 = vmatprep.subr.bf16.mxu0 %v6651_v5  ;;  %v7468_v5 = vld [vmem:[#allocation14 + $0x40] ss:$28 sps:$4 sm:$0xff]  }
 0x321   :  { %2617 = vmatpush1.bf16.msra.mxu1 %v6648_v12  ;;  %v7479_v12 = vld [vmem:[#allocation14 + $0xac] ss:$28 sps:$4 sm:$0xff]  }
 0x322   :  { %2703 = vmatpush1.bf16.msra.mxu0 %v6650_v13  ;;  %2618 = vmatprep.subr.bf16.mxu1 %v6657_v14  ;;  %v7482_v13 = vld [vmem:[#allocation14 + $0xb4] ss:$28 sps:$4 sm:$0xff]   ;;  %v7477_v14 = vld [vmem:[#allocation14 + $0xa8] ss:$28 sps:$4 sm:$0xff]  }
 0x323   :  { %2704 = vmatprep.subr.bf16.mxu0 %v6659_v10  ;;  %v7485_v10 = vld [vmem:[#allocation14 + $0xe4] ss:$28 sps:$4 sm:$0xff]  }
 0x325   :  { %2619 = vmatpush1.bf16.msra.mxu1 %v6656_v25  ;;  %v7494_v25 = vld [vmem:[#allocation14 + $0x124] ss:$28 sps:$4 sm:$0xff]  }
 0x326   :  { %2705 = vmatpush1.bf16.msra.mxu0 %v6658_v26  ;;  %2620 = vmatprep.subr.bf16.mxu1 %v6665_v39  ;;  %v7489_v26 = vld [vmem:[#allocation14 + $0x118] ss:$28 sps:$4 sm:$0xff]   ;;  %v7492_v39 = vld [vmem:[#allocation14 + $0x120] ss:$28 sps:$4 sm:$0xff]  }
 0x327   :  { %2706 = vmatprep.subr.bf16.mxu0 %v6667_v27  ;;  %v7497_v27 = vld [vmem:[#allocation14 + $0x154] ss:$28 sps:$4 sm:$0xff]  }
 0x329   :  { %2621 = vmatpush1.bf16.msra.mxu1 %v6664_v31  ;;  %v7506_v31 = vld [vmem:[#allocation14 + $0x194] ss:$28 sps:$4 sm:$0xff]  }
 0x32a   :  { %2707 = vmatpush1.bf16.msra.mxu0 %v6666_v32  ;;  %2622 = vmatprep.subr.bf16.mxu1 %v6673_v33  ;;  %v7501_v32 = vld [vmem:[#allocation14 + $0x188] ss:$28 sps:$4 sm:$0xff]   ;;  %v7504_v33 = vld [vmem:[#allocation14 + $0x190] ss:$28 sps:$4 sm:$0xff]  }
 0x32b   :  { %2708 = vmatprep.subr.bf16.mxu0 %v6675_v17  ;;  %v7509_v17 = vld [vmem:[#allocation14 + $0x1c4] ss:$28 sps:$4 sm:$0xff]  }
 0x32d   :  { %2623 = vmatpush1.bf16.msra.mxu1 %v6672_v24  ;;  %v7518_v24 = vld [vmem:[#allocation14 + $0x204] ss:$28 sps:$4 sm:$0xff]  }
 0x32e   :  { %2709 = vmatpush1.bf16.msra.mxu0 %v6674_v35  ;;  %2624 = vmatprep.subr.bf16.mxu1 %v6681_v37  ;;  %v7513_v35 = vld [vmem:[#allocation14 + $0x1f8] ss:$28 sps:$4 sm:$0xff]   ;;  %v7516_v37 = vld [vmem:[#allocation14 + $0x200] ss:$28 sps:$4 sm:$0xff]  }
 0x32f   :  { %2710 = vmatprep.subr.bf16.mxu0 %v6683_v38  ;;  %v7521_v38 = vld [vmem:[#allocation14 + $0x234] ss:$28 sps:$4 sm:$0xff]  }
 0x331   :  { %2625 = vmatpush1.bf16.msra.mxu1 %v6680_v46  ;;  %v7530_v46 = vld [vmem:[#allocation14 + $0x274] ss:$28 sps:$4 sm:$0xff]  }
 0x332   :  { %2711 = vmatpush1.bf16.msra.mxu0 %v6682_v47  ;;  %2626 = vmatprep.subr.bf16.mxu1 %v6689_v48  ;;  %v7525_v47 = vld [vmem:[#allocation14 + $0x268] ss:$28 sps:$4 sm:$0xff]   ;;  %v7528_v48 = vld [vmem:[#allocation14 + $0x270] ss:$28 sps:$4 sm:$0xff]  }
 0x333   :  { %2712 = vmatprep.subr.bf16.mxu0 %v6691_v49  ;;  %v7533_v49 = vld [vmem:[#allocation14 + $0x2a4] ss:$28 sps:$4 sm:$0xff]  }
 0x335   :  { %2627 = vmatpush1.bf16.msra.mxu1 %v6688_v54  ;;  %v7542_v54 = vld [vmem:[#allocation14 + $0x2e4] ss:$28 sps:$4 sm:$0xff]  }
 0x336   :  { %2713 = vmatpush1.bf16.msra.mxu0 %v6690_v57  ;;  %2628 = vmatprep.subr.bf16.mxu1 %v6697_v59  ;;  %v7537_v57 = vld [vmem:[#allocation14 + $0x2d8] ss:$28 sps:$4 sm:$0xff]   ;;  %v7540_v59 = vld [vmem:[#allocation14 + $0x2e0] ss:$28 sps:$4 sm:$0xff]  }
 0x337   :  { %2714 = vmatprep.subr.bf16.mxu0 %v6699_v60  ;;  %v7545_v60 = vld [vmem:[#allocation14 + $0x314] ss:$28 sps:$4 sm:$0xff]  }
 0x339   :  { %2629 = vmatpush1.bf16.msra.mxu1 %v6696_v61  ;;  %v7548_v61 = vld [vmem:[#allocation14 + $0x31c] ss:$28 sps:$4 sm:$0xff]  }
 0x33a   :  { %2715 = vmatpush1.bf16.msra.mxu0 %v6698_v62  ;;  %5604 = vmatprep.subr.bf16.mxu1 %v7461_v63  ;;  %v7543_v62 = vld [vmem:[#allocation14 + $0x310] ss:$28 sps:$4 sm:$0xff]   ;;  %v7546_v63 = vld [vmem:[#allocation14 + $0x318] ss:$28 sps:$4 sm:$0xff]  }
 0x33b   :  { %5776 = vmatprep.subr.bf16.mxu0 %v7464_v0  ;;  %v7551_v0 = vld [vmem:[#allocation14 + $0x34c] ss:$28 sps:$4 sm:$0xff]  }
 0x33c   :  { %2631 = vmatmul.mubr.bf16.vlgmr.msra.gmra.mrb[4].mxu1 %v8598_v34 }
 0x33d   :  { %2717 = vmatmul.mubr.bf16.vlgmr.msra.gmra.mrb[16].mxu0 %v8598_v34  ;;  %5605 = vmatpush1.bf16.msra.mxu1 %v7459_v1  ;;  %v7480_v34 = vld [vmem:[#allocation14 + $0xb0] ss:$28 sps:$4 sm:$0xff]  }
 0x33e   :  { %5777 = vmatpush1.bf16.msra.mxu0 %v7462_v2  ;;  %5606 = vmatprep.subr.bf16.mxu1 %v7467_v11  ;;  %v7554_v1 = vld [vmem:[#allocation14 + $0x354] ss:$28 sps:$4 sm:$0xff]   ;;  %v7549_v2 = vld [vmem:[#allocation14 + $0x348] ss:$28 sps:$4 sm:$0xff]  }
 0x33f   :  { %5778 = vmatprep.subr.bf16.mxu0 %v7470_v3  ;;  %v7552_v11 = vld [vmem:[#allocation14 + $0x350] ss:$28 sps:$4 sm:$0xff]   ;;  %v7557_v3 = vld [vmem:[#allocation14 + $0x384] ss:$28 sps:$4 sm:$0xff]  }
 0x341   :  { %5607 = vmatpush1.bf16.msra.mxu1 %v7465_v4  ;;  %v7560_v4 = vld [vmem:[#allocation14 + $0x38c] ss:$28 sps:$4 sm:$0xff]  }
 0x342   :  { %5779 = vmatpush1.bf16.msra.mxu0 %v7468_v5  ;;  %5608 = vmatprep.subr.bf16.mxu1 %v7473_v6  ;;  %v8614_v5 = vld [vmem:[#allocation13] sm:$0xff] }
 0x343   :  { %5780 = vmatprep.subr.bf16.mxu0 %v7476_v7  ;;  %v1066_v6 = vrot.slane %v8614_v5, %v8541_v42  ;;  %v1074_v7 = vrot.slane %v8614_v5, %v8589_v56 }
 0x345   :  { %5609 = vmatpush1.bf16.msra.mxu1 %v7471_v8  ;;  %v1070_v8 = vrot.slane %v8614_v5, %v8544_v44 }
 0x346   :  { %5781 = vmatpush1.bf16.msra.mxu0 %v7474_v9  ;;  %5610 = vmatprep.subr.bf16.mxu1 %v7479_v12  ;;  %v1078_v9 = vrot.slane %v8614_v5, %v8592_v58 }
 0x347   :  { %5782 = vmatprep.subr.bf16.mxu0 %v7482_v13 }
 0x349   :  { %5611 = vmatpush1.bf16.msra.mxu1 %v7477_v14 }
 0x34a   :  { %5783 = vmatpush1.bf16.msra.mxu0 %v7480_v34  ;;  %5612 = vmatprep.subr.bf16.mxu1 %v7485_v10 }
 0x34b   :  { %5784 = vmatprep.subr.bf16.mxu0 %v7488_v15 }
 0x34d   :  { %5613 = vmatpush1.bf16.msra.mxu1 %v7483_v16 }
 0x34e   :  { %5785 = vmatpush1.bf16.msra.mxu0 %v7486_v20  ;;  %5614 = vmatprep.subr.bf16.mxu1 %v7491_v22 }
 0x34f   :  { %5786 = vmatprep.subr.bf16.mxu0 %v7494_v25 }
 0x351   :  { %5615 = vmatpush1.bf16.msra.mxu1 %v7489_v26 }
 0x352   :  { %5787 = vmatpush1.bf16.msra.mxu0 %v7492_v39  ;;  %5616 = vmatprep.subr.bf16.mxu1 %v7497_v27 }
 0x353   :  { %5788 = vmatprep.subr.bf16.mxu0 %v7500_v55 }
 0x355   :  { %5617 = vmatpush1.bf16.msra.mxu1 %v7495_v28 }
 0x356   :  { %5789 = vmatpush1.bf16.msra.mxu0 %v7498_v29  ;;  %5618 = vmatprep.subr.bf16.mxu1 %v7503_v30 }
 0x357   :  { %5790 = vmatprep.subr.bf16.mxu0 %v7506_v31 }
 0x359   :  { %5619 = vmatpush1.bf16.msra.mxu1 %v7501_v32 }
 0x35a   :  { %5791 = vmatpush1.bf16.msra.mxu0 %v7504_v33  ;;  %5620 = vmatprep.subr.bf16.mxu1 %v7509_v17 }
 0x35b   :  { %5792 = vmatprep.subr.bf16.mxu0 %v7512_v18 }
 0x35d   :  { %5621 = vmatpush1.bf16.msra.mxu1 %v7507_v19 }
 0x35e   :  { %5793 = vmatpush1.bf16.msra.mxu0 %v7510_v21  ;;  %5622 = vmatprep.subr.bf16.mxu1 %v7515_v23 }
 0x35f   :  { %5794 = vmatprep.subr.bf16.mxu0 %v7518_v24 }
 0x361   :  { %5623 = vmatpush1.bf16.msra.mxu1 %v7513_v35 }
 0x362   :  { %5795 = vmatpush1.bf16.msra.mxu0 %v7516_v37  ;;  %5624 = vmatprep.subr.bf16.mxu1 %v7521_v38  ;;  %v7555_v38 = vld [vmem:[#allocation14 + $0x380] ss:$28 sps:$4 sm:$0xff]  }
 0x363   :  { %5796 = vmatprep.subr.bf16.mxu0 %v7524_v40  ;;  %v7558_v40 = vld [vmem:[#allocation14 + $0x388] ss:$28 sps:$4 sm:$0xff]  }
 0x365   :  { %5625 = vmatpush1.bf16.msra.mxu1 %v7519_v41  ;;  %v7563_v41 = vld [vmem:[#allocation14 + $0x3bc] ss:$28 sps:$4 sm:$0xff]  }
 0x366   :  { %5797 = vmatpush1.bf16.msra.mxu0 %v7522_v43  ;;  %5626 = vmatprep.subr.bf16.mxu1 %v7527_v45  ;;  %v7566_v43 = vld [vmem:[#allocation14 + $0x3c4] ss:$28 sps:$4 sm:$0xff]   ;;  %v7561_v45 = vld [vmem:[#allocation14 + $0x3b8] ss:$28 sps:$4 sm:$0xff]  }
 0x367   :  { %5798 = vmatprep.subr.bf16.mxu0 %v7530_v46  ;;  %v7564_v46 = vld [vmem:[#allocation14 + $0x3c0] ss:$28 sps:$4 sm:$0xff]  }
 0x369   :  { %5627 = vmatpush1.bf16.msra.mxu1 %v7525_v47  ;;  %v7569_v47 = vld [vmem:[#allocation14 + $0x3f4] ss:$28 sps:$4 sm:$0xff]  }
 0x36a   :  { %5799 = vmatpush1.bf16.msra.mxu0 %v7528_v48  ;;  %5628 = vmatprep.subr.bf16.mxu1 %v7533_v49  ;;  %v7572_v48 = vld [vmem:[#allocation14 + $0x3fc] ss:$28 sps:$4 sm:$0xff]   ;;  %v7567_v49 = vld [vmem:[#allocation14 + $0x3f0] ss:$28 sps:$4 sm:$0xff]  }
 0x36b   :  { %5800 = vmatprep.subr.bf16.mxu0 %v7536_v50  ;;  %v7570_v50 = vld [vmem:[#allocation14 + $0x3f8] ss:$28 sps:$4 sm:$0xff]  }
 0x36d   :  { %5629 = vmatpush1.bf16.msra.mxu1 %v7531_v51  ;;  %v7575_v51 = vld [vmem:[#allocation14 + $0x42c] ss:$28 sps:$4 sm:$0xff]  }
 0x36e   :  { %5801 = vmatpush1.bf16.msra.mxu0 %v7534_v52  ;;  %5630 = vmatprep.subr.bf16.mxu1 %v7539_v53  ;;  %v7578_v52 = vld [vmem:[#allocation14 + $0x434] ss:$28 sps:$4 sm:$0xff]   ;;  %v7573_v53 = vld [vmem:[#allocation14 + $0x428] ss:$28 sps:$4 sm:$0xff]  }
 0x36f   :  { %5802 = vmatprep.subr.bf16.mxu0 %v7542_v54  ;;  %v7576_v54 = vld [vmem:[#allocation14 + $0x430] ss:$28 sps:$4 sm:$0xff]  }
 0x371   :  { %5631 = vmatpush1.bf16.msra.mxu1 %v7537_v57  ;;  %v7581_v57 = vld [vmem:[#allocation14 + $0x464] ss:$28 sps:$4 sm:$0xff]  }
 0x372   :  { %5803 = vmatpush1.bf16.msra.mxu0 %v7540_v59  ;;  %5632 = vmatprep.subr.bf16.mxu1 %v7545_v60  ;;  %v7584_v59 = vld [vmem:[#allocation14 + $0x46c] ss:$28 sps:$4 sm:$0xff]   ;;  %v7579_v60 = vld [vmem:[#allocation14 + $0x460] ss:$28 sps:$4 sm:$0xff]  }
 0x373   :  { %5804 = vmatprep.subr.bf16.mxu0 %v7548_v61  ;;  %v7582_v61 = vld [vmem:[#allocation14 + $0x468] ss:$28 sps:$4 sm:$0xff]  }
 0x375   :  { %5633 = vmatpush1.bf16.msra.mxu1 %v7543_v62  ;;  %v7587_v62 = vld [vmem:[#allocation14 + $0x49c] ss:$28 sps:$4 sm:$0xff]  }
 0x376   :  { %5805 = vmatpush1.bf16.msra.mxu0 %v7546_v63  ;;  %5634 = vmatprep.subr.bf16.mxu1 %v7551_v0  ;;  %v7590_v63 = vld [vmem:[#allocation14 + $0x4a4] ss:$28 sps:$4 sm:$0xff]   ;;  %v7585_v0 = vld [vmem:[#allocation14 + $0x498] ss:$28 sps:$4 sm:$0xff]  }
 0x377   :  { %5806 = vmatprep.subr.bf16.mxu0 %v7554_v1  ;;  %v7588_v1 = vld [vmem:[#allocation14 + $0x4a0] ss:$28 sps:$4 sm:$0xff]  }
 0x379   :  { %5635 = vmatpush1.bf16.msra.mxu1 %v7549_v2  ;;  %v7593_v2 = vld [vmem:[#allocation14 + $0x4d4] ss:$28 sps:$4 sm:$0xff]  }
 0x37a   :  { %5807 = vmatpush1.bf16.msra.mxu0 %v7552_v11  ;;  %5647 = vmatprep.subr.bf16.mxu1 %v7557_v3  ;;  %v7596_v11 = vld [vmem:[#allocation14 + $0x4dc] ss:$28 sps:$4 sm:$0xff]   ;;  %v7591_v3 = vld [vmem:[#allocation14 + $0x4d0] ss:$28 sps:$4 sm:$0xff]  }
 0x37b   :  { %5819 = vmatprep.subr.bf16.mxu0 %v7560_v4  ;;  %v7594_v4 = vld [vmem:[#allocation14 + $0x4d8] ss:$28 sps:$4 sm:$0xff]  }
 0x38f   :  { %v2460_v12 = vpop.f32.mrb[0].mxu1  ;;  %v2546_v13 = vpop.f32.mrb[12].mxu0 }
 0x390   :  { %v7244_v14 = vadd.f32 %v2460_v12, %v1066_v6  ;;  %v7248_v34 = vadd.f32 %v2546_v13, %v1074_v7  ;;  %v2462_v10 = vpop.f32.mrb[1].mxu1  ;;  %v2548_v15 = vpop.f32.mrb[13].mxu0  ;;  %v7605_v12 = vld [vmem:[#allocation14 + $0x544] ss:$28 sps:$4 sm:$0xff]   ;;  %v7608_v13 = vld [vmem:[#allocation14 + $0x54c] ss:$28 sps:$4 sm:$0xff]  }
 0x391   :  { %v7245_v16 = vadd.f32 %v2462_v10, %v1070_v8  ;;  %v7249_v20 = vadd.f32 %v2548_v15, %v1078_v9  ;;  %v2464_v22 = vpop.f32.mrb[2].mxu1  ;;  %v2550_v25 = vpop.f32.mrb[14].mxu0  ;;  %v7611_v10 = vld [vmem:[#allocation14 + $0x57c] ss:$28 sps:$4 sm:$0xff]   ;;  %v7614_v15 = vld [vmem:[#allocation14 + $0x584] ss:$28 sps:$4 sm:$0xff]  }
 0x392   :  { %v7246_v26 = vadd.f32 %v2464_v22, %v1066_v6  ;;  %v7250_v39 = vadd.f32 %v2550_v25, %v1074_v7  ;;  %v2466_v27 = vpop.f32.mrb[3].mxu1  ;;  %v2552_v55 = vpop.f32.mrb[15].mxu0  ;;  %v2727_v30 = vmax.f32 %v7244_v14, 0.0  ;;  %v2729_v31 = vmax.f32 %v7248_v34, 0.0  ;;  %v7599_v6 = vld [vmem:[#allocation14 + $0x50c] ss:$28 sps:$4 sm:$0xff]  }
 0x393   :  { %v7247_v28 = vadd.f32 %v2466_v27, %v1070_v8  ;;  %v7251_v29 = vadd.f32 %v2552_v55, %v1078_v9  ;;  %v2728_v17 = vmax.f32 %v7245_v16, 0.0  ;;  %v2730_v18 = vmax.f32 %v7249_v20, 0.0  ;;  %v7602_v7 = vld [vmem:[#allocation14 + $0x514] ss:$28 sps:$4 sm:$0xff]   ;;  %v7597_v8 = vld [vmem:[#allocation14 + $0x508] ss:$28 sps:$4 sm:$0xff]  }
 0x394   :  { %v2735_v32 = vmax.f32 %v7246_v26, 0.0  ;;  %v2737_v33 = vmax.f32 %v7250_v39, 0.0  ;;  %v7600_v9 = vld [vmem:[#allocation14 + $0x510] ss:$28 sps:$4 sm:$0xff]   ;;  %v7603_v14 = vld [vmem:[#allocation14 + $0x540] ss:$28 sps:$4 sm:$0xff]  }
 0x395   :  { %v2736_v19 = vmax.f32 %v7247_v28, 0.0  ;;  %v2738_v21 = vmax.f32 %v7251_v29, 0.0  ;;  %v7606_v34 = vld [vmem:[#allocation14 + $0x548] ss:$28 sps:$4 sm:$0xff]   ;;  %v7609_v16 = vld [vmem:[#allocation14 + $0x578] ss:$28 sps:$4 sm:$0xff]  }
 0x396   :  { %v8624_v23 = vpack.c.bf16 %v2735_v32, %v2727_v30  ;;  %v8626_v24 = vpack.c.bf16 %v2737_v33, %v2729_v31  ;;  %v7612_v20 = vld [vmem:[#allocation14 + $0x580] ss:$28 sps:$4 sm:$0xff]   ;;  %v7617_v22 = vld [vmem:[#allocation14 + $0x5b4] ss:$28 sps:$4 sm:$0xff]   ;;  %v7623_v27 = vld [vmem:[#allocation14 + $0x5ec] ss:$28 sps:$4 sm:$0xff]  }
 0x397   :  { %v8628_v35 = vpack.c.bf16 %v2736_v19, %v2728_v17  ;;  %v8630_v37 = vpack.c.bf16 %v2738_v21, %v2730_v18  ;;  %v7620_v25 = vld [vmem:[#allocation14 + $0x5bc] ss:$28 sps:$4 sm:$0xff]   ;;  %v7615_v26 = vld [vmem:[#allocation14 + $0x5b0] ss:$28 sps:$4 sm:$0xff]   ;;  %v7621_v28 = vld [vmem:[#allocation14 + $0x5e8] ss:$28 sps:$4 sm:$0xff]  }
 0x398   :  { %v7618_v39 = vld [vmem:[#allocation14 + $0x5b8] ss:$28 sps:$4 sm:$0xff]   ;;  %v7624_v29 = vld [vmem:[#allocation14 + $0x5f0] ss:$28 sps:$4 sm:$0xff]   ;;  %v7629_v30 = vld [vmem:[#allocation14 + $0x624] ss:$28 sps:$4 sm:$0xff]  }
 0x399   :  { %5636 = vmatprep.mubr.bf16.mxu1 %v8628_v35  ;;  %5808 = vmatprep.mubr.bf16.mxu0 %v8628_v35  ;;  %v7626_v55 = vld [vmem:[#allocation14 + $0x5f4] ss:$28 sps:$4 sm:$0xff]   ;;  %v7632_v31 = vld [vmem:[#allocation14 + $0x62c] ss:$28 sps:$4 sm:$0xff]   ;;  %v7627_v32 = vld [vmem:[#allocation14 + $0x620] ss:$28 sps:$4 sm:$0xff]  }
 0x39a   :  { %5637 = vmatmul.mubr.bf16.vlgmr.msra.gmra.mrb[8].mxu1 %v8624_v23  ;;  %5809 = vmatmul.mubr.bf16.vlgmr.msra.gmra.mrb[20].mxu0 %v8624_v23  ;;  %v7630_v33 = vld [vmem:[#allocation14 + $0x628] ss:$28 sps:$4 sm:$0xff]   ;;  %v7635_v17 = vld [vmem:[#allocation14 + $0x65c] ss:$28 sps:$4 sm:$0xff]  }
 0x39b   :  { %5648 = vmatpush1.bf16.msra.mxu1 %v7555_v38  ;;  %5820 = vmatpush1.bf16.msra.mxu0 %v7558_v40  ;;  %v7638_v18 = vld [vmem:[#allocation14 + $0x664] ss:$28 sps:$4 sm:$0xff]   ;;  %v7633_v19 = vld [vmem:[#allocation14 + $0x658] ss:$28 sps:$4 sm:$0xff]  }
 0x39c   :  { %5679 = vmatprep.mubr.bf16.mxu1 %v8630_v37  ;;  %5851 = vmatprep.mubr.bf16.mxu0 %v8630_v37  ;;  %v7636_v21 = vld [vmem:[#allocation14 + $0x660] ss:$28 sps:$4 sm:$0xff]   ;;  %v7641_v38 = vld [vmem:[#allocation14 + $0x694] ss:$28 sps:$4 sm:$0xff]  }
 0x39d   :  { %5649 = vmatprep.subr.bf16.mxu1 %v7563_v41  ;;  %5821 = vmatprep.subr.bf16.mxu0 %v7566_v43  ;;  %v7644_v40 = vld [vmem:[#allocation14 + $0x69c] ss:$28 sps:$4 sm:$0xff]   ;;  %v7639_v41 = vld [vmem:[#allocation14 + $0x690] ss:$28 sps:$4 sm:$0xff]  }
 0x39e   :  { %v7642_v43 = vld [vmem:[#allocation14 + $0x698] ss:$28 sps:$4 sm:$0xff]  }
 0x39f   :  { %5650 = vmatpush1.bf16.msra.mxu1 %v7561_v45  ;;  %5822 = vmatpush1.bf16.msra.mxu0 %v7564_v46  ;;  %v7647_v45 = vld [vmem:[#allocation14 + $0x6cc] ss:$28 sps:$4 sm:$0xff]   ;;  %v7650_v46 = vld [vmem:[#allocation14 + $0x6d4] ss:$28 sps:$4 sm:$0xff]  }
 0x3a0   :  { %5651 = vmatprep.subr.bf16.mxu1 %v7569_v47  ;;  %5823 = vmatprep.subr.bf16.mxu0 %v7572_v48  ;;  %v7645_v47 = vld [vmem:[#allocation14 + $0x6c8] ss:$28 sps:$4 sm:$0xff]   ;;  %v7648_v48 = vld [vmem:[#allocation14 + $0x6d0] ss:$28 sps:$4 sm:$0xff]  }
 0x3a3   :  { %5652 = vmatpush1.bf16.msra.mxu1 %v7567_v49  ;;  %5824 = vmatpush1.bf16.msra.mxu0 %v7570_v50  ;;  %v7653_v49 = vld [vmem:[#allocation14 + $0x704] ss:$28 sps:$4 sm:$0xff]   ;;  %v7656_v50 = vld [vmem:[#allocation14 + $0x70c] ss:$28 sps:$4 sm:$0xff]  }
 0x3a4   :  { %5653 = vmatprep.subr.bf16.mxu1 %v7575_v51  ;;  %5825 = vmatprep.subr.bf16.mxu0 %v7578_v52  ;;  %v7651_v51 = vld [vmem:[#allocation14 + $0x700] ss:$28 sps:$4 sm:$0xff]   ;;  %v7654_v52 = vld [vmem:[#allocation14 + $0x708] ss:$28 sps:$4 sm:$0xff]  }
 0x3a7   :  { %5654 = vmatpush1.bf16.msra.mxu1 %v7573_v53  ;;  %5826 = vmatpush1.bf16.msra.mxu0 %v7576_v54  ;;  %v7659_v53 = vld [vmem:[#allocation14 + $0x73c] ss:$28 sps:$4 sm:$0xff]   ;;  %v7662_v54 = vld [vmem:[#allocation14 + $0x744] ss:$28 sps:$4 sm:$0xff]  }
 0x3a8   :  { %5655 = vmatprep.subr.bf16.mxu1 %v7581_v57  ;;  %5827 = vmatprep.subr.bf16.mxu0 %v7584_v59  ;;  %v7657_v57 = vld [vmem:[#allocation14 + $0x738] ss:$28 sps:$4 sm:$0xff]   ;;  %v7660_v59 = vld [vmem:[#allocation14 + $0x740] ss:$28 sps:$4 sm:$0xff]  }
 0x3ab   :  { %5656 = vmatpush1.bf16.msra.mxu1 %v7579_v60  ;;  %5828 = vmatpush1.bf16.msra.mxu0 %v7582_v61  ;;  %v7665_v60 = vld [vmem:[#allocation14 + $0x774] ss:$28 sps:$4 sm:$0xff]   ;;  %v7668_v61 = vld [vmem:[#allocation14 + $0x77c] ss:$28 sps:$4 sm:$0xff]  }
 0x3ac   :  { %5657 = vmatprep.subr.bf16.mxu1 %v7587_v62  ;;  %5829 = vmatprep.subr.bf16.mxu0 %v7590_v63  ;;  %v7663_v62 = vld [vmem:[#allocation14 + $0x770] ss:$28 sps:$4 sm:$0xff]   ;;  %v7666_v63 = vld [vmem:[#allocation14 + $0x778] ss:$28 sps:$4 sm:$0xff]  }
 0x3af   :  { %5658 = vmatpush1.bf16.msra.mxu1 %v7585_v0  ;;  %5830 = vmatpush1.bf16.msra.mxu0 %v7588_v1  ;;  %v7671_v0 = vld [vmem:[#allocation14 + $0x7ac] ss:$28 sps:$4 sm:$0xff]   ;;  %v7674_v1 = vld [vmem:[#allocation14 + $0x7b4] ss:$28 sps:$4 sm:$0xff]  }
 0x3b0   :  { %5659 = vmatprep.subr.bf16.mxu1 %v7593_v2  ;;  %5831 = vmatprep.subr.bf16.mxu0 %v7596_v11  ;;  %v7669_v2 = vld [vmem:[#allocation14 + $0x7a8] ss:$28 sps:$4 sm:$0xff]   ;;  %v7672_v11 = vld [vmem:[#allocation14 + $0x7b0] ss:$28 sps:$4 sm:$0xff]  }
 0x3b3   :  { %5660 = vmatpush1.bf16.msra.mxu1 %v7591_v3  ;;  %5832 = vmatpush1.bf16.msra.mxu0 %v7594_v4  ;;  %v7677_v3 = vld [vmem:[#allocation14 + $0x7e4] ss:$28 sps:$4 sm:$0xff]   ;;  %v7680_v4 = vld [vmem:[#allocation14 + $0x7ec] ss:$28 sps:$4 sm:$0xff]  }
 0x3b4   :  { %5661 = vmatprep.subr.bf16.mxu1 %v7599_v6  ;;  %5833 = vmatprep.subr.bf16.mxu0 %v7602_v7  ;;  %v7675_v6 = vld [vmem:[#allocation14 + $0x7e0] ss:$28 sps:$4 sm:$0xff]   ;;  %v7678_v7 = vld [vmem:[#allocation14 + $0x7e8] ss:$28 sps:$4 sm:$0xff]  }
 0x3b7   :  { %5662 = vmatpush1.bf16.msra.mxu1 %v7597_v8  ;;  %5834 = vmatpush1.bf16.msra.mxu0 %v7600_v9  ;;  %v7683_v8 = vld [vmem:[#allocation14 + $0x81c] ss:$28 sps:$4 sm:$0xff]   ;;  %v7686_v9 = vld [vmem:[#allocation14 + $0x824] ss:$28 sps:$4 sm:$0xff]  }
 0x3b8   :  { %5663 = vmatprep.subr.bf16.mxu1 %v7605_v12  ;;  %5835 = vmatprep.subr.bf16.mxu0 %v7608_v13  ;;  %v7681_v12 = vld [vmem:[#allocation14 + $0x818] ss:$28 sps:$4 sm:$0xff]   ;;  %v7684_v13 = vld [vmem:[#allocation14 + $0x820] ss:$28 sps:$4 sm:$0xff]  }
 0x3bb   :  { %5664 = vmatpush1.bf16.msra.mxu1 %v7603_v14  ;;  %5836 = vmatpush1.bf16.msra.mxu0 %v7606_v34  ;;  %v7689_v14 = vld [vmem:[#allocation14 + $0x854] ss:$28 sps:$4 sm:$0xff]   ;;  %v7692_v34 = vld [vmem:[#allocation14 + $0x85c] ss:$28 sps:$4 sm:$0xff]  }
 0x3bc   :  { %5665 = vmatprep.subr.bf16.mxu1 %v7611_v10  ;;  %5837 = vmatprep.subr.bf16.mxu0 %v7614_v15  ;;  %v7687_v10 = vld [vmem:[#allocation14 + $0x850] ss:$28 sps:$4 sm:$0xff]   ;;  %v7690_v15 = vld [vmem:[#allocation14 + $0x858] ss:$28 sps:$4 sm:$0xff]  }
 0x3bf   :  { %5666 = vmatpush1.bf16.msra.mxu1 %v7609_v16  ;;  %5838 = vmatpush1.bf16.msra.mxu0 %v7612_v20  ;;  %v7695_v16 = vld [vmem:[#allocation14 + $0x88c] ss:$28 sps:$4 sm:$0xff]   ;;  %v7698_v20 = vld [vmem:[#allocation14 + $0x894] ss:$28 sps:$4 sm:$0xff]  }
 0x3c0   :  { %5667 = vmatprep.subr.bf16.mxu1 %v7617_v22  ;;  %5839 = vmatprep.subr.bf16.mxu0 %v7620_v25  ;;  %v7693_v22 = vld [vmem:[#allocation14 + $0x888] ss:$28 sps:$4 sm:$0xff]   ;;  %v7696_v25 = vld [vmem:[#allocation14 + $0x890] ss:$28 sps:$4 sm:$0xff]  }
 0x3c3   :  { %5668 = vmatpush1.bf16.msra.mxu1 %v7615_v26  ;;  %5840 = vmatpush1.bf16.msra.mxu0 %v7618_v39  ;;  %v7701_v26 = vld [vmem:[#allocation14 + $0x8c4] ss:$28 sps:$4 sm:$0xff]   ;;  %v7704_v39 = vld [vmem:[#allocation14 + $0x8cc] ss:$28 sps:$4 sm:$0xff]  }
 0x3c4   :  { %5669 = vmatprep.subr.bf16.mxu1 %v7623_v27  ;;  %5841 = vmatprep.subr.bf16.mxu0 %v7626_v55  ;;  %v7699_v27 = vld [vmem:[#allocation14 + $0x8c0] ss:$28 sps:$4 sm:$0xff]   ;;  %v7702_v55 = vld [vmem:[#allocation14 + $0x8c8] ss:$28 sps:$4 sm:$0xff]  }
 0x3c7   :  { %5670 = vmatpush1.bf16.msra.mxu1 %v7621_v28  ;;  %5842 = vmatpush1.bf16.msra.mxu0 %v7624_v29  ;;  %v7707_v28 = vld [vmem:[#allocation14 + $0x8fc] ss:$28 sps:$4 sm:$0xff]   ;;  %v7710_v29 = vld [vmem:[#allocation14 + $0x904] ss:$28 sps:$4 sm:$0xff]  }
 0x3c8   :  { %5671 = vmatprep.subr.bf16.mxu1 %v7629_v30  ;;  %5843 = vmatprep.subr.bf16.mxu0 %v7632_v31  ;;  %v7705_v30 = vld [vmem:[#allocation14 + $0x8f8] ss:$28 sps:$4 sm:$0xff]   ;;  %v7708_v31 = vld [vmem:[#allocation14 + $0x900] ss:$28 sps:$4 sm:$0xff]  }
 0x3cb   :  { %5672 = vmatpush1.bf16.msra.mxu1 %v7627_v32  ;;  %5844 = vmatpush1.bf16.msra.mxu0 %v7630_v33  ;;  %v7713_v32 = vld [vmem:[#allocation14 + $0x934] ss:$28 sps:$4 sm:$0xff]   ;;  %v7716_v33 = vld [vmem:[#allocation14 + $0x93c] ss:$28 sps:$4 sm:$0xff]  }
 0x3cc   :  { %5673 = vmatprep.subr.bf16.mxu1 %v7635_v17  ;;  %5845 = vmatprep.subr.bf16.mxu0 %v7638_v18  ;;  %v7711_v17 = vld [vmem:[#allocation14 + $0x930] ss:$28 sps:$4 sm:$0xff]   ;;  %v7714_v18 = vld [vmem:[#allocation14 + $0x938] ss:$28 sps:$4 sm:$0xff]  }
 0x3cf   :  { %5674 = vmatpush1.bf16.msra.mxu1 %v7633_v19  ;;  %5846 = vmatpush1.bf16.msra.mxu0 %v7636_v21  ;;  %v7719_v19 = vld [vmem:[#allocation14 + $0x96c] ss:$28 sps:$4 sm:$0xff]   ;;  %v7722_v21 = vld [vmem:[#allocation14 + $0x974] ss:$28 sps:$4 sm:$0xff]  }
 0x3d0   :  { %5675 = vmatprep.subr.bf16.mxu1 %v7641_v38  ;;  %5847 = vmatprep.subr.bf16.mxu0 %v7644_v40  ;;  %v7717_v38 = vld [vmem:[#allocation14 + $0x968] ss:$28 sps:$4 sm:$0xff]   ;;  %v7720_v40 = vld [vmem:[#allocation14 + $0x970] ss:$28 sps:$4 sm:$0xff]  }
 0x3d3   :  { %5676 = vmatpush1.bf16.msra.mxu1 %v7639_v41  ;;  %5848 = vmatpush1.bf16.msra.mxu0 %v7642_v43  ;;  %v7725_v41 = vld [vmem:[#allocation14 + $0x9a4] ss:$28 sps:$4 sm:$0xff]   ;;  %v7728_v43 = vld [vmem:[#allocation14 + $0x9ac] ss:$28 sps:$4 sm:$0xff]  }
 0x3d4   :  { %5677 = vmatprep.subr.bf16.mxu1 %v7647_v45  ;;  %5849 = vmatprep.subr.bf16.mxu0 %v7650_v46  ;;  %v7723_v45 = vld [vmem:[#allocation14 + $0x9a0] ss:$28 sps:$4 sm:$0xff]   ;;  %v7726_v46 = vld [vmem:[#allocation14 + $0x9a8] ss:$28 sps:$4 sm:$0xff]  }
 0x3d7   :  { %5678 = vmatpush1.bf16.msra.mxu1 %v7645_v47  ;;  %5850 = vmatpush1.bf16.msra.mxu0 %v7648_v48  ;;  %v7731_v47 = vld [vmem:[#allocation14 + $0x9dc] ss:$28 sps:$4 sm:$0xff]   ;;  %v7734_v48 = vld [vmem:[#allocation14 + $0x9e4] ss:$28 sps:$4 sm:$0xff]  }
 0x3d8   :  { %5690 = vmatprep.subr.bf16.mxu1 %v7653_v49  ;;  %5862 = vmatprep.subr.bf16.mxu0 %v7656_v50  ;;  %v1081_v49 = vsub.s32 4, %v8538_v36  ;;  %v1089_v50 = vsub.s32 6, %v8538_v36 }
 0x3da   :  { %5680 = vmatmul.mubr.bf16.vlgmr.msra.gmra.mrb[8].mxu1 %v8626_v24  ;;  %5852 = vmatmul.mubr.bf16.vlgmr.msra.gmra.mrb[20].mxu0 %v8626_v24 }
 0x3db   :  { %5691 = vmatpush1.bf16.msra.mxu1 %v7651_v51  ;;  %5863 = vmatpush1.bf16.msra.mxu0 %v7654_v52  ;;  %v1085_v51 = vsub.s32 5, %v8538_v36  ;;  %v1093_v52 = vsub.s32 7, %v8538_v36 }
 0x3dc   :  { %5692 = vmatprep.subr.bf16.mxu1 %v7659_v53  ;;  %5864 = vmatprep.subr.bf16.mxu0 %v7662_v54  ;;  %v7729_v53 = vld [vmem:[#allocation14 + $0x9d8] ss:$28 sps:$4 sm:$0xff]   ;;  %v7732_v54 = vld [vmem:[#allocation14 + $0x9e0] ss:$28 sps:$4 sm:$0xff]  }
 0x3df   :  { %5693 = vmatpush1.bf16.msra.mxu1 %v7657_v57  ;;  %5865 = vmatpush1.bf16.msra.mxu0 %v7660_v59  ;;  %v1082_v57 = vrot.slane %v8614_v5, %v1081_v49  ;;  %v7737_v59 = vld [vmem:[#allocation14 + $0xa14] ss:$28 sps:$4 sm:$0xff]  }
 0x3e0   :  { %5694 = vmatprep.subr.bf16.mxu1 %v7665_v60  ;;  %5866 = vmatprep.subr.bf16.mxu0 %v7668_v61  ;;  %v7740_v60 = vld [vmem:[#allocation14 + $0xa1c] ss:$28 sps:$4 sm:$0xff]   ;;  %v1090_v61 = vrot.slane %v8614_v5, %v1089_v50 }
 0x3e3   :  { %5695 = vmatpush1.bf16.msra.mxu1 %v7663_v62  ;;  %5867 = vmatpush1.bf16.msra.mxu0 %v7666_v63  ;;  %v1086_v62 = vrot.slane %v8614_v5, %v1085_v51  ;;  %v1094_v63 = vrot.slane %v8614_v5, %v1093_v52  ;;  %v7764_v52 = vld [vmem:[#allocation14 + $0xafc] ss:$28 sps:$4 sm:$0xff]  }
 0x3e4   :  { %5696 = vmatprep.subr.bf16.mxu1 %v7671_v0  ;;  %5868 = vmatprep.subr.bf16.mxu0 %v7674_v1  ;;  %v7735_v1 = vld [vmem:[#allocation14 + $0xa10] ss:$28 sps:$4 sm:$0xff]  }
 0x3e7   :  { %5697 = vmatpush1.bf16.msra.mxu1 %v7669_v2  ;;  %5869 = vmatpush1.bf16.msra.mxu0 %v7672_v11  ;;  %v7738_v2 = vld [vmem:[#allocation14 + $0xa18] ss:$28 sps:$4 sm:$0xff]  }
 0x3e8   :  { %5698 = vmatprep.subr.bf16.mxu1 %v7677_v3  ;;  %5870 = vmatprep.subr.bf16.mxu0 %v7680_v4 }
 0x3eb   :  { %5699 = vmatpush1.bf16.msra.mxu1 %v7675_v6  ;;  %5871 = vmatpush1.bf16.msra.mxu0 %v7678_v7  ;;  %v7743_v6 = vld [vmem:[#allocation14 + $0xa4c] ss:$28 sps:$4 sm:$0xff]   ;;  %v7746_v7 = vld [vmem:[#allocation14 + $0xa54] ss:$28 sps:$4 sm:$0xff]  }
 0x3ec   :  { %5700 = vmatprep.subr.bf16.mxu1 %v7683_v8  ;;  %5872 = vmatprep.subr.bf16.mxu0 %v7686_v9 }
 0x3ef   :  { %5701 = vmatpush1.bf16.msra.mxu1 %v7681_v12  ;;  %5873 = vmatpush1.bf16.msra.mxu0 %v7684_v13 }
 0x3f0   :  { %5702 = vmatprep.subr.bf16.mxu1 %v7689_v14  ;;  %5874 = vmatprep.subr.bf16.mxu0 %v7692_v34 }
 0x3f3   :  { %5703 = vmatpush1.bf16.msra.mxu1 %v7687_v10  ;;  %5875 = vmatpush1.bf16.msra.mxu0 %v7690_v15 }
 0x3f4   :  { %5704 = vmatprep.subr.bf16.mxu1 %v7695_v16  ;;  %5876 = vmatprep.subr.bf16.mxu0 %v7698_v20 }
 0x3f7   :  { %5705 = vmatpush1.bf16.msra.mxu1 %v7693_v22  ;;  %5877 = vmatpush1.bf16.msra.mxu0 %v7696_v25  ;;  %v7741_v22 = vld [vmem:[#allocation14 + $0xa48] ss:$28 sps:$4 sm:$0xff]   ;;  %v7744_v25 = vld [vmem:[#allocation14 + $0xa50] ss:$28 sps:$4 sm:$0xff]  }
 0x3f8   :  { %5706 = vmatprep.subr.bf16.mxu1 %v7701_v26  ;;  %5878 = vmatprep.subr.bf16.mxu0 %v7704_v39 }
 0x3fb   :  { %5707 = vmatpush1.bf16.msra.mxu1 %v7699_v27  ;;  %5879 = vmatpush1.bf16.msra.mxu0 %v7702_v55  ;;  %v7749_v55 = vld [vmem:[#allocation14 + $0xa84] ss:$28 sps:$4 sm:$0xff]  }
 0x3fc   :  { %5708 = vmatprep.subr.bf16.mxu1 %v7707_v28  ;;  %5880 = vmatprep.subr.bf16.mxu0 %v7710_v29  ;;  %v7752_v28 = vld [vmem:[#allocation14 + $0xa8c] ss:$28 sps:$4 sm:$0xff]  }
 0x3ff   :  { %5709 = vmatpush1.bf16.msra.mxu1 %v7705_v30  ;;  %5881 = vmatpush1.bf16.msra.mxu0 %v7708_v31 }
 0x400   :  { %5710 = vmatprep.subr.bf16.mxu1 %v7713_v32  ;;  %5882 = vmatprep.subr.bf16.mxu0 %v7716_v33 }
 0x403   :  { %5711 = vmatpush1.bf16.msra.mxu1 %v7711_v17  ;;  %5883 = vmatpush1.bf16.msra.mxu0 %v7714_v18 }
 0x404   :  { %5712 = vmatprep.subr.bf16.mxu1 %v7719_v19  ;;  %5884 = vmatprep.subr.bf16.mxu0 %v7722_v21 }
 0x407   :  { %5713 = vmatpush1.bf16.msra.mxu1 %v7717_v38  ;;  %5885 = vmatpush1.bf16.msra.mxu0 %v7720_v40  ;;  %v7747_v38 = vld [vmem:[#allocation14 + $0xa80] ss:$28 sps:$4 sm:$0xff]   ;;  %v7750_v40 = vld [vmem:[#allocation14 + $0xa88] ss:$28 sps:$4 sm:$0xff]  }
 0x408   :  { %5714 = vmatprep.subr.bf16.mxu1 %v7725_v41  ;;  %5886 = vmatprep.subr.bf16.mxu0 %v7728_v43  ;;  %v7755_v43 = vld [vmem:[#allocation14 + $0xabc] ss:$28 sps:$4 sm:$0xff]  }
 0x40b   :  { %5715 = vmatpush1.bf16.msra.mxu1 %v7723_v45  ;;  %5887 = vmatpush1.bf16.msra.mxu0 %v7726_v46  ;;  %v7758_v45 = vld [vmem:[#allocation14 + $0xac4] ss:$28 sps:$4 sm:$0xff]   ;;  %v7753_v46 = vld [vmem:[#allocation14 + $0xab8] ss:$28 sps:$4 sm:$0xff]  }
 0x40c   :  { %5716 = vmatprep.subr.bf16.mxu1 %v7731_v47  ;;  %5888 = vmatprep.subr.bf16.mxu0 %v7734_v48  ;;  %v7756_v47 = vld [vmem:[#allocation14 + $0xac0] ss:$28 sps:$4 sm:$0xff]   ;;  %v7761_v48 = vld [vmem:[#allocation14 + $0xaf4] ss:$28 sps:$4 sm:$0xff]  }
 0x40f   :  { %5717 = vmatpush1.bf16.msra.mxu1 %v7729_v53  ;;  %5889 = vmatpush1.bf16.msra.mxu0 %v7732_v54  ;;  %v2632_v0 = vpop.f32.mrb[4].mxu1  ;;  %v7759_v53 = vld [vmem:[#allocation14 + $0xaf0] ss:$28 sps:$4 sm:$0xff]   ;;  %v7762_v54 = vld [vmem:[#allocation14 + $0xaf8] ss:$28 sps:$4 sm:$0xff]  }
 0x410   :  { %v7252_v11 = vadd.f32 %v2632_v0, %v1082_v57  ;;  %v2718_v3 = vpop.f32.mrb[16].mxu0  ;;  %v2634_v4 = vpop.f32.mrb[5].mxu1  ;;  %5718 = vmatprep.subr.bf16.mxu1 %v7737_v59  ;;  %5890 = vmatprep.subr.bf16.mxu0 %v7740_v60  ;;  %v7770_v59 = vld [vmem:[#allocation14 + $0xb34] ss:$28 sps:$4 sm:$0xff]   ;;  %v7765_v60 = vld [vmem:[#allocation14 + $0xb28] ss:$28 sps:$4 sm:$0xff]  }
 0x411   :  { %v7256_v8 = vadd.f32 %v2718_v3, %v1090_v61  ;;  %v7253_v9 = vadd.f32 %v2634_v4, %v1086_v62  ;;  %v2720_v12 = vpop.f32.mrb[17].mxu0  ;;  %v2636_v13 = vpop.f32.mrb[6].mxu1  ;;  %v7771_v0 = vld [vmem:[#allocation14 + $0xb60] ss:$28 sps:$4 sm:$0xff]   ;;  %v7777_v3 = vld [vmem:[#allocation14 + $0xb98] ss:$28 sps:$4 sm:$0xff]  }
 0x412   :  { %v7257_v14 = vadd.f32 %v2720_v12, %v1094_v63  ;;  %v7254_v34 = vadd.f32 %v2636_v13, %v1082_v57  ;;  %v2722_v10 = vpop.f32.mrb[18].mxu0  ;;  %v2638_v5 = vpop.f32.mrb[7].mxu1  ;;  %v2731_v26 = vmax.f32 %v7252_v11, 0.0  ;;  %v7767_v57 = vld [vmem:[#allocation14 + $0xb2c] ss:$28 sps:$4 sm:$0xff]  }
 0x413   :  { %v7258_v15 = vadd.f32 %v2722_v10, %v1090_v61  ;;  %v7255_v16 = vadd.f32 %v2638_v5, %v1086_v62  ;;  %v2724_v20 = vpop.f32.mrb[19].mxu0  ;;  %5719 = vmatpush1.bf16.msra.mxu1 %v7735_v1  ;;  %5891 = vmatpush1.bf16.msra.mxu0 %v7738_v2  ;;  %v2733_v29 = vmax.f32 %v7256_v8, 0.0  ;;  %v2732_v30 = vmax.f32 %v7253_v9, 0.0  ;;  %v7768_v61 = vld [vmem:[#allocation14 + $0xb30] ss:$28 sps:$4 sm:$0xff]  }
 0x414   :  { %v2739_v39 = vmax.f32 %v7254_v34, 0.0  ;;  %v7259_v27 = vadd.f32 %v2724_v20, %v1094_v63  ;;  %5720 = vmatprep.subr.bf16.mxu1 %v7743_v6  ;;  %5892 = vmatprep.subr.bf16.mxu0 %v7746_v7  ;;  %v2734_v33 = vmax.f32 %v7257_v14, 0.0  ;;  %v7773_v62 = vld [vmem:[#allocation14 + $0xb64] ss:$28 sps:$4 sm:$0xff]   ;;  %v7776_v63 = vld [vmem:[#allocation14 + $0xb6c] ss:$28 sps:$4 sm:$0xff]  }
 0x415   :  { %v2741_v31 = vmax.f32 %v7258_v15, 0.0  ;;  %v2740_v32 = vmax.f32 %v7255_v16, 0.0  ;;  %v7774_v1 = vld [vmem:[#allocation14 + $0xb68] ss:$28 sps:$4 sm:$0xff]   ;;  %v7779_v2 = vld [vmem:[#allocation14 + $0xb9c] ss:$28 sps:$4 sm:$0xff]  }
 0x416   :  { %v8654_v17 = vpack.c.bf16 %v2739_v39, %v2731_v26  ;;  %v2742_v18 = vmax.f32 %v7259_v27, 0.0  ;;  %v7782_v11 = vld [vmem:[#allocation14 + $0xba4] ss:$28 sps:$4 sm:$0xff]   ;;  %v7785_v6 = vld [vmem:[#allocation14 + $0xbd4] ss:$28 sps:$4 sm:$0xff]  }
 0x417   :  { %v8656_v19 = vpack.c.bf16 %v2741_v31, %v2733_v29  ;;  %v8658_v21 = vpack.c.bf16 %v2740_v32, %v2732_v30  ;;  %5721 = vmatpush1.bf16.msra.mxu1 %v7741_v22  ;;  %5893 = vmatpush1.bf16.msra.mxu0 %v7744_v25  ;;  %v7780_v4 = vld [vmem:[#allocation14 + $0xba0] ss:$28 sps:$4 sm:$0xff]   ;;  %v7783_v8 = vld [vmem:[#allocation14 + $0xbd0] ss:$28 sps:$4 sm:$0xff]   ;;  %v7786_v9 = vld [vmem:[#allocation14 + $0xbd8] ss:$28 sps:$4 sm:$0xff]  }
 0x418   :  { %v8660_v41 = vpack.c.bf16 %v2742_v18, %v2734_v33  ;;  %5733 = vmatprep.subr.bf16.mxu1 %v7749_v55  ;;  %5905 = vmatprep.subr.bf16.mxu0 %v7752_v28  ;;  %v7788_v7 = vld [vmem:[#allocation14 + $0xbdc] ss:$28 sps:$4 sm:$0xff]   ;;  %v7791_v12 = vld [vmem:[#allocation14 + $0xc0c] ss:$28 sps:$4 sm:$0xff]   ;;  %v7794_v13 = vld [vmem:[#allocation14 + $0xc14] ss:$28 sps:$4 sm:$0xff]  }
 0x419   :  { %5722 = vmatprep.mubr.bf16.mxu1 %v8658_v21  ;;  %5894 = vmatprep.mubr.bf16.mxu0 %v8658_v21  ;;  %v7789_v14 = vld [vmem:[#allocation14 + $0xc08] ss:$28 sps:$4 sm:$0xff]   ;;  %v7792_v34 = vld [vmem:[#allocation14 + $0xc10] ss:$28 sps:$4 sm:$0xff]   ;;  %v7795_v15 = vld [vmem:[#allocation14 + $0xc40] ss:$28 sps:$4 sm:$0xff]  }
 0x41a   :  { %5723 = vmatmul.mubr.bf16.vlgmr.msra.gmra.mrb[8].mxu1 %v8654_v17  ;;  %5895 = vmatmul.mubr.bf16.vlgmr.msra.gmra.mrb[20].mxu0 %v8654_v17  ;;  %v7797_v10 = vld [vmem:[#allocation14 + $0xc44] ss:$28 sps:$4 sm:$0xff]   ;;  %v7800_v5 = vld [vmem:[#allocation14 + $0xc4c] ss:$28 sps:$4 sm:$0xff]   ;;  %v7803_v20 = vld [vmem:[#allocation14 + $0xc7c] ss:$28 sps:$4 sm:$0xff]  }
 0x41b   :  { %5734 = vmatpush1.bf16.msra.mxu1 %v7747_v38  ;;  %5906 = vmatpush1.bf16.msra.mxu0 %v7750_v40  ;;  %v7798_v16 = vld [vmem:[#allocation14 + $0xc48] ss:$28 sps:$4 sm:$0xff]   ;;  %v7801_v25 = vld [vmem:[#allocation14 + $0xc78] ss:$28 sps:$4 sm:$0xff]   ;;  %v7804_v26 = vld [vmem:[#allocation14 + $0xc80] ss:$28 sps:$4 sm:$0xff]  }
 0x41c   :  { %5765 = vmatprep.mubr.bf16.mxu1 %v8660_v41  ;;  %5937 = vmatprep.mubr.bf16.mxu0 %v8660_v41  ;;  %v7806_v22 = vld [vmem:[#allocation14 + $0xc84] ss:$28 sps:$4 sm:$0xff]   ;;  %v7809_v39 = vld [vmem:[#allocation14 + $0xcb4] ss:$28 sps:$4 sm:$0xff]   ;;  %v7812_v27 = vld [vmem:[#allocation14 + $0xcbc] ss:$28 sps:$4 sm:$0xff]  }
 0x41d   :  { %5735 = vmatprep.subr.bf16.mxu1 %v7755_v43  ;;  %5907 = vmatprep.subr.bf16.mxu0 %v7758_v45  ;;  %v7807_v55 = vld [vmem:[#allocation14 + $0xcb0] ss:$28 sps:$4 sm:$0xff]   ;;  %v7810_v28 = vld [vmem:[#allocation14 + $0xcb8] ss:$28 sps:$4 sm:$0xff]   ;;  %v7813_v31 = vld [vmem:[#allocation14 + $0xce8] ss:$28 sps:$4 sm:$0xff]  }
 0x41e   :  { %v7815_v29 = vld [vmem:[#allocation14 + $0xcec] ss:$28 sps:$4 sm:$0xff]   ;;  %v7818_v30 = vld [vmem:[#allocation14 + $0xcf4] ss:$28 sps:$4 sm:$0xff]   ;;  %v7821_v33 = vld [vmem:[#allocation14 + $0xd24] ss:$28 sps:$4 sm:$0xff]  }
 0x41f   :  { %5736 = vmatpush1.bf16.msra.mxu1 %v7753_v46  ;;  %5908 = vmatpush1.bf16.msra.mxu0 %v7756_v47  ;;  %v7816_v32 = vld [vmem:[#allocation14 + $0xcf0] ss:$28 sps:$4 sm:$0xff]   ;;  %v7819_v38 = vld [vmem:[#allocation14 + $0xd20] ss:$28 sps:$4 sm:$0xff]   ;;  %v7822_v40 = vld [vmem:[#allocation14 + $0xd28] ss:$28 sps:$4 sm:$0xff]  }
 0x420   :  { %5737 = vmatprep.subr.bf16.mxu1 %v7761_v48  ;;  %5909 = vmatprep.subr.bf16.mxu0 %v7764_v52  ;;  %v7824_v18 = vld [vmem:[#allocation14 + $0xd2c] ss:$28 sps:$4 sm:$0xff]   ;;  %v7827_v43 = vld [vmem:[#allocation14 + $0xd5c] ss:$28 sps:$4 sm:$0xff]   ;;  %v7830_v45 = vld [vmem:[#allocation14 + $0xd64] ss:$28 sps:$4 sm:$0xff]  }
 0x421   :  { %v7825_v46 = vld [vmem:[#allocation14 + $0xd58] ss:$28 sps:$4 sm:$0xff]   ;;  %v7828_v47 = vld [vmem:[#allocation14 + $0xd60] ss:$28 sps:$4 sm:$0xff]  }
 0x422   :  { %v7833_v48 = vld [vmem:[#allocation14 + $0xd94] ss:$28 sps:$4 sm:$0xff]   ;;  %v7836_v52 = vld [vmem:[#allocation14 + $0xd9c] ss:$28 sps:$4 sm:$0xff]  }
 0x423   :  { %5738 = vmatpush1.bf16.msra.mxu1 %v7759_v53  ;;  %5910 = vmatpush1.bf16.msra.mxu0 %v7762_v54  ;;  %v7831_v53 = vld [vmem:[#allocation14 + $0xd90] ss:$28 sps:$4 sm:$0xff]   ;;  %v7834_v54 = vld [vmem:[#allocation14 + $0xd98] ss:$28 sps:$4 sm:$0xff]  }
 0x424   :  { %5739 = vmatprep.subr.bf16.mxu1 %v7767_v57  ;;  %5911 = vmatprep.subr.bf16.mxu0 %v7770_v59  ;;  %v7839_v57 = vld [vmem:[#allocation14 + $0xdcc] ss:$28 sps:$4 sm:$0xff]   ;;  %v7842_v59 = vld [vmem:[#allocation14 + $0xdd4] ss:$28 sps:$4 sm:$0xff]  }
 0x427   :  { %5740 = vmatpush1.bf16.msra.mxu1 %v7765_v60  ;;  %5912 = vmatpush1.bf16.msra.mxu0 %v7768_v61  ;;  %v7837_v60 = vld [vmem:[#allocation14 + $0xdc8] ss:$28 sps:$4 sm:$0xff]   ;;  %v7840_v61 = vld [vmem:[#allocation14 + $0xdd0] ss:$28 sps:$4 sm:$0xff]  }
 0x428   :  { %5741 = vmatprep.subr.bf16.mxu1 %v7773_v62  ;;  %5913 = vmatprep.subr.bf16.mxu0 %v7776_v63  ;;  %v7845_v62 = vld [vmem:[#allocation14 + $0x14] ss:$28 sps:$4 sm:$0xff]  }
 0x429   :  { %v7846_v63 = vld [vmem:[#allocation14 + $0x1d8] ss:$28 sps:$4 sm:$0xff]  }
 0x42b   :  { %5742 = vmatpush1.bf16.msra.mxu1 %v7771_v0  ;;  %5914 = vmatpush1.bf16.msra.mxu0 %v7774_v1  ;;  %v7843_v0 = vld [vmem:[#allocation14 + $0x10] ss:$28 sps:$4 sm:$0xff]   ;;  %v7847_v1 = vld [vmem:[#allocation14 + $0x18] ss:$28 sps:$4 sm:$0xff]  }
 0x42c   :  { %5743 = vmatprep.subr.bf16.mxu1 %v7779_v2  ;;  %5915 = vmatprep.subr.bf16.mxu0 %v7782_v11  ;;  %v7850_v2 = vld [vmem:[#allocation14 + $0x4c] ss:$28 sps:$4 sm:$0xff]  }
 0x42d   :  { %v7851_v11 = vld [vmem:[#allocation14 + $0x210] ss:$28 sps:$4 sm:$0xff]  }
 0x42f   :  { %5744 = vmatpush1.bf16.msra.mxu1 %v7777_v3  ;;  %5916 = vmatpush1.bf16.msra.mxu0 %v7780_v4  ;;  %v7848_v3 = vld [vmem:[#allocation14 + $0x48] ss:$28 sps:$4 sm:$0xff]   ;;  %v7852_v4 = vld [vmem:[#allocation14 + $0x50] ss:$28 sps:$4 sm:$0xff]  }
 0x430   :  { %5745 = vmatprep.subr.bf16.mxu1 %v7785_v6  ;;  %5917 = vmatprep.subr.bf16.mxu0 %v7788_v7  ;;  %v7855_v6 = vld [vmem:[#allocation14 + $0x84] ss:$28 sps:$4 sm:$0xff]  }
 0x431   :  { %v7856_v7 = vld [vmem:[#allocation14 + $0x248] ss:$28 sps:$4 sm:$0xff]  }
 0x433   :  { %5746 = vmatpush1.bf16.msra.mxu1 %v7783_v8  ;;  %5918 = vmatpush1.bf16.msra.mxu0 %v7786_v9  ;;  %v7853_v8 = vld [vmem:[#allocation14 + $0x80] ss:$28 sps:$4 sm:$0xff]   ;;  %v7857_v9 = vld [vmem:[#allocation14 + $0x88] ss:$28 sps:$4 sm:$0xff]  }
 0x434   :  { %5747 = vmatprep.subr.bf16.mxu1 %v7791_v12  ;;  %5919 = vmatprep.subr.bf16.mxu0 %v7794_v13  ;;  %v7860_v12 = vld [vmem:[#allocation14 + $0xbc] ss:$28 sps:$4 sm:$0xff]  }
 0x435   :  { %v7861_v13 = vld [vmem:[#allocation14 + $0x280] ss:$28 sps:$4 sm:$0xff]  }
 0x437   :  { %5748 = vmatpush1.bf16.msra.mxu1 %v7789_v14  ;;  %5920 = vmatpush1.bf16.msra.mxu0 %v7792_v34  ;;  %v7858_v14 = vld [vmem:[#allocation14 + $0xb8] ss:$28 sps:$4 sm:$0xff]   ;;  %v7862_v34 = vld [vmem:[#allocation14 + $0xc0] ss:$28 sps:$4 sm:$0xff]  }
 0x438   :  { %5749 = vmatprep.subr.bf16.mxu1 %v7797_v10  ;;  %5921 = vmatprep.subr.bf16.mxu0 %v7800_v5  ;;  %v7865_v10 = vld [vmem:[#allocation14 + $0xf4] ss:$28 sps:$4 sm:$0xff]  }
 0x439   :  { %v7863_v5 = vld [vmem:[#allocation14 + $0xf0] ss:$28 sps:$4 sm:$0xff]  }
 0x43b   :  { %5750 = vmatpush1.bf16.msra.mxu1 %v7795_v15  ;;  %5922 = vmatpush1.bf16.msra.mxu0 %v7798_v16  ;;  %v7867_v15 = vld [vmem:[#allocation14 + $0xf8] ss:$28 sps:$4 sm:$0xff]   ;;  %v7870_v16 = vld [vmem:[#allocation14 + $0x12c] ss:$28 sps:$4 sm:$0xff]  }
 0x43c   :  { %5751 = vmatprep.subr.bf16.mxu1 %v7803_v20  ;;  %5923 = vmatprep.subr.bf16.mxu0 %v7806_v22  ;;  %v7871_v20 = vld [vmem:[#allocation14 + $0x2f0] ss:$28 sps:$4 sm:$0xff]   ;;  %v7868_v22 = vld [vmem:[#allocation14 + $0x128] ss:$28 sps:$4 sm:$0xff]  }
 0x43f   :  { %5752 = vmatpush1.bf16.msra.mxu1 %v7801_v25  ;;  %5924 = vmatpush1.bf16.msra.mxu0 %v7804_v26  ;;  %v7872_v25 = vld [vmem:[#allocation14 + $0x130] ss:$28 sps:$4 sm:$0xff]   ;;  %v7875_v26 = vld [vmem:[#allocation14 + $0x164] ss:$28 sps:$4 sm:$0xff]  }
 0x440   :  { %5753 = vmatprep.subr.bf16.mxu1 %v7809_v39  ;;  %5925 = vmatprep.subr.bf16.mxu0 %v7812_v27  ;;  %v7876_v39 = vld [vmem:[#allocation14 + $0x328] ss:$28 sps:$4 sm:$0xff]   ;;  %v7873_v27 = vld [vmem:[#allocation14 + $0x160] ss:$28 sps:$4 sm:$0xff]  }
 0x443   :  { %5754 = vmatpush1.bf16.msra.mxu1 %v7807_v55  ;;  %5926 = vmatpush1.bf16.msra.mxu0 %v7810_v28  ;;  %v7877_v55 = vld [vmem:[#allocation14 + $0x168] ss:$28 sps:$4 sm:$0xff]   ;;  %v7880_v28 = vld [vmem:[#allocation14 + $0x19c] ss:$28 sps:$4 sm:$0xff]  }
 0x444   :  { %5755 = vmatprep.subr.bf16.mxu1 %v7815_v29  ;;  %5927 = vmatprep.subr.bf16.mxu0 %v7818_v30  ;;  %v7881_v29 = vld [vmem:[#allocation14 + $0x360] ss:$28 sps:$4 sm:$0xff]   ;;  %v7878_v30 = vld [vmem:[#allocation14 + $0x198] ss:$28 sps:$4 sm:$0xff]  }
 0x447   :  { %5756 = vmatpush1.bf16.msra.mxu1 %v7813_v31  ;;  %5928 = vmatpush1.bf16.msra.mxu0 %v7816_v32  ;;  %v7882_v31 = vld [vmem:[#allocation14 + $0x1a0] ss:$28 sps:$4 sm:$0xff]   ;;  %v7885_v32 = vld [vmem:[#allocation14 + $0x1d4] ss:$28 sps:$4 sm:$0xff]  }
 0x448   :  { %5757 = vmatprep.subr.bf16.mxu1 %v7821_v33  ;;  %5929 = vmatprep.subr.bf16.mxu0 %v7824_v18  ;;  %v7886_v33 = vld [vmem:[#allocation14 + $0x558] ss:$28 sps:$4 sm:$0xff]   ;;  %v7883_v18 = vld [vmem:[#allocation14 + $0x1d0] ss:$28 sps:$4 sm:$0xff]  }
 0x44b   :  { %5758 = vmatpush1.bf16.msra.mxu1 %v7819_v38  ;;  %5930 = vmatpush1.bf16.msra.mxu0 %v7822_v40  ;;  %v7887_v38 = vld [vmem:[#allocation14 + $0x398] ss:$28 sps:$4 sm:$0xff]   ;;  %v7890_v40 = vld [vmem:[#allocation14 + $0x20c] ss:$28 sps:$4 sm:$0xff]  }
 0x44c   :  { %5759 = vmatprep.subr.bf16.mxu1 %v7827_v43  ;;  %5931 = vmatprep.subr.bf16.mxu0 %v7830_v45  ;;  %v7891_v43 = vld [vmem:[#allocation14 + $0x590] ss:$28 sps:$4 sm:$0xff]   ;;  %v7888_v45 = vld [vmem:[#allocation14 + $0x208] ss:$28 sps:$4 sm:$0xff]  }
 0x44f   :  { %5760 = vmatpush1.bf16.msra.mxu1 %v7825_v46  ;;  %5932 = vmatpush1.bf16.msra.mxu0 %v7828_v47  ;;  %v7892_v46 = vld [vmem:[#allocation14 + $0x3d0] ss:$28 sps:$4 sm:$0xff]   ;;  %v7895_v47 = vld [vmem:[#allocation14 + $0x244] ss:$28 sps:$4 sm:$0xff]  }
 0x450   :  { %5761 = vmatprep.subr.bf16.mxu1 %v7833_v48  ;;  %5933 = vmatprep.subr.bf16.mxu0 %v7836_v52  ;;  %v7896_v48 = vld [vmem:[#allocation14 + $0x5c8] ss:$28 sps:$4 sm:$0xff]   ;;  %v7893_v52 = vld [vmem:[#allocation14 + $0x240] ss:$28 sps:$4 sm:$0xff]  }
 0x453   :  { %5762 = vmatpush1.bf16.msra.mxu1 %v7831_v53  ;;  %5934 = vmatpush1.bf16.msra.mxu0 %v7834_v54  ;;  %v7897_v53 = vld [vmem:[#allocation14 + $0x408] ss:$28 sps:$4 sm:$0xff]   ;;  %v7900_v54 = vld [vmem:[#allocation14 + $0x27c] ss:$28 sps:$4 sm:$0xff]  }
 0x454   :  { %5763 = vmatprep.subr.bf16.mxu1 %v7839_v57  ;;  %5935 = vmatprep.subr.bf16.mxu0 %v7842_v59  ;;  %v7901_v57 = vld [vmem:[#allocation14 + $0x600] ss:$28 sps:$4 sm:$0xff]   ;;  %v7898_v59 = vld [vmem:[#allocation14 + $0x278] ss:$28 sps:$4 sm:$0xff]  }
 0x457   :  { %5764 = vmatpush1.bf16.msra.mxu1 %v7837_v60  ;;  %5936 = vmatpush1.bf16.msra.mxu0 %v7840_v61  ;;  %v7902_v60 = vld [vmem:[#allocation14 + $0x440] ss:$28 sps:$4 sm:$0xff]   ;;  %v7905_v61 = vld [vmem:[#allocation14 + $0x2b4] ss:$28 sps:$4 sm:$0xff]  }
 0x458   :  { %5948 = vmatprep.subr.bf16.mxu1 %v7845_v62  ;;  %7156 = vmatprep.subr.bf16.mxu0 %v7846_v63  ;;  %v7906_v62 = vld [vmem:[#allocation14 + $0x638] ss:$28 sps:$4 sm:$0xff]   ;;  %v7903_v63 = vld [vmem:[#allocation14 + $0x2b0] ss:$28 sps:$4 sm:$0xff]  }
 0x45a   :  { %5766 = vmatmul.mubr.bf16.vlgmr.msra.gmra.mrb[8].mxu1 %v8656_v19  ;;  %5938 = vmatmul.mubr.bf16.vlgmr.msra.gmra.mrb[20].mxu0 %v8656_v19 }
 0x45b   :  { %5949 = vmatpush1.bf16.msra.mxu1 %v7843_v0  ;;  %5980 = vmatprep.mubr.bf16.mxu1 %v8628_v35  ;;  %v7907_v0 = vld [vmem:[#allocation14 + $0x478] ss:$28 sps:$4 sm:$0xff]  }
 0x45c   :  { %7157 = vmatpush3.bf16.msra.mxu0 %v7847_v1  ;;  %6152 = vmatprep.mubr.bf16.mxu0 %v8628_v35  ;;  %v7866_v35 = vld [vmem:[#allocation14 + $0x2b8] ss:$28 sps:$4 sm:$0xff]   ;;  %v7910_v1 = vld [vmem:[#allocation14 + $0x2ec] ss:$28 sps:$4 sm:$0xff]  }
 0x45d   :  { %5950 = vmatprep.subr.bf16.mxu1 %v7850_v2  ;;  %7158 = vmatprep.subr.bf16.mxu0 %v7851_v11  ;;  %v7911_v2 = vld [vmem:[#allocation14 + $0x670] ss:$28 sps:$4 sm:$0xff]   ;;  %v7908_v11 = vld [vmem:[#allocation14 + $0x2e8] ss:$28 sps:$4 sm:$0xff]  }
 0x45f   :  { %5951 = vmatpush1.bf16.msra.mxu1 %v7848_v3  ;;  %v7912_v3 = vld [vmem:[#allocation14 + $0x4b0] ss:$28 sps:$4 sm:$0xff]  }
 0x460   :  { %7159 = vmatpush3.bf16.msra.mxu0 %v7852_v4  ;;  %5952 = vmatprep.subr.bf16.mxu1 %v7855_v6  ;;  %v7915_v4 = vld [vmem:[#allocation14 + $0x324] ss:$28 sps:$4 sm:$0xff]  }
 0x461   :  { %7160 = vmatprep.subr.bf16.mxu0 %v7856_v7  ;;  %v7916_v6 = vld [vmem:[#allocation14 + $0x6a8] ss:$28 sps:$4 sm:$0xff]   ;;  %v7913_v7 = vld [vmem:[#allocation14 + $0x320] ss:$28 sps:$4 sm:$0xff]  }
 0x463   :  { %5953 = vmatpush1.bf16.msra.mxu1 %v7853_v8  ;;  %v7917_v8 = vld [vmem:[#allocation14 + $0x4e8] ss:$28 sps:$4 sm:$0xff]  }
 0x464   :  { %7161 = vmatpush3.bf16.msra.mxu0 %v7857_v9  ;;  %5954 = vmatprep.subr.bf16.mxu1 %v7860_v12  ;;  %v7920_v9 = vld [vmem:[#allocation14 + $0x35c] ss:$28 sps:$4 sm:$0xff]  }
 0x465   :  { %7162 = vmatprep.subr.bf16.mxu0 %v7861_v13  ;;  %v7921_v12 = vld [vmem:[#allocation14 + $0x6e0] ss:$28 sps:$4 sm:$0xff]   ;;  %v7918_v13 = vld [vmem:[#allocation14 + $0x358] ss:$28 sps:$4 sm:$0xff]  }
 0x467   :  { %5955 = vmatpush1.bf16.msra.mxu1 %v7858_v14  ;;  %v7922_v14 = vld [vmem:[#allocation14 + $0x520] ss:$28 sps:$4 sm:$0xff]  }
 0x468   :  { %7163 = vmatpush3.bf16.msra.mxu0 %v7862_v34  ;;  %5956 = vmatprep.subr.bf16.mxu1 %v7865_v10  ;;  %v7925_v34 = vld [vmem:[#allocation14 + $0x394] ss:$28 sps:$4 sm:$0xff]  }
 0x469   :  { %7164 = vmatprep.subr.bf16.mxu0 %v7866_v35  ;;  %v7926_v10 = vld [vmem:[#allocation14 + $0x8d8] ss:$28 sps:$4 sm:$0xff]   ;;  %v7923_v35 = vld [vmem:[#allocation14 + $0x390] ss:$28 sps:$4 sm:$0xff]  }
 0x46b   :  { %5957 = vmatpush1.bf16.msra.mxu1 %v7863_v5  ;;  %v7927_v5 = vld [vmem:[#allocation14 + $0x718] ss:$28 sps:$4 sm:$0xff]  }
 0x46c   :  { %7165 = vmatpush3.bf16.msra.mxu0 %v7867_v15  ;;  %5958 = vmatprep.subr.bf16.mxu1 %v7870_v16  ;;  %v7930_v15 = vld [vmem:[#allocation14 + $0x3cc] ss:$28 sps:$4 sm:$0xff]  }
 0x46d   :  { %7166 = vmatprep.subr.bf16.mxu0 %v7871_v20  ;;  %v7931_v16 = vld [vmem:[#allocation14 + $0x910] ss:$28 sps:$4 sm:$0xff]   ;;  %v7928_v20 = vld [vmem:[#allocation14 + $0x3c8] ss:$28 sps:$4 sm:$0xff]  }
 0x46f   :  { %5959 = vmatpush1.bf16.msra.mxu1 %v7868_v22  ;;  %v7932_v22 = vld [vmem:[#allocation14 + $0x750] ss:$28 sps:$4 sm:$0xff]  }
 0x470   :  { %7167 = vmatpush3.bf16.msra.mxu0 %v7872_v25  ;;  %5960 = vmatprep.subr.bf16.mxu1 %v7875_v26  ;;  %v7935_v25 = vld [vmem:[#allocation14 + $0x404] ss:$28 sps:$4 sm:$0xff]  }
 0x471   :  { %7168 = vmatprep.subr.bf16.mxu0 %v7876_v39  ;;  %v7936_v26 = vld [vmem:[#allocation14 + $0x948] ss:$28 sps:$4 sm:$0xff]   ;;  %v7933_v39 = vld [vmem:[#allocation14 + $0x400] ss:$28 sps:$4 sm:$0xff]  }
 0x473   :  { %5961 = vmatpush1.bf16.msra.mxu1 %v7873_v27  ;;  %v7940_v27 = vld [vmem:[#allocation14 + $0x43c] ss:$28 sps:$4 sm:$0xff]  }
 0x474   :  { %7169 = vmatpush3.bf16.msra.mxu0 %v7877_v55  ;;  %5962 = vmatprep.subr.bf16.mxu1 %v7880_v28  ;;  %v7941_v55 = vld [vmem:[#allocation14 + $0x980] ss:$28 sps:$4 sm:$0xff]   ;;  %v7938_v28 = vld [vmem:[#allocation14 + $0x438] ss:$28 sps:$4 sm:$0xff]  }
 0x475   :  { %7170 = vmatprep.subr.bf16.mxu0 %v7881_v29  ;;  %v7945_v29 = vld [vmem:[#allocation14 + $0x474] ss:$28 sps:$4 sm:$0xff]  }
 0x477   :  { %5963 = vmatpush1.bf16.msra.mxu1 %v7878_v30  ;;  %v7946_v30 = vld [vmem:[#allocation14 + $0x9b8] ss:$28 sps:$4 sm:$0xff]  }
 0x478   :  { %7171 = vmatpush3.bf16.msra.mxu0 %v7882_v31  ;;  %5964 = vmatprep.subr.bf16.mxu1 %v7885_v32  ;;  %v7943_v31 = vld [vmem:[#allocation14 + $0x470] ss:$28 sps:$4 sm:$0xff]   ;;  %v7947_v32 = vld [vmem:[#allocation14 + $0x7f8] ss:$28 sps:$4 sm:$0xff]  }
 0x479   :  { %7178 = vmatprep.subr.bf16.mxu0 %v7886_v33  ;;  %v7950_v33 = vld [vmem:[#allocation14 + $0x4ac] ss:$28 sps:$4 sm:$0xff]  }
 0x47b   :  { %6153 = vmatmul.mubr.bf16.vlgmr.msra.gmra.mrb[24].mxu0 %v8624_v23  ;;  %5965 = vmatpush1.bf16.msra.mxu1 %v7883_v18  ;;  %v7951_v18 = vld [vmem:[#allocation14 + $0x9f0] ss:$28 sps:$4 sm:$0xff]  }
 0x47c   :  { %7179 = vmatpush3.bf16.msra.mxu0 %v7887_v38  ;;  %6193 = vmatprep.mubr.bf16.mxu0 %v8630_v37  ;;  %v7948_v38 = vld [vmem:[#allocation14 + $0x4a8] ss:$28 sps:$4 sm:$0xff]  }
 0x47d   :  { %5966 = vmatprep.subr.bf16.mxu1 %v7890_v40  ;;  %7180 = vmatprep.subr.bf16.mxu0 %v7891_v43  ;;  %v7952_v40 = vld [vmem:[#allocation14 + $0x830] ss:$28 sps:$4 sm:$0xff]   ;;  %v7955_v43 = vld [vmem:[#allocation14 + $0x4e4] ss:$28 sps:$4 sm:$0xff]  }
 0x47f   :  { %5967 = vmatpush1.bf16.msra.mxu1 %v7888_v45  ;;  %v7956_v45 = vld [vmem:[#allocation14 + $0xa28] ss:$28 sps:$4 sm:$0xff]  }
 0x480   :  { %7181 = vmatpush3.bf16.msra.mxu0 %v7892_v46  ;;  %5968 = vmatprep.subr.bf16.mxu1 %v7895_v47  ;;  %v7953_v46 = vld [vmem:[#allocation14 + $0x4e0] ss:$28 sps:$4 sm:$0xff]   ;;  %v7957_v47 = vld [vmem:[#allocation14 + $0x868] ss:$28 sps:$4 sm:$0xff]  }
 0x481   :  { %7182 = vmatprep.subr.bf16.mxu0 %v7896_v48  ;;  %v7960_v48 = vld [vmem:[#allocation14 + $0x51c] ss:$28 sps:$4 sm:$0xff]  }
 0x483   :  { %5969 = vmatpush1.bf16.msra.mxu1 %v7893_v52  ;;  %v7961_v52 = vld [vmem:[#allocation14 + $0xa60] ss:$28 sps:$4 sm:$0xff]  }
 0x484   :  { %7183 = vmatpush3.bf16.msra.mxu0 %v7897_v53  ;;  %5970 = vmatprep.subr.bf16.mxu1 %v7900_v54  ;;  %v7958_v53 = vld [vmem:[#allocation14 + $0x518] ss:$28 sps:$4 sm:$0xff]   ;;  %v7962_v54 = vld [vmem:[#allocation14 + $0x8a0] ss:$28 sps:$4 sm:$0xff]  }
 0x485   :  { %7184 = vmatprep.subr.bf16.mxu0 %v7901_v57  ;;  %v7965_v57 = vld [vmem:[#allocation14 + $0x554] ss:$28 sps:$4 sm:$0xff]  }
 0x487   :  { %5971 = vmatpush1.bf16.msra.mxu1 %v7898_v59  ;;  %v7966_v59 = vld [vmem:[#allocation14 + $0xc58] ss:$28 sps:$4 sm:$0xff]  }
 0x488   :  { %7185 = vmatpush3.bf16.msra.mxu0 %v7902_v60  ;;  %5972 = vmatprep.subr.bf16.mxu1 %v7905_v61  ;;  %v7963_v60 = vld [vmem:[#allocation14 + $0x550] ss:$28 sps:$4 sm:$0xff]   ;;  %v7967_v61 = vld [vmem:[#allocation14 + $0xa98] ss:$28 sps:$4 sm:$0xff]  }
 0x489   :  { %7186 = vmatprep.subr.bf16.mxu0 %v7906_v62  ;;  %v7970_v62 = vld [vmem:[#allocation14 + $0x58c] ss:$28 sps:$4 sm:$0xff]  }
 0x48b   :  { %5973 = vmatpush1.bf16.msra.mxu1 %v7903_v63  ;;  %v7971_v63 = vld [vmem:[#allocation14 + $0xc90] ss:$28 sps:$4 sm:$0xff]  }
 0x48c   :  { %7187 = vmatpush3.bf16.msra.mxu0 %v7907_v0  ;;  %5974 = vmatprep.subr.bf16.mxu1 %v7910_v1  ;;  %v7968_v0 = vld [vmem:[#allocation14 + $0x588] ss:$28 sps:$4 sm:$0xff]   ;;  %v7972_v1 = vld [vmem:[#allocation14 + $0xad0] ss:$28 sps:$4 sm:$0xff]  }
 0x48d   :  { %7188 = vmatprep.subr.bf16.mxu0 %v7911_v2  ;;  %v7975_v2 = vld [vmem:[#allocation14 + $0x5c4] ss:$28 sps:$4 sm:$0xff]  }
 0x48f   :  { %5975 = vmatpush1.bf16.msra.mxu1 %v7908_v11  ;;  %v7976_v11 = vld [vmem:[#allocation14 + $0xcc8] ss:$28 sps:$4 sm:$0xff]  }
 0x490   :  { %7189 = vmatpush3.bf16.msra.mxu0 %v7912_v3  ;;  %5976 = vmatprep.subr.bf16.mxu1 %v7915_v4  ;;  %v7973_v3 = vld [vmem:[#allocation14 + $0x5c0] ss:$28 sps:$4 sm:$0xff]   ;;  %v7977_v4 = vld [vmem:[#allocation14 + $0xb08] ss:$28 sps:$4 sm:$0xff]  }
 0x491   :  { %7190 = vmatprep.subr.bf16.mxu0 %v7916_v6  ;;  %v7980_v6 = vld [vmem:[#allocation14 + $0x5fc] ss:$28 sps:$4 sm:$0xff]  }
 0x493   :  { %5977 = vmatpush1.bf16.msra.mxu1 %v7913_v7  ;;  %v7981_v7 = vld [vmem:[#allocation14 + $0xd00] ss:$28 sps:$4 sm:$0xff]  }
 0x494   :  { %7191 = vmatpush3.bf16.msra.mxu0 %v7917_v8  ;;  %5978 = vmatprep.subr.bf16.mxu1 %v7920_v9  ;;  %v7978_v8 = vld [vmem:[#allocation14 + $0x5f8] ss:$28 sps:$4 sm:$0xff]   ;;  %v7982_v9 = vld [vmem:[#allocation14 + $0xb40] ss:$28 sps:$4 sm:$0xff]  }
 0x495   :  { %7192 = vmatprep.subr.bf16.mxu0 %v7921_v12  ;;  %v7985_v12 = vld [vmem:[#allocation14 + $0x634] ss:$28 sps:$4 sm:$0xff]  }
 0x497   :  { %5979 = vmatpush1.bf16.msra.mxu1 %v7918_v13  ;;  %v7986_v13 = vld [vmem:[#allocation14 + $0xd38] ss:$28 sps:$4 sm:$0xff]  }
 0x498   :  { %7193 = vmatpush3.bf16.msra.mxu0 %v7922_v14  ;;  %5991 = vmatprep.subr.bf16.mxu1 %v7925_v34  ;;  %v7983_v14 = vld [vmem:[#allocation14 + $0x630] ss:$28 sps:$4 sm:$0xff]   ;;  %v7987_v34 = vld [vmem:[#allocation14 + $0xb78] ss:$28 sps:$4 sm:$0xff]  }
 0x499   :  { %7200 = vmatprep.subr.bf16.mxu0 %v7926_v10  ;;  %v7990_v10 = vld [vmem:[#allocation14 + $0x66c] ss:$28 sps:$4 sm:$0xff]  }
 0x49a   :  { %5981 = vmatmul.mubr.bf16.vlgmr.msra.gmra.mrb[12].mxu1 %v8624_v23  ;;  %v7937_v23 = vld [vmem:[#allocation14 + $0x788] ss:$28 sps:$4 sm:$0xff]  }
 0x49b   :  { %6194 = vmatmul.mubr.bf16.vlgmr.msra.gmra.mrb[28].mxu0 %v8626_v24  ;;  %5992 = vmatpush1.bf16.msra.mxu1 %v7923_v35  ;;  %v7991_v35 = vld [vmem:[#allocation14 + $0xd70] ss:$28 sps:$4 sm:$0xff]  }
 0x49c   :  { %6023 = vmatprep.mubr.bf16.mxu1 %v8630_v37  ;;  %7201 = vmatpush3.bf16.msra.mxu0 %v7927_v5  ;;  %v7942_v37 = vld [vmem:[#allocation14 + $0x7c0] ss:$28 sps:$4 sm:$0xff]   ;;  %v7988_v5 = vld [vmem:[#allocation14 + $0x668] ss:$28 sps:$4 sm:$0xff]  }
 0x49d   :  { %6234 = vmatprep.mubr.bf16.mxu0 %v8658_v21  ;;  %5993 = vmatprep.subr.bf16.mxu1 %v7930_v15  ;;  %v7992_v15 = vld [vmem:[#allocation14 + $0xbb0] ss:$28 sps:$4 sm:$0xff]  }
 0x49e   :  { %7202 = vmatprep.subr.bf16.mxu0 %v7931_v16  ;;  %v7995_v16 = vld [vmem:[#allocation14 + $0x6a4] ss:$28 sps:$4 sm:$0xff]  }
 0x49f   :  { %5994 = vmatpush1.bf16.msra.mxu1 %v7928_v20  ;;  %v7996_v20 = vld [vmem:[#allocation14 + $0xda8] ss:$28 sps:$4 sm:$0xff]  }
 0x4a0   :  { %7203 = vmatpush3.bf16.msra.mxu0 %v7932_v22  ;;  %5995 = vmatprep.subr.bf16.mxu1 %v7935_v25  ;;  %v7993_v22 = vld [vmem:[#allocation14 + $0x6a0] ss:$28 sps:$4 sm:$0xff]   ;;  %v7997_v25 = vld [vmem:[#allocation14 + $0xbe8] ss:$28 sps:$4 sm:$0xff]  }
 0x4a1   :  { %7204 = vmatprep.subr.bf16.mxu0 %v7936_v26  ;;  %v8000_v26 = vld [vmem:[#allocation14 + $0x6dc] ss:$28 sps:$4 sm:$0xff]  }
 0x4a3   :  { %5996 = vmatpush1.bf16.msra.mxu1 %v7933_v39  ;;  %v8001_v39 = vld [vmem:[#allocation14 + $0xde0] ss:$28 sps:$4 sm:$0xff]  }
 0x4a4   :  { %7205 = vmatpush3.bf16.msra.mxu0 %v7937_v23  ;;  %5997 = vmatprep.subr.bf16.mxu1 %v7940_v27  ;;  %v7998_v23 = vld [vmem:[#allocation14 + $0x6d8] ss:$28 sps:$4 sm:$0xff]   ;;  %v8002_v27 = vld [vmem:[#allocation14 + $0xc20] ss:$28 sps:$4 sm:$0xff]  }
 0x4a5   :  { %7206 = vmatprep.subr.bf16.mxu0 %v7941_v55  ;;  %v8005_v55 = vld [vmem:[#allocation14 + $0x714] ss:$28 sps:$4 sm:$0xff]  }
 0x4a7   :  { %5998 = vmatpush1.bf16.msra.mxu1 %v7938_v28  ;;  %v8003_v28 = vld [vmem:[#allocation14 + $0x710] ss:$28 sps:$4 sm:$0xff]  }
 0x4a8   :  { %7207 = vmatpush3.bf16.msra.mxu0 %v7942_v37  ;;  %5999 = vmatprep.subr.bf16.mxu1 %v7945_v29  ;;  %v8008_v37 = vld [vmem:[#allocation14 + $0x74c] ss:$28 sps:$4 sm:$0xff]  }
 0x4a9   :  { %7208 = vmatprep.subr.bf16.mxu0 %v7946_v30  ;;  %v8006_v29 = vld [vmem:[#allocation14 + $0x748] ss:$28 sps:$4 sm:$0xff]  }
 0x4aa   :  { %v8011_v30 = vld [vmem:[#allocation14 + $0x784] ss:$28 sps:$4 sm:$0xff]  }
 0x4ab   :  { %6000 = vmatpush1.bf16.msra.mxu1 %v7943_v31  ;;  %v8009_v31 = vld [vmem:[#allocation14 + $0x780] ss:$28 sps:$4 sm:$0xff]  }
 0x4ac   :  { %7209 = vmatpush3.bf16.msra.mxu0 %v7947_v32  ;;  %6001 = vmatprep.subr.bf16.mxu1 %v7950_v33  ;;  %v8014_v32 = vld [vmem:[#allocation14 + $0x7bc] ss:$28 sps:$4 sm:$0xff]  }
 0x4ad   :  { %7210 = vmatprep.subr.bf16.mxu0 %v7951_v18  ;;  %v8012_v33 = vld [vmem:[#allocation14 + $0x7b8] ss:$28 sps:$4 sm:$0xff]  }
 0x4ae   :  { %v8017_v18 = vld [vmem:[#allocation14 + $0x7f4] ss:$28 sps:$4 sm:$0xff]  }
 0x4af   :  { %6002 = vmatpush1.bf16.msra.mxu1 %v7948_v38  ;;  %v8015_v38 = vld [vmem:[#allocation14 + $0x7f0] ss:$28 sps:$4 sm:$0xff]  }
 0x4b0   :  { %7211 = vmatpush3.bf16.msra.mxu0 %v7952_v40  ;;  %6003 = vmatprep.subr.bf16.mxu1 %v7955_v43  ;;  %v8018_v40 = vld [vmem:[#allocation14 + $0x828] ss:$28 sps:$4 sm:$0xff]  }
 0x4b1   :  { %7212 = vmatprep.subr.bf16.mxu0 %v7956_v45  ;;  %v8023_v43 = vld [vmem:[#allocation14 + $0x864] ss:$28 sps:$4 sm:$0xff]   ;;  %v8026_v45 = vld [vmem:[#allocation14 + $0x89c] ss:$28 sps:$4 sm:$0xff]  }
 0x4b3   :  { %6004 = vmatpush1.bf16.msra.mxu1 %v7953_v46  ;;  %v8024_v46 = vld [vmem:[#allocation14 + $0x898] ss:$28 sps:$4 sm:$0xff]  }
 0x4b4   :  { %7213 = vmatpush3.bf16.msra.mxu0 %v7957_v47  ;;  %6005 = vmatprep.subr.bf16.mxu1 %v7960_v48  ;;  %v8029_v47 = vld [vmem:[#allocation14 + $0x8d4] ss:$28 sps:$4 sm:$0xff]  }
 0x4b5   :  { %7214 = vmatprep.subr.bf16.mxu0 %v7961_v52  ;;  %v8027_v48 = vld [vmem:[#allocation14 + $0x8d0] ss:$28 sps:$4 sm:$0xff]  }
 0x4b6   :  { %v8032_v52 = vld [vmem:[#allocation14 + $0x90c] ss:$28 sps:$4 sm:$0xff]  }
 0x4b7   :  { %6006 = vmatpush1.bf16.msra.mxu1 %v7958_v53  ;;  %v8030_v53 = vld [vmem:[#allocation14 + $0x908] ss:$28 sps:$4 sm:$0xff]  }
 0x4b8   :  { %7215 = vmatpush3.bf16.msra.mxu0 %v7962_v54  ;;  %6007 = vmatprep.subr.bf16.mxu1 %v7965_v57  ;;  %v8035_v54 = vld [vmem:[#allocation14 + $0x944] ss:$28 sps:$4 sm:$0xff]  }
 0x4b9   :  { %7222 = vmatprep.subr.bf16.mxu0 %v7966_v59  ;;  %v8033_v57 = vld [vmem:[#allocation14 + $0x940] ss:$28 sps:$4 sm:$0xff]  }
 0x4ba   :  { %v8038_v59 = vld [vmem:[#allocation14 + $0x97c] ss:$28 sps:$4 sm:$0xff]  }
 0x4bb   :  { %6235 = vmatmul.mubr.bf16.vlgmr.msra.gmra.mrb[32].mxu0 %v8654_v17  ;;  %6008 = vmatpush1.bf16.msra.mxu1 %v7963_v60  ;;  %v8036_v60 = vld [vmem:[#allocation14 + $0x978] ss:$28 sps:$4 sm:$0xff]  }
 0x4bc   :  { %7223 = vmatpush3.bf16.msra.mxu0 %v7967_v61  ;;  %6275 = vmatprep.mubr.bf16.mxu0 %v8660_v41  ;;  %v8041_v61 = vld [vmem:[#allocation14 + $0x9b4] ss:$28 sps:$4 sm:$0xff]  }
 0x4bd   :  { %6009 = vmatprep.subr.bf16.mxu1 %v7970_v62  ;;  %7224 = vmatprep.subr.bf16.mxu0 %v7971_v63  ;;  %v8039_v62 = vld [vmem:[#allocation14 + $0x9b0] ss:$28 sps:$4 sm:$0xff]  }
 0x4be   :  { %v8044_v63 = vld [vmem:[#allocation14 + $0x9ec] ss:$28 sps:$4 sm:$0xff]  }
 0x4bf   :  { %6010 = vmatpush1.bf16.msra.mxu1 %v7968_v0  ;;  %v8042_v0 = vld [vmem:[#allocation14 + $0x9e8] ss:$28 sps:$4 sm:$0xff]  }
 0x4c0   :  { %7225 = vmatpush3.bf16.msra.mxu0 %v7972_v1  ;;  %6011 = vmatprep.subr.bf16.mxu1 %v7975_v2  ;;  %v8047_v1 = vld [vmem:[#allocation14 + $0xa24] ss:$28 sps:$4 sm:$0xff]  }
 0x4c1   :  { %7226 = vmatprep.subr.bf16.mxu0 %v7976_v11  ;;  %v8045_v2 = vld [vmem:[#allocation14 + $0xa20] ss:$28 sps:$4 sm:$0xff]  }
 0x4c2   :  { %v8050_v11 = vld [vmem:[#allocation14 + $0xa5c] ss:$28 sps:$4 sm:$0xff]  }
 0x4c3   :  { %6012 = vmatpush1.bf16.msra.mxu1 %v7973_v3  ;;  %v8048_v3 = vld [vmem:[#allocation14 + $0xa58] ss:$28 sps:$4 sm:$0xff]  }
 0x4c4   :  { %7227 = vmatpush3.bf16.msra.mxu0 %v7977_v4  ;;  %6013 = vmatprep.subr.bf16.mxu1 %v7980_v6  ;;  %v8053_v4 = vld [vmem:[#allocation14 + $0xa94] ss:$28 sps:$4 sm:$0xff]  }
 0x4c5   :  { %7228 = vmatprep.subr.bf16.mxu0 %v7981_v7  ;;  %v8051_v6 = vld [vmem:[#allocation14 + $0xa90] ss:$28 sps:$4 sm:$0xff]  }
 0x4c6   :  { %v8056_v7 = vld [vmem:[#allocation14 + $0xacc] ss:$28 sps:$4 sm:$0xff]  }
 0x4c7   :  { %6014 = vmatpush1.bf16.msra.mxu1 %v7978_v8  ;;  %v8054_v8 = vld [vmem:[#allocation14 + $0xac8] ss:$28 sps:$4 sm:$0xff]  }
 0x4c8   :  { %7229 = vmatpush3.bf16.msra.mxu0 %v7982_v9  ;;  %6015 = vmatprep.subr.bf16.mxu1 %v7985_v12  ;;  %v8059_v9 = vld [vmem:[#allocation14 + $0xb04] ss:$28 sps:$4 sm:$0xff]  }
 0x4c9   :  { %7230 = vmatprep.subr.bf16.mxu0 %v7986_v13  ;;  %v8057_v12 = vld [vmem:[#allocation14 + $0xb00] ss:$28 sps:$4 sm:$0xff]  }
 0x4ca   :  { %v8062_v13 = vld [vmem:[#allocation14 + $0xb3c] ss:$28 sps:$4 sm:$0xff]  }
 0x4cb   :  { %6016 = vmatpush1.bf16.msra.mxu1 %v7983_v14  ;;  %v8060_v14 = vld [vmem:[#allocation14 + $0xb38] ss:$28 sps:$4 sm:$0xff]  }
 0x4cc   :  { %7231 = vmatpush3.bf16.msra.mxu0 %v7987_v34  ;;  %6017 = vmatprep.subr.bf16.mxu1 %v7990_v10  ;;  %v8065_v34 = vld [vmem:[#allocation14 + $0xb74] ss:$28 sps:$4 sm:$0xff]  }
 0x4cd   :  { %7232 = vmatprep.subr.bf16.mxu0 %v7991_v35  ;;  %v8063_v10 = vld [vmem:[#allocation14 + $0xb70] ss:$28 sps:$4 sm:$0xff]  }
 0x4ce   :  { %v8068_v35 = vld [vmem:[#allocation14 + $0xbac] ss:$28 sps:$4 sm:$0xff]  }
 0x4cf   :  { %6018 = vmatpush1.bf16.msra.mxu1 %v7988_v5  ;;  %v8685_v5 = vld [vmem:[#allocation16] sm:$0xff] }
 0x4d0   :  { %7233 = vmatpush3.bf16.msra.mxu0 %v7992_v15  ;;  %6019 = vmatprep.subr.bf16.mxu1 %v7995_v16  ;;  %v3276_v15 = vrot.slane %v8685_v5, %v8589_v56  ;;  %v8071_v16 = vld [vmem:[#allocation14 + $0xbe4] ss:$28 sps:$4 sm:$0xff]  }
 0x4d1   :  { %7234 = vmatprep.subr.bf16.mxu0 %v7996_v20 }
 0x4d3   :  { %6020 = vmatpush1.bf16.msra.mxu1 %v7993_v22 }
 0x4d4   :  { %7235 = vmatpush3.bf16.msra.mxu0 %v7997_v25  ;;  %6021 = vmatprep.subr.bf16.mxu1 %v8000_v26  ;;  %v3272_v25 = vrot.slane %v8685_v5, %v8544_v44  ;;  %v3280_v26 = vrot.slane %v8685_v5, %v8592_v58 }
 0x4d5   :  { %7236 = vmatprep.subr.bf16.mxu0 %v8001_v39 }
 0x4d7   :  { %6022 = vmatpush1.bf16.msra.mxu1 %v7998_v23 }
 0x4d8   :  { %7237 = vmatpush3.bf16.msra.mxu0 %v8002_v27  ;;  %6034 = vmatprep.subr.bf16.mxu1 %v8005_v55 }
 0x4da   :  { %6024 = vmatmul.mubr.bf16.vlgmr.msra.gmra.mrb[12].mxu1 %v8626_v24  ;;  %v8020_v24 = vld [vmem:[#allocation14 + $0x82c] ss:$28 sps:$4 sm:$0xff]  }
 0x4db   :  { %6276 = vmatmul.mubr.bf16.vlgmr.msra.gmra.mrb[36].mxu0 %v8656_v19  ;;  %6035 = vmatpush1.bf16.msra.mxu1 %v8003_v28  ;;  %v8069_v28 = vld [vmem:[#allocation14 + $0xbe0] ss:$28 sps:$4 sm:$0xff]  }
 0x4dc   :  { %6066 = vmatprep.mubr.bf16.mxu1 %v8658_v21  ;;  %6036 = vmatprep.subr.bf16.mxu1 %v8008_v37  ;;  %v8021_v21 = vld [vmem:[#allocation14 + $0x860] ss:$28 sps:$4 sm:$0xff]  }
 0x4df   :  { %6037 = vmatpush1.bf16.msra.mxu1 %v8006_v29 }
 0x4e0   :  { %6038 = vmatprep.subr.bf16.mxu1 %v8011_v30 }
 0x4e3   :  { %6039 = vmatpush1.bf16.msra.mxu1 %v8009_v31 }
 0x4e4   :  { %6040 = vmatprep.subr.bf16.mxu1 %v8014_v32  ;;  %v8074_v32 = vld [vmem:[#allocation14 + $0xc1c] ss:$28 sps:$4 sm:$0xff]  }
 0x4e7   :  { %6041 = vmatpush1.bf16.msra.mxu1 %v8012_v33 }
 0x4e8   :  { %6042 = vmatprep.subr.bf16.mxu1 %v8017_v18 }
 0x4eb   :  { %6043 = vmatpush1.bf16.msra.mxu1 %v8015_v38 }
 0x4ec   :  { %6044 = vmatprep.subr.bf16.mxu1 %v8020_v24 }
 0x4ef   :  { %6045 = vmatpush1.bf16.msra.mxu1 %v8018_v40 }
 0x4f0   :  { %6046 = vmatprep.subr.bf16.mxu1 %v8023_v43 }
 0x4f3   :  { %6047 = vmatpush1.bf16.msra.mxu1 %v8021_v21  ;;  %v8072_v21 = vld [vmem:[#allocation14 + $0xc18] ss:$28 sps:$4 sm:$0xff]  }
 0x4f4   :  { %6048 = vmatprep.subr.bf16.mxu1 %v8026_v45  ;;  %v8077_v45 = vld [vmem:[#allocation14 + $0xc54] ss:$28 sps:$4 sm:$0xff]  }
 0x4f7   :  { %6049 = vmatpush1.bf16.msra.mxu1 %v8024_v46  ;;  %v8075_v46 = vld [vmem:[#allocation14 + $0xc50] ss:$28 sps:$4 sm:$0xff]  }
 0x4f8   :  { %6050 = vmatprep.subr.bf16.mxu1 %v8029_v47  ;;  %v8080_v47 = vld [vmem:[#allocation14 + $0xc8c] ss:$28 sps:$4 sm:$0xff]  }
 0x4fb   :  { %6051 = vmatpush1.bf16.msra.mxu1 %v8027_v48  ;;  %v8078_v48 = vld [vmem:[#allocation14 + $0xc88] ss:$28 sps:$4 sm:$0xff]  }
 0x4fc   :  { %6052 = vmatprep.subr.bf16.mxu1 %v8032_v52  ;;  %v8083_v52 = vld [vmem:[#allocation14 + $0xcc4] ss:$28 sps:$4 sm:$0xff]  }
 0x4ff   :  { %6053 = vmatpush1.bf16.msra.mxu1 %v8030_v53 }
 0x500   :  { %6054 = vmatprep.subr.bf16.mxu1 %v8035_v54  ;;  %v8081_v54 = vld [vmem:[#allocation14 + $0xcc0] ss:$28 sps:$4 sm:$0xff]  }
 0x503   :  { %6055 = vmatpush1.bf16.msra.mxu1 %v8033_v57 }
 0x504   :  { %6056 = vmatprep.subr.bf16.mxu1 %v8038_v59  ;;  %v8086_v59 = vld [vmem:[#allocation14 + $0xcfc] ss:$28 sps:$4 sm:$0xff]  }
 0x507   :  { %6057 = vmatpush1.bf16.msra.mxu1 %v8036_v60 }
 0x508   :  { %6058 = vmatprep.subr.bf16.mxu1 %v8041_v61 }
 0x50b   :  { %6059 = vmatpush1.bf16.msra.mxu1 %v8039_v62 }
 0x50c   :  { %6060 = vmatprep.subr.bf16.mxu1 %v8044_v63 }
 0x50f   :  { %6061 = vmatpush1.bf16.msra.mxu1 %v8042_v0 }
 0x510   :  { %6062 = vmatprep.subr.bf16.mxu1 %v8047_v1 }
 0x513   :  { %6063 = vmatpush1.bf16.msra.mxu1 %v8045_v2  ;;  %v8084_v2 = vld [vmem:[#allocation14 + $0xcf8] ss:$28 sps:$4 sm:$0xff]  }
 0x514   :  { %6064 = vmatprep.subr.bf16.mxu1 %v8050_v11  ;;  %v8089_v11 = vld [vmem:[#allocation14 + $0xd34] ss:$28 sps:$4 sm:$0xff]  }
 0x517   :  { %6065 = vmatpush1.bf16.msra.mxu1 %v8048_v3  ;;  %v8087_v3 = vld [vmem:[#allocation14 + $0xd30] ss:$28 sps:$4 sm:$0xff]  }
 0x518   :  { %6077 = vmatprep.subr.bf16.mxu1 %v8053_v4  ;;  %v8092_v4 = vld [vmem:[#allocation14 + $0xd6c] ss:$28 sps:$4 sm:$0xff]  }
 0x51a   :  { %6067 = vmatmul.mubr.bf16.vlgmr.msra.gmra.mrb[12].mxu1 %v8654_v17  ;;  %v8066_v17 = vld [vmem:[#allocation14 + $0xba8] ss:$28 sps:$4 sm:$0xff]  }
 0x51b   :  { %6078 = vmatpush1.bf16.msra.mxu1 %v8051_v6  ;;  %6109 = vmatprep.mubr.bf16.mxu1 %v8660_v41  ;;  %v3268_v41 = vrot.slane %v8685_v5, %v8541_v42  ;;  %v8090_v6 = vld [vmem:[#allocation14 + $0xd68] ss:$28 sps:$4 sm:$0xff]  }
 0x51c   :  { %6079 = vmatprep.subr.bf16.mxu1 %v8056_v7  ;;  %v8095_v7 = vld [vmem:[#allocation14 + $0xda4] ss:$28 sps:$4 sm:$0xff]  }
 0x51f   :  { %6080 = vmatpush1.bf16.msra.mxu1 %v8054_v8 }
 0x520   :  { %6081 = vmatprep.subr.bf16.mxu1 %v8059_v9 }
 0x523   :  { %6082 = vmatpush1.bf16.msra.mxu1 %v8057_v12  ;;  %v8093_v12 = vld [vmem:[#allocation14 + $0xda0] ss:$28 sps:$4 sm:$0xff]  }
 0x524   :  { %6083 = vmatprep.subr.bf16.mxu1 %v8062_v13 }
 0x527   :  { %6084 = vmatpush1.bf16.msra.mxu1 %v8060_v14 }
 0x528   :  { %6085 = vmatprep.subr.bf16.mxu1 %v8065_v34  ;;  %v8098_v34 = vld [vmem:[#allocation14 + $0xddc] ss:$28 sps:$4 sm:$0xff]  }
 0x52b   :  { %6086 = vmatpush1.bf16.msra.mxu1 %v8063_v10 }
 0x52c   :  { %6087 = vmatprep.subr.bf16.mxu1 %v8068_v35 }
 0x52d   :  { %v5767_v20 = vpop.f32.mrb[8].mxu1  ;;  %v5939_v22 = vpop.f32.mrb[20].mxu0 }
 0x52e   :  { %v5769_v39 = vpop.f32.mrb[9].mxu1  ;;  %v5941_v23 = vpop.f32.mrb[21].mxu0  ;;  %v7260_v42 = vadd.f32 %v5767_v20, %v3268_v41  ;;  %v7264_v37 = vadd.f32 %v5939_v22, %v3276_v15 }
 0x52f   :  { %v5771_v27 = vpop.f32.mrb[10].mxu1  ;;  %v5943_v55 = vpop.f32.mrb[22].mxu0  ;;  %6088 = vmatpush1.bf16.msra.mxu1 %v8066_v17  ;;  %v7261_v33 = vadd.f32 %v5769_v39, %v3272_v25  ;;  %v7265_v18 = vadd.f32 %v5941_v23, %v3280_v26  ;;  %v8096_v17 = vld [vmem:[#allocation14 + $0xdd8] ss:$28 sps:$4 sm:$0xff]  }
 0x530   :  { %v7262_v29 = vadd.f32 %v5771_v27, %v3268_v41  ;;  %v7266_v56 = vadd.f32 %v5943_v55, %v3276_v15  ;;  %v5773_v30 = vpop.f32.mrb[11].mxu1  ;;  %v5945_v31 = vpop.f32.mrb[23].mxu0  ;;  %6089 = vmatprep.subr.bf16.mxu1 %v8071_v16  ;;  %v3292_v41 = vrot.slane %v8685_v5, %v1089_v50 }
 0x531   :  { %v7263_v44 = vadd.f32 %v5773_v30, %v3272_v25  ;;  %v7267_v38 = vadd.f32 %v5945_v31, %v3280_v26 }
 0x532   :  { %v6284_v24 = vpack.c.bf16 %v7262_v29, %v7260_v42  ;;  %v6286_v58 = vpack.c.bf16 %v7266_v56, %v7264_v37 }
 0x533   :  { %v6285_v40 = vpack.c.bf16 %v7263_v44, %v7261_v33  ;;  %v6287_v43 = vpack.c.bf16 %v7267_v38, %v7265_v18  ;;  %6090 = vmatpush1.bf16.msra.mxu1 %v8069_v28 }
 0x534   :  { %8099 = vtanh.bf16 %v6284_v24  ;;  %6091 = vmatprep.subr.bf16.mxu1 %v8074_v32 }
 0x535   :  { %8101 = vtanh.bf16 %v6286_v58 }
 0x536   :  { %8103 = vtanh.bf16 %v6285_v40 }
 0x537   :  { %8105 = vtanh.bf16 %v6287_v43  ;;  %6092 = vmatpush1.bf16.msra.mxu1 %v8072_v21 }
 0x538   :  { %6093 = vmatprep.subr.bf16.mxu1 %v8077_v45 }
 0x53b   :  { %6094 = vmatpush1.bf16.msra.mxu1 %v8075_v46  ;;  %v3284_v46 = vrot.slane %v8685_v5, %v1081_v49 }
 0x53c   :  { %6095 = vmatprep.subr.bf16.mxu1 %v8080_v47 }
 0x53f   :  { %v8100_v53 = vpop.eup %8099  ;;  %6096 = vmatpush1.bf16.msra.mxu1 %v8078_v48  ;;  %v3288_v48 = vrot.slane %v8685_v5, %v1085_v51 }
 0x540   :  { %v8102_v57 = vpop.eup %8101  ;;  %6097 = vmatprep.subr.bf16.mxu1 %v8083_v52 }
 0x541   :  { %v8104_v60 = vpop.eup %8103 }
 0x542   :  { %v8106_v61 = vpop.eup %8105  ;;  %v7148_v62 = vcombine.low %v8100_v53, %v8104_v60  ;;  %v7152_v63 = vcombine.high %v8100_v53, %v8104_v60 }
 0x543   :  { %v7149_v0 = vcombine.low %v8102_v57, %v8106_v61  ;;  %v7153_v1 = vcombine.high %v8102_v57, %v8106_v61  ;;  %6098 = vmatpush1.bf16.msra.mxu1 %v8081_v54 }
 0x544   :  { %6335 = vst [vmem:[#allocation17] sm:$0xff] %v7148_v62  ;;  %6339 = vst [vmem:[#allocation17 + $0x1c] sm:$0xff] %v7152_v63  ;;  %6099 = vmatprep.subr.bf16.mxu1 %v8086_v59 }
 0x545   :  { %6336 = vst [vmem:[#allocation17 + $0x8] sm:$0xff] %v7149_v0  ;;  %6340 = vst [vmem:[#allocation17 + $0x24] sm:$0xff] %v7153_v1 }
 0x547   :  { %6100 = vmatpush1.bf16.msra.mxu1 %v8084_v2 }
 0x548   :  { %6101 = vmatprep.subr.bf16.mxu1 %v8089_v11 }
 0x54b   :  { %6102 = vmatpush1.bf16.msra.mxu1 %v8087_v3 }
 0x54c   :  { %6103 = vmatprep.subr.bf16.mxu1 %v8092_v4 }
 0x54e   :  { %v7172_v8 = vpop.f32.mrb[24].mxu0 }
 0x54f   :  { %v7173_v9 = vpop.f32.mrb[25].mxu0  ;;  %6104 = vmatpush1.bf16.msra.mxu1 %v8090_v6 }
 0x550   :  { %v7174_v13 = vadd.f32 %v7173_v9, %v7172_v8  ;;  %v7175_v14 = vpop.f32.mrb[26].mxu0  ;;  %6105 = vmatprep.subr.bf16.mxu1 %v8095_v7 }
 0x551   :  { %v7176_v10 = vpop.f32.mrb[27].mxu0 }
 0x552   :  { %v7177_v35 = vadd.f32 %v7176_v10, %v7175_v14  ;;  %v6155_v20 = vadd.f32 %v7174_v13, %v3292_v41 }
 0x553   :  { %6106 = vmatpush1.bf16.msra.mxu1 %v8093_v12 }
 0x554   :  { %6107 = vmatprep.subr.bf16.mxu1 %v8098_v34  ;;  %v6158_v39 = vadd.f32 %v7177_v35, %v3292_v41 }
 0x557   :  { %6108 = vmatpush1.bf16.msra.mxu1 %v8096_v17 }
 0x55a   :  { %6110 = vmatmul.mubr.bf16.vlgmr.msra.gmra.mrb[12].mxu1 %v8656_v19 }
 0x56e   :  { %v7194_v15 = vpop.f32.mrb[28].mxu0 }
 0x56f   :  { %v7195_v16 = vpop.f32.mrb[29].mxu0 }
 0x570   :  { %v7196_v22 = vadd.f32 %v7195_v16, %v7194_v15  ;;  %v7197_v25 = vpop.f32.mrb[30].mxu0 }
 0x571   :  { %v7198_v26 = vpop.f32.mrb[31].mxu0 }
 0x572   :  { %v6196_v23 = vadd.f32 %v7196_v22, %v6155_v20  ;;  %v7199_v27 = vadd.f32 %v7198_v26, %v7197_v25 }
 0x574   :  { %v6199_v55 = vadd.f32 %v7199_v27, %v6158_v39 }
 0x58e   :  { %v7216_v28 = vpop.f32.mrb[32].mxu0 }
 0x58f   :  { %v7217_v42 = vpop.f32.mrb[33].mxu0 }
 0x590   :  { %v7218_v37 = vadd.f32 %v7217_v42, %v7216_v28  ;;  %v7219_v29 = vpop.f32.mrb[34].mxu0 }
 0x591   :  { %v7220_v56 = vpop.f32.mrb[35].mxu0 }
 0x592   :  { %v6237_v19 = vadd.f32 %v7218_v37, %v6196_v23  ;;  %v7221_v30 = vadd.f32 %v7220_v56, %v7219_v29 }
 0x594   :  { %v6240_v31 = vadd.f32 %v7221_v30, %v6199_v55 }
 0x5ae   :  { %v7238_v32 = vpop.f32.mrb[36].mxu0 }
 0x5af   :  { %v7239_v50 = vpop.f32.mrb[37].mxu0 }
 0x5b0   :  { %v7240_v33 = vadd.f32 %v7239_v50, %v7238_v32  ;;  %v7241_v18 = vpop.f32.mrb[38].mxu0 }
 0x5b1   :  { %v7242_v44 = vpop.f32.mrb[39].mxu0 }
 0x5b2   :  { %v6278_v38 = vadd.f32 %v7240_v33, %v6237_v19  ;;  %v7243_v24 = vadd.f32 %v7242_v44, %v7241_v18 }
 0x5b4   :  { %v6281_v58 = vadd.f32 %v7243_v24, %v6240_v31 }
 0x5b6   :  { %v6290_v40 = vpack.c.bf16 %v6281_v58, %v6278_v38 }
 0x5b8   :  { %8107 = vtanh.bf16 %v6290_v40 }
 0x5c3   :  { %v8108_v43 = vpop.eup %8107 }
 0x5c4   :  { %v7151_v21 = vcombine.low %v8108_v43, %v8108_v43  ;;  %v7155_v45 = vcombine.high %v8108_v43, %v8108_v43 }
 0x5c6   :  { %6338 = vst [vmem:[#allocation17 + $0x18] sm:$0xf] %v7151_v21  ;;  %6342 = vst [vmem:[#allocation17 + $0x34] sm:$0xf] %v7155_v45 }
 0x62d   :  { %v6111_v47 = vpop.f32.mrb[12].mxu1 }
 0x62e   :  { %v6113_v52 = vpop.f32.mrb[13].mxu1  ;;  %v7268_v54 = vadd.f32 %v6111_v47, %v3284_v46 }
 0x62f   :  { %v6115_v53 = vpop.f32.mrb[14].mxu1  ;;  %v7269_v60 = vadd.f32 %v6113_v52, %v3288_v48 }
 0x630   :  { %v7270_v57 = vadd.f32 %v6115_v53, %v3284_v46  ;;  %v6117_v59 = vpop.f32.mrb[15].mxu1 }
 0x631   :  { %v7271_v61 = vadd.f32 %v6117_v59, %v3288_v48 }
 0x632   :  { %v6288_v62 = vpack.c.bf16 %v7270_v57, %v7268_v54 }
 0x633   :  { %v6289_v63 = vpack.c.bf16 %v7271_v61, %v7269_v60 }
 0x634   :  { %8109 = vtanh.bf16 %v6288_v62 }
 0x635   :  { %8111 = vtanh.bf16 %v6289_v63 }
 0x63f   :  { %v8110_v0 = vpop.eup %8109 }
 0x640   :  { %v8112_v49 = vpop.eup %8111 }
 0x641   :  { %v7150_v1 = vcombine.low %v8110_v0, %v8112_v49  ;;  %v7154_v2 = vcombine.high %v8110_v0, %v8112_v49 }
 0x643   :  { %6337 = vst [vmem:[#allocation17 + $0x10] sm:$0xff] %v7150_v1  ;;  %6341 = vst [vmem:[#allocation17 + $0x2c] sm:$0xff] %v7154_v2 }
 0x644   :  { %8322 = shalt.err (!%p8319_p6)
}
 0x645   :  { %s8323_s10 = scalar_lea.hbm %s8729_s9, 896 }
 0x646   :  { %p8324_p7 = scmp.ne.s32.totalorder %s8729_s9, %s8323_s10  ;;  %p8327_p8 = scmp.lt.u32.totalorder %s8323_s10, %s8729_s9 }
 0x648   :  { %p8329_p9 = pnand %p8327_p8, %p8324_p7 }
 0x64a   :  { %8332 = shalt.err (!%p8329_p9)
}
 0x64b   :  { %6354 = dma.vmem_to_hbm [thread:$0]  %s6349_s7, 896, %s8729_s9, [#allocation4], %s8355_s5, %s8355_s5, %s8356_s17  }
 0x64c   :  { %8343 = dma.done.wait [#allocation4], 896  }
 0x64d   :  { %8344 = vsyncadd [#allocation4], 4294966400 }
 0x64e   :  { %6358 = vsyncpa [#allocation3], 1 }
 0x64f   :  { %6359 = vsyncpa [#allocation6], 1 }
 0x650   :  { %6360 = vsyncpa [#allocation9], 1 }
 0x651   :  { %6361 = vsyncpa [#allocation12], 1 }
 0x652   :  { %6362 = vsyncpa [#allocation15], 1 }
 0x653   :  { %6363 = vsyncpa [#allocation4], 1 }

</bundles_post_ra>
